<compile_context>
chip_gen: v5e
topology: v5e:2x2
jax: 0.10.0
libtpu: 0.0.40
codegen_flags: <defaults>
</compile_context>

<pallas_src>
import functools
import math

import jax
import jax.numpy as jnp
from jax import lax
from jax.experimental import pallas as pl
from jax.experimental.pallas import tpu as pltpu

BN_EPS = 1e-5
TILE = 512  # elements of the big (im2col-row) dimension processed per grid step


def _round_up(x, m):
    return (x + m - 1) // m * m


# ----------------------------- Pallas kernel ------------------------------ #

def _fused_kernel(*refs, apply_relu, has_residual):
    """o = maybe_relu(a @ b + bias (+ residual)); bf16 dot, f32 accumulate."""
    if has_residual:
        a_ref, b_ref, bias_ref, r_ref, o_ref = refs
    else:
        a_ref, b_ref, bias_ref, o_ref = refs
    acc = jnp.dot(a_ref[...], b_ref[...], preferred_element_type=jnp.float32)
    acc = acc + bias_ref[...]
    if has_residual:
        acc = acc + r_ref[...]
    if apply_relu:
        acc = jnp.maximum(acc, 0.0)
    o_ref[...] = acc


def _pallas_fused(ops, in_specs, out_shape, out_spec, grid, apply_relu, has_res):
    return pl.pallas_call(
        functools.partial(_fused_kernel, apply_relu=apply_relu,
                          has_residual=has_res),
        out_shape=out_shape,
        grid_spec=pltpu.PrefetchScalarGridSpec(
            num_scalar_prefetch=0,
            grid=grid,
            in_specs=in_specs,
            out_specs=out_spec),
        compiler_params=pltpu.CompilerParams(
            dimension_semantics=("parallel",)),
    )(*ops)


def _fused_small_cout(patches, w, bias, residual, apply_relu):
    """Transposed orientation (Cout < 128): out_T[C, M] = W_T[C,K] @ X_T[K,M].

    Big M goes on the lane axis (lane-dense, unmasked stores); Cout only pads
    to the sublane tile (16 for bf16) instead of 128.
    """
    M, K = patches.shape
    C = w.shape[1]
    Kp = _round_up(K, 128)
    Cp = _round_up(C, 16)
    tn = min(TILE, _round_up(M, 128))
    Mp = _round_up(M, tn)

    wT = jnp.pad(w.T.astype(jnp.bfloat16), ((0, Cp - C), (0, Kp - K)))
    xT = jnp.pad(patches.T.astype(jnp.bfloat16), ((0, Kp - K), (0, Mp - M)))
    b2 = jnp.pad(bias.astype(jnp.float32)[:, None], ((0, Cp - C), (0, 0)))

    ops = [wT, xT, b2]
    in_specs = [
        pl.BlockSpec((Cp, Kp), lambda i: (0, 0)),   # BN-scaled weights, resident
        pl.BlockSpec((Kp, tn), lambda i: (0, i)),   # im2col patches, streamed
        pl.BlockSpec((Cp, 1), lambda i: (0, 0)),    # BN shift (bias), resident
    ]
    has_res = residual is not None
    if has_res:
        rT = jnp.pad(residual.T.astype(jnp.float32), ((0, Cp - C), (0, Mp - M)))
        ops.append(rT)
        in_specs.append(pl.BlockSpec((Cp, tn), lambda i: (0, i)))

    out = _pallas_fused(
        ops, in_specs,
        jax.ShapeDtypeStruct((Cp, Mp), jnp.float32),
        pl.BlockSpec((Cp, tn), lambda i: (0, i)),
        (Mp // tn,), apply_relu, has_res)
    return out[:C, :M].T


def _fused_large_cout(patches, w, bias, residual, apply_relu):
    """Standard orientation (Cout >= 128): out[M, C] = X[M,K] @ W[K,C]."""
    M, K = patches.shape
    C = w.shape[1]
    Kp = _round_up(K, 128)
    Cp = _round_up(C, 128)
    tm = min(TILE, _round_up(M, 128))
    Mp = _round_up(M, tm)

    xp = jnp.pad(patches.astype(jnp.bfloat16), ((0, Mp - M), (0, Kp - K)))
    wp = jnp.pad(w.astype(jnp.bfloat16), ((0, Kp - K), (0, Cp - C)))
    b2 = jnp.pad(bias.astype(jnp.float32)[None, :], ((0, 0), (0, Cp - C)))

    ops = [xp, wp, b2]
    in_specs = [
        pl.BlockSpec((tm, Kp), lambda i: (i, 0)),
        pl.BlockSpec((Kp, Cp), lambda i: (0, 0)),
        pl.BlockSpec((1, Cp), lambda i: (0, 0)),
    ]
    has_res = residual is not None
    if has_res:
        rp = jnp.pad(residual.astype(jnp.float32), ((0, Mp - M), (0, Cp - C)))
        ops.append(rp)
        in_specs.append(pl.BlockSpec((tm, Cp), lambda i: (i, 0)))

    out = _pallas_fused(
        ops, in_specs,
        jax.ShapeDtypeStruct((Mp, Cp), jnp.float32),
        pl.BlockSpec((tm, Cp), lambda i: (i, 0)),
        (Mp // tm,), apply_relu, has_res)
    return out[:M, :C]


def fused_matmul_bias(patches, w, bias, residual=None, apply_relu=True):
    """maybe_relu(patches @ w + bias (+ residual)) -> [M, C] float32."""
    if w.shape[1] < 128:
        return _fused_small_cout(patches, w, bias, residual, apply_relu)
    return _fused_large_cout(patches, w, bias, residual, apply_relu)


# ------------------------------- conv glue -------------------------------- #

def _im2col3x3(x, stride):
    """x:[N,H,W,C] f32 -> bf16 patches [N*Ho*Wo, 9*C] (order ky,kx,c), pad=1."""
    N, H, W, C = x.shape
    Ho = (H + 2 - 3) // stride + 1
    Wo = (W + 2 - 3) // stride + 1
    xp = jnp.pad(x.astype(jnp.bfloat16), ((0, 0), (1, 1), (1, 1), (0, 0)))
    cols = []
    for ky in range(3):
        for kx in range(3):
            cols.append(xp[:, ky:ky + stride * (Ho - 1) + 1:stride,
                           kx:kx + stride * (Wo - 1) + 1:stride, :])
    patches = jnp.stack(cols, axis=3)  # [N,Ho,Wo,9,C]
    return patches.reshape(N * Ho * Wo, 9 * C), (N, Ho, Wo)


def _bn_fold(w2, bn):
    """Fold inference BN into matmul weights + bias.  w2: [K, Cout]."""
    gamma, beta, mean, var = bn
    scale = gamma / jnp.sqrt(var + BN_EPS)
    return w2 * scale[None, :], beta - mean * scale


def conv3x3_bn(x, w, bn, stride, residual=None, apply_relu=True):
    """x NHWC f32, w torch layout [Cout,Cin,3,3]."""
    patches, (N, Ho, Wo) = _im2col3x3(x, stride)
    Cout = w.shape[0]
    w2 = jnp.transpose(w, (2, 3, 1, 0)).reshape(-1, Cout)   # (ky,kx,cin) x cout
    w2, bias = _bn_fold(w2, bn)
    res = None if residual is None else residual.reshape(N * Ho * Wo, Cout)
    out = fused_matmul_bias(patches, w2, bias, res, apply_relu)
    return out.reshape(N, Ho, Wo, Cout)


def conv1x1_bn(x, w, bn, stride):
    """1x1 shortcut conv + BN (no relu). w:[Cout,Cin,1,1]."""
    N, H, W, C = x.shape
    xs = x[:, ::stride, ::stride, :]
    _, Ho, Wo, _ = xs.shape
    Cout = w.shape[0]
    w2, bias = _bn_fold(jnp.transpose(w.reshape(Cout, C), (1, 0)), bn)
    out = fused_matmul_bias(xs.reshape(N * Ho * Wo, C), w2, bias,
                            residual=None, apply_relu=False)
    return out.reshape(N, Ho, Wo, Cout)


def basic_block(x, p, stride):
    h = conv3x3_bn(x, p['conv1_w'], p['bn1'], stride, apply_relu=True)
    sc = conv1x1_bn(x, p['sc_w'], p['sc_bn'], stride) if 'sc_w' in p else x
    # conv2 + bn2 + residual add + relu fused into a single Pallas call.
    # TODO(synk): fuse conv1 and the 1x1 shortcut into one pallas_call sharing
    # the resident input tile (two outputs) to cut an activation round trip.
    return conv3x3_bn(h, p['conv2_w'], p['bn2'], 1, residual=sc, apply_relu=True)


def avg_pool2d_4(x):
    N, H, W, C = x.shape
    Ho, Wo = H // 4, W // 4
    x = x[:, :Ho * 4, :Wo * 4, :].reshape(N, Ho, 4, Wo, 4, C)
    return x.mean(axis=(2, 4))


def resnet_forward(params, strides_per_layer, x_nchw, global_pooling):
    assert x_nchw.ndim == 4, 'Assuming x.view(bsz, C, W, H)'
    x = jnp.transpose(x_nchw, (0, 2, 3, 1))  # NCHW -> NHWC (channels on lanes)
    out = conv3x3_bn(x, params['conv1_w'], params['bn1'], 1, apply_relu=True)
    for layer_params, layer_strides in zip(params['layers'], strides_per_layer):
        for bp, s in zip(layer_params, layer_strides):
            out = basic_block(out, bp, s)
    if global_pooling:
        out = avg_pool2d_4(out)
    # flatten in NCHW order to match torch's out.view(bsz, -1)
    out = jnp.transpose(out, (0, 3, 1, 2))
    return out.reshape(out.shape[0], -1)


# ----------------------- deterministic parameter init --------------------- #

def _make_bn(key, c):
    k1, k2, k3, k4 = jax.random.split(key, 4)
    gamma = 1.0 + 0.1 * jax.random.normal(k1, (c,), jnp.float32)
    beta = 0.1 * jax.random.normal(k2, (c,), jnp.float32)
    mean = 0.1 * jax.random.normal(k3, (c,), jnp.float32)
    var = 1.0 + 0.1 * jnp.abs(jax.random.normal(k4, (c,), jnp.float32))
    return (gamma, beta, mean, var)


def _make_conv(key, cout, cin, k):
    std = 1.0 / math.sqrt(cin * k * k)
    return std * jax.random.normal(key, (cout, cin, k, k), jnp.float32)


def init_params(key, nf, num_blocks):
    keys = iter(jax.random.split(key, 256))
    params = {'conv1_w': _make_conv(next(keys), nf, 3, 3),
              'bn1': _make_bn(next(keys), nf)}
    in_planes = nf
    layers, strides_per_layer = [], []
    for mult, nb, stride0 in zip([1, 2, 4, 8], num_blocks, [1, 2, 2, 2]):
        planes = nf * mult
        strides = [stride0] + [1] * (nb - 1)
        layer = []
        for s in strides:
            bp = {'conv1_w': _make_conv(next(keys), planes, in_planes, 3),
                  'bn1': _make_bn(next(keys), planes),
                  'conv2_w': _make_conv(next(keys), planes, planes, 3),
                  'bn2': _make_bn(next(keys), planes)}
            if s != 1 or in_planes != planes:
                bp['sc_w'] = _make_conv(next(keys), planes, in_planes, 1)
                bp['sc_bn'] = _make_bn(next(keys), planes)
            layer.append(bp)
            in_planes = planes
        layers.append(layer)
        strides_per_layer.append(strides)
    params['layers'] = layers
    return params, strides_per_layer


# --------------------------- pure-JAX reference ---------------------------- #

def _ref_conv(x, w, stride, padding):
    wh = jnp.transpose(w, (2, 3, 1, 0))  # OIHW -> HWIO
    return lax.conv_general_dilated(x, wh, (stride, stride),
                                    ((padding, padding), (padding, padding)),
                                    dimension_numbers=('NHWC', 'HWIO', 'NHWC'))


def _ref_bn(x, bn):
    gamma, beta, mean, var = bn
    return (x - mean) / jnp.sqrt(var + BN_EPS) * gamma + beta


def _ref_block(x, p, stride):
    h = jax.nn.relu(_ref_bn(_ref_conv(x, p['conv1_w'], stride, 1), p['bn1']))
    sc = _ref_bn(_ref_conv(x, p['sc_w'], stride, 0), p['sc_bn']) if 'sc_w' in p else x
    return jax.nn.relu(_ref_bn(_ref_conv(h, p['conv2_w'], 1, 1), p['bn2']) + sc)


def ref_forward(params, strides_per_layer, x_nchw, global_pooling):
    x = jnp.transpose(x_nchw, (0, 2, 3, 1))
    out = jax.nn.relu(_ref_bn(_ref_conv(x, params['conv1_w'], 1, 1), params['bn1']))
    for layer_params, layer_strides in zip(params['layers'], strides_per_layer):
        for bp, s in zip(layer_params, layer_strides):
            out = _ref_block(out, bp, s)
    if global_pooling:
        out = avg_pool2d_4(out)
    out = jnp.transpose(out, (0, 3, 1, 2))
    return out.reshape(out.shape[0], -1)


# ----------------------------------- main ---------------------------------- #

if __name__ == "__main__":
    nf = 8
    num_blocks = [1, 1, 1, 1]
    global_pooling = True

    x = jax.random.normal(jax.random.PRNGKey(0), (2, 3, 32, 32), jnp.float32)  # NCHW
    params, strides_per_layer = init_params(jax.random.PRNGKey(42), nf, num_blocks)

    fwd = jax.jit(lambda p, xx: resnet_forward(p, strides_per_layer, xx,
                                               global_pooling))
    ref_fwd = jax.jit(lambda p, xx: ref_forward(p, strides_per_layer, xx,
                                                global_pooling))

    out = jax.block_until_ready(fwd(params, x))
    ref = jax.block_until_ready(ref_fwd(params, x))

    assert out.shape == (2, nf * 8), out.shape
    max_err = float(jnp.max(jnp.abs(out - ref)))
    ref_scale = float(jnp.max(jnp.abs(ref)))
    tol = 1e-1 * max(1.0, ref_scale)  # bf16 matmuls through 9 convs vs f32 ref
    if max_err > tol:
        raise AssertionError(
            f"Pallas output mismatch vs JAX reference: {max_err} (tol {tol})")
    print("KERNEL_OK")
</pallas_src>

<mosaic_0001>
module attributes {stable_mosaic.version = 11 : i64} {
  func.func @_fused_kernel(%arg0: i32, %arg1: memref<16x128xbf16, #tpu.memory_space<vmem>>, %arg2: memref<128x512xbf16, #tpu.memory_space<vmem>>, %arg3: memref<16x1xf32, #tpu.memory_space<vmem>>, %arg4: memref<16x512xf32, #tpu.memory_space<vmem>>) attributes {dimension_semantics = [#tpu.dimension_semantics<parallel>], iteration_bounds = array<i64: 4>, scalar_prefetch = 0 : i64, scratch_operands = 0 : i64, tpu.core_type = #tpu.core_type<tc>, window_params = [{pipeline_mode = #tpu.pipeline_mode<synchronous>, transform_indices = @transform_0, window_bounds = array<i64: 16, 128>}, {transform_indices = @transform_1, window_bounds = array<i64: 128, 512>}, {pipeline_mode = #tpu.pipeline_mode<synchronous>, transform_indices = @transform_2, window_bounds = array<i64: 16, 1>}, {transform_indices = @transform_3, window_bounds = array<i64: 16, 512>}]} {
    %c0 = arith.constant 0 : index
    %c0_0 = arith.constant 0 : index
    %0 = vector.load %arg1[%c0, %c0_0] : memref<16x128xbf16, #tpu.memory_space<vmem>>, vector<16x128xbf16>
    %c0_1 = arith.constant 0 : index
    %c0_2 = arith.constant 0 : index
    %1 = vector.load %arg2[%c0_1, %c0_2] : memref<128x512xbf16, #tpu.memory_space<vmem>>, vector<128x512xbf16>
    %cst = arith.constant dense<0.000000e+00> : vector<16x512xf32>
    %2 = tpu.matmul %0, %1, %cst {dimension_numbers = #tpu.dot_dimension_numbers<[1], [0], [0], [1], [0, 0, 1, 1], [], []>} : vector<16x128xbf16>, vector<128x512xbf16>, vector<16x512xf32> -> vector<16x512xf32>
    %c0_3 = arith.constant 0 : index
    %c0_4 = arith.constant 0 : index
    %3 = vector.load %arg3[%c0_3, %c0_4] : memref<16x1xf32, #tpu.memory_space<vmem>>, vector<16x1xf32>
    %4 = vector.broadcast %3 : vector<16x1xf32> to vector<16x512xf32>
    %5 = arith.addf %2, %4 : vector<16x512xf32>
    %cst_5 = arith.constant 0.000000e+00 : f32
    %6 = vector.broadcast %cst_5 : f32 to vector<16x512xf32>
    %7 = arith.maximumf %5, %6 : vector<16x512xf32>
    %c0_6 = arith.constant 0 : index
    %c0_7 = arith.constant 0 : index
    %8 = vector.load %arg4[%c0_6, %c0_7] : memref<16x512xf32, #tpu.memory_space<vmem>>, vector<16x512xf32>
    tpu.vector_store %arg4[%c0_6, %c0_7], %7 {strides = array<i32>} : memref<16x512xf32, #tpu.memory_space<vmem>>, vector<16x512xf32>,
    return
  }
  func.func @transform_0(%arg0: i32) -> (i32, i32) {
    %c0_i32 = arith.constant 0 : i32
    %c0_i32_0 = arith.constant 0 : i32
    %c0_i32_1 = arith.constant 0 : i32
    return %c0_i32, %c0_i32_0 : i32, i32
  }
  func.func @transform_1(%arg0: i32) -> (i32, i32) {
    %c0_i32 = arith.constant 0 : i32
    %c0_i32_0 = arith.constant 0 : i32
    return %c0_i32, %arg0 : i32, i32
  }
  func.func @transform_2(%arg0: i32) -> (i32, i32) {
    %c0_i32 = arith.constant 0 : i32
    %c0_i32_0 = arith.constant 0 : i32
    %c0_i32_1 = arith.constant 0 : i32
    return %c0_i32, %c0_i32_0 : i32, i32
  }
  func.func @transform_3(%arg0: i32) -> (i32, i32) {
    %c0_i32 = arith.constant 0 : i32
    %c0_i32_0 = arith.constant 0 : i32
    return %c0_i32, %arg0 : i32, i32
  }
}

module attributes {stable_mosaic.version = 11 : i64} {
  func.func @_fused_kernel(%arg0: i32, %arg1: memref<16x128xbf16, #tpu.memory_space<vmem>>, %arg2: memref<128x512xbf16, #tpu.memory_space<vmem>>, %arg3: memref<16x1xf32, #tpu.memory_space<vmem>>, %arg4: memref<16x512xf32, #tpu.memory_space<vmem>>, %arg5: memref<16x512xf32, #tpu.memory_space<vmem>>) attributes {dimension_semantics = [#tpu.dimension_semantics<parallel>], iteration_bounds = array<i64: 4>, scalar_prefetch = 0 : i64, scratch_operands = 0 : i64, tpu.core_type = #tpu.core_type<tc>, window_params = [{pipeline_mode = #tpu.pipeline_mode<synchronous>, transform_indices = @transform_0, window_bounds = array<i64: 16, 128>}, {transform_indices = @transform_1, window_bounds = array<i64: 128, 512>}, {pipeline_mode = #tpu.pipeline_mode<synchronous>, transform_indices = @transform_2, window_bounds = array<i64: 16, 1>}, {transform_indices = @transform_3, window_bounds = array<i64: 16, 512>}, {transform_indices = @transform_4, window_bounds = array<i64: 16, 512>}]} {
    %c0 = arith.constant 0 : index
    %c0_0 = arith.constant 0 : index
    %0 = vector.load %arg1[%c0, %c0_0] : memref<16x128xbf16, #tpu.memory_space<vmem>>, vector<16x128xbf16>
    %c0_1 = arith.constant 0 : index
    %c0_2 = arith.constant 0 : index
    %1 = vector.load %arg2[%c0_1, %c0_2] : memref<128x512xbf16, #tpu.memory_space<vmem>>, vector<128x512xbf16>
    %cst = arith.constant dense<0.000000e+00> : vector<16x512xf32>
    %2 = tpu.matmul %0, %1, %cst {dimension_numbers = #tpu.dot_dimension_numbers<[1], [0], [0], [1], [0, 0, 1, 1], [], []>} : vector<16x128xbf16>, vector<128x512xbf16>, vector<16x512xf32> -> vector<16x512xf32>
    %c0_3 = arith.constant 0 : index
    %c0_4 = arith.constant 0 : index
    %3 = vector.load %arg3[%c0_3, %c0_4] : memref<16x1xf32, #tpu.memory_space<vmem>>, vector<16x1xf32>
    %4 = vector.broadcast %3 : vector<16x1xf32> to vector<16x512xf32>
    %5 = arith.addf %2, %4 : vector<16x512xf32>
    %c0_5 = arith.constant 0 : index
    %c0_6 = arith.constant 0 : index
    %6 = vector.load %arg4[%c0_5, %c0_6] : memref<16x512xf32, #tpu.memory_space<vmem>>, vector<16x512xf32>
    %7 = arith.addf %5, %6 : vector<16x512xf32>
    %cst_7 = arith.constant 0.000000e+00 : f32
    %8 = vector.broadcast %cst_7 : f32 to vector<16x512xf32>
    %9 = arith.maximumf %7, %8 : vector<16x512xf32>
    %c0_8 = arith.constant 0 : index
    %c0_9 = arith.constant 0 : index
    %10 = vector.load %arg5[%c0_8, %c0_9] : memref<16x512xf32, #tpu.memory_space<vmem>>, vector<16x512xf32>
    tpu.vector_store %arg5[%c0_8, %c0_9], %9 {strides = array<i32>} : memref<16x512xf32, #tpu.memory_space<vmem>>, vector<16x512xf32>,
    return
  }
  func.func @transform_0(%arg0: i32) -> (i32, i32) {
    %c0_i32 = arith.constant 0 : i32
    %c0_i32_0 = arith.constant 0 : i32
    %c0_i32_1 = arith.constant 0 : i32
    return %c0_i32, %c0_i32_0 : i32, i32
  }
  func.func @transform_1(%arg0: i32) -> (i32, i32) {
    %c0_i32 = arith.constant 0 : i32
    %c0_i32_0 = arith.constant 0 : i32
    return %c0_i32, %arg0 : i32, i32
  }
  func.func @transform_2(%arg0: i32) -> (i32, i32) {
    %c0_i32 = arith.constant 0 : i32
    %c0_i32_0 = arith.constant 0 : i32
    %c0_i32_1 = arith.constant 0 : i32
    return %c0_i32, %c0_i32_0 : i32, i32
  }
  func.func @transform_3(%arg0: i32) -> (i32, i32) {
    %c0_i32 = arith.constant 0 : i32
    %c0_i32_0 = arith.constant 0 : i32
    return %c0_i32, %arg0 : i32, i32
  }
  func.func @transform_4(%arg0: i32) -> (i32, i32) {
    %c0_i32 = arith.constant 0 : i32
    %c0_i32_0 = arith.constant 0 : i32
    return %c0_i32, %arg0 : i32, i32
  }
}

module attributes {stable_mosaic.version = 11 : i64} {
  func.func @_fused_kernel(%arg0: i32, %arg1: memref<16x128xbf16, #tpu.memory_space<vmem>>, %arg2: memref<128x512xbf16, #tpu.memory_space<vmem>>, %arg3: memref<16x1xf32, #tpu.memory_space<vmem>>, %arg4: memref<16x512xf32, #tpu.memory_space<vmem>>) attributes {dimension_semantics = [#tpu.dimension_semantics<parallel>], iteration_bounds = array<i64: 1>, scalar_prefetch = 0 : i64, scratch_operands = 0 : i64, tpu.core_type = #tpu.core_type<tc>, window_params = [{pipeline_mode = #tpu.pipeline_mode<synchronous>, transform_indices = @transform_0, window_bounds = array<i64: 16, 128>}, {transform_indices = @transform_1, window_bounds = array<i64: 128, 512>}, {pipeline_mode = #tpu.pipeline_mode<synchronous>, transform_indices = @transform_2, window_bounds = array<i64: 16, 1>}, {transform_indices = @transform_3, window_bounds = array<i64: 16, 512>}]} {
    %c0 = arith.constant 0 : index
    %c0_0 = arith.constant 0 : index
    %0 = vector.load %arg1[%c0, %c0_0] : memref<16x128xbf16, #tpu.memory_space<vmem>>, vector<16x128xbf16>
    %c0_1 = arith.constant 0 : index
    %c0_2 = arith.constant 0 : index
    %1 = vector.load %arg2[%c0_1, %c0_2] : memref<128x512xbf16, #tpu.memory_space<vmem>>, vector<128x512xbf16>
    %cst = arith.constant dense<0.000000e+00> : vector<16x512xf32>
    %2 = tpu.matmul %0, %1, %cst {dimension_numbers = #tpu.dot_dimension_numbers<[1], [0], [0], [1], [0, 0, 1, 1], [], []>} : vector<16x128xbf16>, vector<128x512xbf16>, vector<16x512xf32> -> vector<16x512xf32>
    %c0_3 = arith.constant 0 : index
    %c0_4 = arith.constant 0 : index
    %3 = vector.load %arg3[%c0_3, %c0_4] : memref<16x1xf32, #tpu.memory_space<vmem>>, vector<16x1xf32>
    %4 = vector.broadcast %3 : vector<16x1xf32> to vector<16x512xf32>
    %5 = arith.addf %2, %4 : vector<16x512xf32>
    %cst_5 = arith.constant 0.000000e+00 : f32
    %6 = vector.broadcast %cst_5 : f32 to vector<16x512xf32>
    %7 = arith.maximumf %5, %6 : vector<16x512xf32>
    %c0_6 = arith.constant 0 : index
    %c0_7 = arith.constant 0 : index
    %8 = vector.load %arg4[%c0_6, %c0_7] : memref<16x512xf32, #tpu.memory_space<vmem>>, vector<16x512xf32>
    tpu.vector_store %arg4[%c0_6, %c0_7], %7 {strides = array<i32>} : memref<16x512xf32, #tpu.memory_space<vmem>>, vector<16x512xf32>,
    return
  }
  func.func @transform_0(%arg0: i32) -> (i32, i32) {
    %c0_i32 = arith.constant 0 : i32
    %c0_i32_0 = arith.constant 0 : i32
    %c0_i32_1 = arith.constant 0 : i32
    return %c0_i32, %c0_i32_0 : i32, i32
  }
  func.func @transform_1(%arg0: i32) -> (i32, i32) {
    %c0_i32 = arith.constant 0 : i32
    %c0_i32_0 = arith.constant 0 : i32
    return %c0_i32, %arg0 : i32, i32
  }
  func.func @transform_2(%arg0: i32) -> (i32, i32) {
    %c0_i32 = arith.constant 0 : i32
    %c0_i32_0 = arith.constant 0 : i32
    %c0_i32_1 = arith.constant 0 : i32
    return %c0_i32, %c0_i32_0 : i32, i32
  }
  func.func @transform_3(%arg0: i32) -> (i32, i32) {
    %c0_i32 = arith.constant 0 : i32
    %c0_i32_0 = arith.constant 0 : i32
    return %c0_i32, %arg0 : i32, i32
  }
}

module attributes {stable_mosaic.version = 11 : i64} {
  func.func @_fused_kernel(%arg0: i32, %arg1: memref<16x128xbf16, #tpu.memory_space<vmem>>, %arg2: memref<128x512xbf16, #tpu.memory_space<vmem>>, %arg3: memref<16x1xf32, #tpu.memory_space<vmem>>, %arg4: memref<16x512xf32, #tpu.memory_space<vmem>>) attributes {dimension_semantics = [#tpu.dimension_semantics<parallel>], iteration_bounds = array<i64: 1>, scalar_prefetch = 0 : i64, scratch_operands = 0 : i64, tpu.core_type = #tpu.core_type<tc>, window_params = [{pipeline_mode = #tpu.pipeline_mode<synchronous>, transform_indices = @transform_0, window_bounds = array<i64: 16, 128>}, {transform_indices = @transform_1, window_bounds = array<i64: 128, 512>}, {pipeline_mode = #tpu.pipeline_mode<synchronous>, transform_indices = @transform_2, window_bounds = array<i64: 16, 1>}, {transform_indices = @transform_3, window_bounds = array<i64: 16, 512>}]} {
    %c0 = arith.constant 0 : index
    %c0_0 = arith.constant 0 : index
    %0 = vector.load %arg1[%c0, %c0_0] : memref<16x128xbf16, #tpu.memory_space<vmem>>, vector<16x128xbf16>
    %c0_1 = arith.constant 0 : index
    %c0_2 = arith.constant 0 : index
    %1 = vector.load %arg2[%c0_1, %c0_2] : memref<128x512xbf16, #tpu.memory_space<vmem>>, vector<128x512xbf16>
    %cst = arith.constant dense<0.000000e+00> : vector<16x512xf32>
    %2 = tpu.matmul %0, %1, %cst {dimension_numbers = #tpu.dot_dimension_numbers<[1], [0], [0], [1], [0, 0, 1, 1], [], []>} : vector<16x128xbf16>, vector<128x512xbf16>, vector<16x512xf32> -> vector<16x512xf32>
    %c0_3 = arith.constant 0 : index
    %c0_4 = arith.constant 0 : index
    %3 = vector.load %arg3[%c0_3, %c0_4] : memref<16x1xf32, #tpu.memory_space<vmem>>, vector<16x1xf32>
    %4 = vector.broadcast %3 : vector<16x1xf32> to vector<16x512xf32>
    %5 = arith.addf %2, %4 : vector<16x512xf32>
    %c0_5 = arith.constant 0 : index
    %c0_6 = arith.constant 0 : index
    %6 = vector.load %arg4[%c0_5, %c0_6] : memref<16x512xf32, #tpu.memory_space<vmem>>, vector<16x512xf32>
    tpu.vector_store %arg4[%c0_5, %c0_6], %5 {strides = array<i32>} : memref<16x512xf32, #tpu.memory_space<vmem>>, vector<16x512xf32>,
    return
  }
  func.func @transform_0(%arg0: i32) -> (i32, i32) {
    %c0_i32 = arith.constant 0 : i32
    %c0_i32_0 = arith.constant 0 : i32
    %c0_i32_1 = arith.constant 0 : i32
    return %c0_i32, %c0_i32_0 : i32, i32
  }
  func.func @transform_1(%arg0: i32) -> (i32, i32) {
    %c0_i32 = arith.constant 0 : i32
    %c0_i32_0 = arith.constant 0 : i32
    return %c0_i32, %arg0 : i32, i32
  }
  func.func @transform_2(%arg0: i32) -> (i32, i32) {
    %c0_i32 = arith.constant 0 : i32
    %c0_i32_0 = arith.constant 0 : i32
    %c0_i32_1 = arith.constant 0 : i32
    return %c0_i32, %c0_i32_0 : i32, i32
  }
  func.func @transform_3(%arg0: i32) -> (i32, i32) {
    %c0_i32 = arith.constant 0 : i32
    %c0_i32_0 = arith.constant 0 : i32
    return %c0_i32, %arg0 : i32, i32
  }
}

module attributes {stable_mosaic.version = 11 : i64} {
  func.func @_fused_kernel(%arg0: i32, %arg1: memref<16x256xbf16, #tpu.memory_space<vmem>>, %arg2: memref<256x512xbf16, #tpu.memory_space<vmem>>, %arg3: memref<16x1xf32, #tpu.memory_space<vmem>>, %arg4: memref<16x512xf32, #tpu.memory_space<vmem>>, %arg5: memref<16x512xf32, #tpu.memory_space<vmem>>) attributes {dimension_semantics = [#tpu.dimension_semantics<parallel>], iteration_bounds = array<i64: 1>, scalar_prefetch = 0 : i64, scratch_operands = 0 : i64, tpu.core_type = #tpu.core_type<tc>, window_params = [{pipeline_mode = #tpu.pipeline_mode<synchronous>, transform_indices = @transform_0, window_bounds = array<i64: 16, 256>}, {transform_indices = @transform_1, window_bounds = array<i64: 256, 512>}, {pipeline_mode = #tpu.pipeline_mode<synchronous>, transform_indices = @transform_2, window_bounds = array<i64: 16, 1>}, {transform_indices = @transform_3, window_bounds = array<i64: 16, 512>}, {transform_indices = @transform_4, window_bounds = array<i64: 16, 512>}]} {
    %c0 = arith.constant 0 : index
    %c0_0 = arith.constant 0 : index
    %0 = vector.load %arg1[%c0, %c0_0] : memref<16x256xbf16, #tpu.memory_space<vmem>>, vector<16x256xbf16>
    %c0_1 = arith.constant 0 : index
    %c0_2 = arith.constant 0 : index
    %1 = vector.load %arg2[%c0_1, %c0_2] : memref<256x512xbf16, #tpu.memory_space<vmem>>, vector<256x512xbf16>
    %cst = arith.constant dense<0.000000e+00> : vector<16x512xf32>
    %2 = tpu.matmul %0, %1, %cst {dimension_numbers = #tpu.dot_dimension_numbers<[1], [0], [0], [1], [0, 0, 1, 1], [], []>} : vector<16x256xbf16>, vector<256x512xbf16>, vector<16x512xf32> -> vector<16x512xf32>
    %c0_3 = arith.constant 0 : index
    %c0_4 = arith.constant 0 : index
    %3 = vector.load %arg3[%c0_3, %c0_4] : memref<16x1xf32, #tpu.memory_space<vmem>>, vector<16x1xf32>
    %4 = vector.broadcast %3 : vector<16x1xf32> to vector<16x512xf32>
    %5 = arith.addf %2, %4 : vector<16x512xf32>
    %c0_5 = arith.constant 0 : index
    %c0_6 = arith.constant 0 : index
    %6 = vector.load %arg4[%c0_5, %c0_6] : memref<16x512xf32, #tpu.memory_space<vmem>>, vector<16x512xf32>
    %7 = arith.addf %5, %6 : vector<16x512xf32>
    %cst_7 = arith.constant 0.000000e+00 : f32
    %8 = vector.broadcast %cst_7 : f32 to vector<16x512xf32>
    %9 = arith.maximumf %7, %8 : vector<16x512xf32>
    %c0_8 = arith.constant 0 : index
    %c0_9 = arith.constant 0 : index
    %10 = vector.load %arg5[%c0_8, %c0_9] : memref<16x512xf32, #tpu.memory_space<vmem>>, vector<16x512xf32>
    tpu.vector_store %arg5[%c0_8, %c0_9], %9 {strides = array<i32>} : memref<16x512xf32, #tpu.memory_space<vmem>>, vector<16x512xf32>,
    return
  }
  func.func @transform_0(%arg0: i32) -> (i32, i32) {
    %c0_i32 = arith.constant 0 : i32
    %c0_i32_0 = arith.constant 0 : i32
    %c0_i32_1 = arith.constant 0 : i32
    return %c0_i32, %c0_i32_0 : i32, i32
  }
  func.func @transform_1(%arg0: i32) -> (i32, i32) {
    %c0_i32 = arith.constant 0 : i32
    %c0_i32_0 = arith.constant 0 : i32
    return %c0_i32, %arg0 : i32, i32
  }
  func.func @transform_2(%arg0: i32) -> (i32, i32) {
    %c0_i32 = arith.constant 0 : i32
    %c0_i32_0 = arith.constant 0 : i32
    %c0_i32_1 = arith.constant 0 : i32
    return %c0_i32, %c0_i32_0 : i32, i32
  }
  func.func @transform_3(%arg0: i32) -> (i32, i32) {
    %c0_i32 = arith.constant 0 : i32
    %c0_i32_0 = arith.constant 0 : i32
    return %c0_i32, %arg0 : i32, i32
  }
  func.func @transform_4(%arg0: i32) -> (i32, i32) {
    %c0_i32 = arith.constant 0 : i32
    %c0_i32_0 = arith.constant 0 : i32
    return %c0_i32, %arg0 : i32, i32
  }
}

module attributes {stable_mosaic.version = 11 : i64} {
  func.func @_fused_kernel(%arg0: i32, %arg1: memref<32x256xbf16, #tpu.memory_space<vmem>>, %arg2: memref<256x128xbf16, #tpu.memory_space<vmem>>, %arg3: memref<32x1xf32, #tpu.memory_space<vmem>>, %arg4: memref<32x128xf32, #tpu.memory_space<vmem>>) attributes {dimension_semantics = [#tpu.dimension_semantics<parallel>], iteration_bounds = array<i64: 1>, scalar_prefetch = 0 : i64, scratch_operands = 0 : i64, tpu.core_type = #tpu.core_type<tc>, window_params = [{pipeline_mode = #tpu.pipeline_mode<synchronous>, transform_indices = @transform_0, window_bounds = array<i64: 32, 256>}, {transform_indices = @transform_1, window_bounds = array<i64: 256, 128>}, {pipeline_mode = #tpu.pipeline_mode<synchronous>, transform_indices = @transform_2, window_bounds = array<i64: 32, 1>}, {transform_indices = @transform_3, window_bounds = array<i64: 32, 128>}]} {
    %c0 = arith.constant 0 : index
    %c0_0 = arith.constant 0 : index
    %0 = vector.load %arg1[%c0, %c0_0] : memref<32x256xbf16, #tpu.memory_space<vmem>>, vector<32x256xbf16>
    %c0_1 = arith.constant 0 : index
    %c0_2 = arith.constant 0 : index
    %1 = vector.load %arg2[%c0_1, %c0_2] : memref<256x128xbf16, #tpu.memory_space<vmem>>, vector<256x128xbf16>
    %cst = arith.constant dense<0.000000e+00> : vector<32x128xf32>
    %2 = tpu.matmul %0, %1, %cst {dimension_numbers = #tpu.dot_dimension_numbers<[1], [0], [0], [1], [0, 0, 1, 1], [], []>} : vector<32x256xbf16>, vector<256x128xbf16>, vector<32x128xf32> -> vector<32x128xf32>
    %c0_3 = arith.constant 0 : index
    %c0_4 = arith.constant 0 : index
    %3 = vector.load %arg3[%c0_3, %c0_4] : memref<32x1xf32, #tpu.memory_space<vmem>>, vector<32x1xf32>
    %4 = vector.broadcast %3 : vector<32x1xf32> to vector<32x128xf32>
    %5 = arith.addf %2, %4 : vector<32x128xf32>
    %cst_5 = arith.constant 0.000000e+00 : f32
    %6 = vector.broadcast %cst_5 : f32 to vector<32x128xf32>
    %7 = arith.maximumf %5, %6 : vector<32x128xf32>
    %c0_6 = arith.constant 0 : index
    %c0_7 = arith.constant 0 : index
    %8 = vector.load %arg4[%c0_6, %c0_7] : memref<32x128xf32, #tpu.memory_space<vmem>>, vector<32x128xf32>
    tpu.vector_store %arg4[%c0_6, %c0_7], %7 {strides = array<i32>} : memref<32x128xf32, #tpu.memory_space<vmem>>, vector<32x128xf32>,
    return
  }
  func.func @transform_0(%arg0: i32) -> (i32, i32) {
    %c0_i32 = arith.constant 0 : i32
    %c0_i32_0 = arith.constant 0 : i32
    %c0_i32_1 = arith.constant 0 : i32
    return %c0_i32, %c0_i32_0 : i32, i32
  }
  func.func @transform_1(%arg0: i32) -> (i32, i32) {
    %c0_i32 = arith.constant 0 : i32
    %c0_i32_0 = arith.constant 0 : i32
    return %c0_i32, %arg0 : i32, i32
  }
  func.func @transform_2(%arg0: i32) -> (i32, i32) {
    %c0_i32 = arith.constant 0 : i32
    %c0_i32_0 = arith.constant 0 : i32
    %c0_i32_1 = arith.constant 0 : i32
    return %c0_i32, %c0_i32_0 : i32, i32
  }
  func.func @transform_3(%arg0: i32) -> (i32, i32) {
    %c0_i32 = arith.constant 0 : i32
    %c0_i32_0 = arith.constant 0 : i32
    return %c0_i32, %arg0 : i32, i32
  }
}

module attributes {stable_mosaic.version = 11 : i64} {
  func.func @_fused_kernel(%arg0: i32, %arg1: memref<32x128xbf16, #tpu.memory_space<vmem>>, %arg2: memref<128x128xbf16, #tpu.memory_space<vmem>>, %arg3: memref<32x1xf32, #tpu.memory_space<vmem>>, %arg4: memref<32x128xf32, #tpu.memory_space<vmem>>) attributes {dimension_semantics = [#tpu.dimension_semantics<parallel>], iteration_bounds = array<i64: 1>, scalar_prefetch = 0 : i64, scratch_operands = 0 : i64, tpu.core_type = #tpu.core_type<tc>, window_params = [{pipeline_mode = #tpu.pipeline_mode<synchronous>, transform_indices = @transform_0, window_bounds = array<i64: 32, 128>}, {transform_indices = @transform_1, window_bounds = array<i64: 128, 128>}, {pipeline_mode = #tpu.pipeline_mode<synchronous>, transform_indices = @transform_2, window_bounds = array<i64: 32, 1>}, {transform_indices = @transform_3, window_bounds = array<i64: 32, 128>}]} {
    %c0 = arith.constant 0 : index
    %c0_0 = arith.constant 0 : index
    %0 = vector.load %arg1[%c0, %c0_0] : memref<32x128xbf16, #tpu.memory_space<vmem>>, vector<32x128xbf16>
    %c0_1 = arith.constant 0 : index
    %c0_2 = arith.constant 0 : index
    %1 = vector.load %arg2[%c0_1, %c0_2] : memref<128x128xbf16, #tpu.memory_space<vmem>>, vector<128x128xbf16>
    %cst = arith.constant dense<0.000000e+00> : vector<32x128xf32>
    %2 = tpu.matmul %0, %1, %cst {dimension_numbers = #tpu.dot_dimension_numbers<[1], [0], [0], [1], [0, 0, 1, 1], [], []>} : vector<32x128xbf16>, vector<128x128xbf16>, vector<32x128xf32> -> vector<32x128xf32>
    %c0_3 = arith.constant 0 : index
    %c0_4 = arith.constant 0 : index
    %3 = vector.load %arg3[%c0_3, %c0_4] : memref<32x1xf32, #tpu.memory_space<vmem>>, vector<32x1xf32>
    %4 = vector.broadcast %3 : vector<32x1xf32> to vector<32x128xf32>
    %5 = arith.addf %2, %4 : vector<32x128xf32>
    %c0_5 = arith.constant 0 : index
    %c0_6 = arith.constant 0 : index
    %6 = vector.load %arg4[%c0_5, %c0_6] : memref<32x128xf32, #tpu.memory_space<vmem>>, vector<32x128xf32>
    tpu.vector_store %arg4[%c0_5, %c0_6], %5 {strides = array<i32>} : memref<32x128xf32, #tpu.memory_space<vmem>>, vector<32x128xf32>,
    return
  }
  func.func @transform_0(%arg0: i32) -> (i32, i32) {
    %c0_i32 = arith.constant 0 : i32
    %c0_i32_0 = arith.constant 0 : i32
    %c0_i32_1 = arith.constant 0 : i32
    return %c0_i32, %c0_i32_0 : i32, i32
  }
  func.func @transform_1(%arg0: i32) -> (i32, i32) {
    %c0_i32 = arith.constant 0 : i32
    %c0_i32_0 = arith.constant 0 : i32
    return %c0_i32, %arg0 : i32, i32
  }
  func.func @transform_2(%arg0: i32) -> (i32, i32) {
    %c0_i32 = arith.constant 0 : i32
    %c0_i32_0 = arith.constant 0 : i32
    %c0_i32_1 = arith.constant 0 : i32
    return %c0_i32, %c0_i32_0 : i32, i32
  }
  func.func @transform_3(%arg0: i32) -> (i32, i32) {
    %c0_i32 = arith.constant 0 : i32
    %c0_i32_0 = arith.constant 0 : i32
    return %c0_i32, %arg0 : i32, i32
  }
}

module attributes {stable_mosaic.version = 11 : i64} {
  func.func @_fused_kernel(%arg0: i32, %arg1: memref<32x384xbf16, #tpu.memory_space<vmem>>, %arg2: memref<384x128xbf16, #tpu.memory_space<vmem>>, %arg3: memref<32x1xf32, #tpu.memory_space<vmem>>, %arg4: memref<32x128xf32, #tpu.memory_space<vmem>>, %arg5: memref<32x128xf32, #tpu.memory_space<vmem>>) attributes {dimension_semantics = [#tpu.dimension_semantics<parallel>], iteration_bounds = array<i64: 1>, scalar_prefetch = 0 : i64, scratch_operands = 0 : i64, tpu.core_type = #tpu.core_type<tc>, window_params = [{pipeline_mode = #tpu.pipeline_mode<synchronous>, transform_indices = @transform_0, window_bounds = array<i64: 32, 384>}, {transform_indices = @transform_1, window_bounds = array<i64: 384, 128>}, {pipeline_mode = #tpu.pipeline_mode<synchronous>, transform_indices = @transform_2, window_bounds = array<i64: 32, 1>}, {transform_indices = @transform_3, window_bounds = array<i64: 32, 128>}, {transform_indices = @transform_4, window_bounds = array<i64: 32, 128>}]} {
    %c0 = arith.constant 0 : index
    %c0_0 = arith.constant 0 : index
    %0 = vector.load %arg1[%c0, %c0_0] : memref<32x384xbf16, #tpu.memory_space<vmem>>, vector<32x384xbf16>
    %c0_1 = arith.constant 0 : index
    %c0_2 = arith.constant 0 : index
    %1 = vector.load %arg2[%c0_1, %c0_2] : memref<384x128xbf16, #tpu.memory_space<vmem>>, vector<384x128xbf16>
    %cst = arith.constant dense<0.000000e+00> : vector<32x128xf32>
    %2 = tpu.matmul %0, %1, %cst {dimension_numbers = #tpu.dot_dimension_numbers<[1], [0], [0], [1], [0, 0, 1, 1], [], []>} : vector<32x384xbf16>, vector<384x128xbf16>, vector<32x128xf32> -> vector<32x128xf32>
    %c0_3 = arith.constant 0 : index
    %c0_4 = arith.constant 0 : index
    %3 = vector.load %arg3[%c0_3, %c0_4] : memref<32x1xf32, #tpu.memory_space<vmem>>, vector<32x1xf32>
    %4 = vector.broadcast %3 : vector<32x1xf32> to vector<32x128xf32>
    %5 = arith.addf %2, %4 : vector<32x128xf32>
    %c0_5 = arith.constant 0 : index
    %c0_6 = arith.constant 0 : index
    %6 = vector.load %arg4[%c0_5, %c0_6] : memref<32x128xf32, #tpu.memory_space<vmem>>, vector<32x128xf32>
    %7 = arith.addf %5, %6 : vector<32x128xf32>
    %cst_7 = arith.constant 0.000000e+00 : f32
    %8 = vector.broadcast %cst_7 : f32 to vector<32x128xf32>
    %9 = arith.maximumf %7, %8 : vector<32x128xf32>
    %c0_8 = arith.constant 0 : index
    %c0_9 = arith.constant 0 : index
    %10 = vector.load %arg5[%c0_8, %c0_9] : memref<32x128xf32, #tpu.memory_space<vmem>>, vector<32x128xf32>
    tpu.vector_store %arg5[%c0_8, %c0_9], %9 {strides = array<i32>} : memref<32x128xf32, #tpu.memory_space<vmem>>, vector<32x128xf32>,
    return
  }
  func.func @transform_0(%arg0: i32) -> (i32, i32) {
    %c0_i32 = arith.constant 0 : i32
    %c0_i32_0 = arith.constant 0 : i32
    %c0_i32_1 = arith.constant 0 : i32
    return %c0_i32, %c0_i32_0 : i32, i32
  }
  func.func @transform_1(%arg0: i32) -> (i32, i32) {
    %c0_i32 = arith.constant 0 : i32
    %c0_i32_0 = arith.constant 0 : i32
    return %c0_i32, %arg0 : i32, i32
  }
  func.func @transform_2(%arg0: i32) -> (i32, i32) {
    %c0_i32 = arith.constant 0 : i32
    %c0_i32_0 = arith.constant 0 : i32
    %c0_i32_1 = arith.constant 0 : i32
    return %c0_i32, %c0_i32_0 : i32, i32
  }
  func.func @transform_3(%arg0: i32) -> (i32, i32) {
    %c0_i32 = arith.constant 0 : i32
    %c0_i32_0 = arith.constant 0 : i32
    return %c0_i32, %arg0 : i32, i32
  }
  func.func @transform_4(%arg0: i32) -> (i32, i32) {
    %c0_i32 = arith.constant 0 : i32
    %c0_i32_0 = arith.constant 0 : i32
    return %c0_i32, %arg0 : i32, i32
  }
}

module attributes {stable_mosaic.version = 11 : i64} {
  func.func @_fused_kernel(%arg0: i32, %arg1: memref<64x384xbf16, #tpu.memory_space<vmem>>, %arg2: memref<384x128xbf16, #tpu.memory_space<vmem>>, %arg3: memref<64x1xf32, #tpu.memory_space<vmem>>, %arg4: memref<64x128xf32, #tpu.memory_space<vmem>>) attributes {dimension_semantics = [#tpu.dimension_semantics<parallel>], iteration_bounds = array<i64: 1>, scalar_prefetch = 0 : i64, scratch_operands = 0 : i64, tpu.core_type = #tpu.core_type<tc>, window_params = [{pipeline_mode = #tpu.pipeline_mode<synchronous>, transform_indices = @transform_0, window_bounds = array<i64: 64, 384>}, {transform_indices = @transform_1, window_bounds = array<i64: 384, 128>}, {pipeline_mode = #tpu.pipeline_mode<synchronous>, transform_indices = @transform_2, window_bounds = array<i64: 64, 1>}, {transform_indices = @transform_3, window_bounds = array<i64: 64, 128>}]} {
    %c0 = arith.constant 0 : index
    %c0_0 = arith.constant 0 : index
    %0 = vector.load %arg1[%c0, %c0_0] : memref<64x384xbf16, #tpu.memory_space<vmem>>, vector<64x384xbf16>
    %c0_1 = arith.constant 0 : index
    %c0_2 = arith.constant 0 : index
    %1 = vector.load %arg2[%c0_1, %c0_2] : memref<384x128xbf16, #tpu.memory_space<vmem>>, vector<384x128xbf16>
    %cst = arith.constant dense<0.000000e+00> : vector<64x128xf32>
    %2 = tpu.matmul %0, %1, %cst {dimension_numbers = #tpu.dot_dimension_numbers<[1], [0], [0], [1], [0, 0, 1, 1], [], []>} : vector<64x384xbf16>, vector<384x128xbf16>, vector<64x128xf32> -> vector<64x128xf32>
    %c0_3 = arith.constant 0 : index
    %c0_4 = arith.constant 0 : index
    %3 = vector.load %arg3[%c0_3, %c0_4] : memref<64x1xf32, #tpu.memory_space<vmem>>, vector<64x1xf32>
    %4 = vector.broadcast %3 : vector<64x1xf32> to vector<64x128xf32>
    %5 = arith.addf %2, %4 : vector<64x128xf32>
    %cst_5 = arith.constant 0.000000e+00 : f32
    %6 = vector.broadcast %cst_5 : f32 to vector<64x128xf32>
    %7 = arith.maximumf %5, %6 : vector<64x128xf32>
    %c0_6 = arith.constant 0 : index
    %c0_7 = arith.constant 0 : index
    %8 = vector.load %arg4[%c0_6, %c0_7] : memref<64x128xf32, #tpu.memory_space<vmem>>, vector<64x128xf32>
    tpu.vector_store %arg4[%c0_6, %c0_7], %7 {strides = array<i32>} : memref<64x128xf32, #tpu.memory_space<vmem>>, vector<64x128xf32>,
    return
  }
  func.func @transform_0(%arg0: i32) -> (i32, i32) {
    %c0_i32 = arith.constant 0 : i32
    %c0_i32_0 = arith.constant 0 : i32
    %c0_i32_1 = arith.constant 0 : i32
    return %c0_i32, %c0_i32_0 : i32, i32
  }
  func.func @transform_1(%arg0: i32) -> (i32, i32) {
    %c0_i32 = arith.constant 0 : i32
    %c0_i32_0 = arith.constant 0 : i32
    return %c0_i32, %arg0 : i32, i32
  }
  func.func @transform_2(%arg0: i32) -> (i32, i32) {
    %c0_i32 = arith.constant 0 : i32
    %c0_i32_0 = arith.constant 0 : i32
    %c0_i32_1 = arith.constant 0 : i32
    return %c0_i32, %c0_i32_0 : i32, i32
  }
  func.func @transform_3(%arg0: i32) -> (i32, i32) {
    %c0_i32 = arith.constant 0 : i32
    %c0_i32_0 = arith.constant 0 : i32
    return %c0_i32, %arg0 : i32, i32
  }
}

module attributes {stable_mosaic.version = 11 : i64} {
  func.func @_fused_kernel(%arg0: i32, %arg1: memref<64x128xbf16, #tpu.memory_space<vmem>>, %arg2: memref<128x128xbf16, #tpu.memory_space<vmem>>, %arg3: memref<64x1xf32, #tpu.memory_space<vmem>>, %arg4: memref<64x128xf32, #tpu.memory_space<vmem>>) attributes {dimension_semantics = [#tpu.dimension_semantics<parallel>], iteration_bounds = array<i64: 1>, scalar_prefetch = 0 : i64, scratch_operands = 0 : i64, tpu.core_type = #tpu.core_type<tc>, window_params = [{pipeline_mode = #tpu.pipeline_mode<synchronous>, transform_indices = @transform_0, window_bounds = array<i64: 64, 128>}, {transform_indices = @transform_1, window_bounds = array<i64: 128, 128>}, {pipeline_mode = #tpu.pipeline_mode<synchronous>, transform_indices = @transform_2, window_bounds = array<i64: 64, 1>}, {transform_indices = @transform_3, window_bounds = array<i64: 64, 128>}]} {
    %c0 = arith.constant 0 : index
    %c0_0 = arith.constant 0 : index
    %0 = vector.load %arg1[%c0, %c0_0] : memref<64x128xbf16, #tpu.memory_space<vmem>>, vector<64x128xbf16>
    %c0_1 = arith.constant 0 : index
    %c0_2 = arith.constant 0 : index
    %1 = vector.load %arg2[%c0_1, %c0_2] : memref<128x128xbf16, #tpu.memory_space<vmem>>, vector<128x128xbf16>
    %cst = arith.constant dense<0.000000e+00> : vector<64x128xf32>
    %2 = tpu.matmul %0, %1, %cst {dimension_numbers = #tpu.dot_dimension_numbers<[1], [0], [0], [1], [0, 0, 1, 1], [], []>} : vector<64x128xbf16>, vector<128x128xbf16>, vector<64x128xf32> -> vector<64x128xf32>
    %c0_3 = arith.constant 0 : index
    %c0_4 = arith.constant 0 : index
    %3 = vector.load %arg3[%c0_3, %c0_4] : memref<64x1xf32, #tpu.memory_space<vmem>>, vector<64x1xf32>
    %4 = vector.broadcast %3 : vector<64x1xf32> to vector<64x128xf32>
    %5 = arith.addf %2, %4 : vector<64x128xf32>
    %c0_5 = arith.constant 0 : index
    %c0_6 = arith.constant 0 : index
    %6 = vector.load %arg4[%c0_5, %c0_6] : memref<64x128xf32, #tpu.memory_space<vmem>>, vector<64x128xf32>
    tpu.vector_store %arg4[%c0_5, %c0_6], %5 {strides = array<i32>} : memref<64x128xf32, #tpu.memory_space<vmem>>, vector<64x128xf32>,
    return
  }
  func.func @transform_0(%arg0: i32) -> (i32, i32) {
    %c0_i32 = arith.constant 0 : i32
    %c0_i32_0 = arith.constant 0 : i32
    %c0_i32_1 = arith.constant 0 : i32
    return %c0_i32, %c0_i32_0 : i32, i32
  }
  func.func @transform_1(%arg0: i32) -> (i32, i32) {
    %c0_i32 = arith.constant 0 : i32
    %c0_i32_0 = arith.constant 0 : i32
    return %c0_i32, %arg0 : i32, i32
  }
  func.func @transform_2(%arg0: i32) -> (i32, i32) {
    %c0_i32 = arith.constant 0 : i32
    %c0_i32_0 = arith.constant 0 : i32
    %c0_i32_1 = arith.constant 0 : i32
    return %c0_i32, %c0_i32_0 : i32, i32
  }
  func.func @transform_3(%arg0: i32) -> (i32, i32) {
    %c0_i32 = arith.constant 0 : i32
    %c0_i32_0 = arith.constant 0 : i32
    return %c0_i32, %arg0 : i32, i32
  }
}

module attributes {stable_mosaic.version = 11 : i64} {
  func.func @_fused_kernel(%arg0: i32, %arg1: memref<64x640xbf16, #tpu.memory_space<vmem>>, %arg2: memref<640x128xbf16, #tpu.memory_space<vmem>>, %arg3: memref<64x1xf32, #tpu.memory_space<vmem>>, %arg4: memref<64x128xf32, #tpu.memory_space<vmem>>, %arg5: memref<64x128xf32, #tpu.memory_space<vmem>>) attributes {dimension_semantics = [#tpu.dimension_semantics<parallel>], iteration_bounds = array<i64: 1>, scalar_prefetch = 0 : i64, scratch_operands = 0 : i64, tpu.core_type = #tpu.core_type<tc>, window_params = [{pipeline_mode = #tpu.pipeline_mode<synchronous>, transform_indices = @transform_0, window_bounds = array<i64: 64, 640>}, {transform_indices = @transform_1, window_bounds = array<i64: 640, 128>}, {pipeline_mode = #tpu.pipeline_mode<synchronous>, transform_indices = @transform_2, window_bounds = array<i64: 64, 1>}, {transform_indices = @transform_3, window_bounds = array<i64: 64, 128>}, {transform_indices = @transform_4, window_bounds = array<i64: 64, 128>}]} {
    %c0 = arith.constant 0 : index
    %c0_0 = arith.constant 0 : index
    %0 = vector.load %arg1[%c0, %c0_0] : memref<64x640xbf16, #tpu.memory_space<vmem>>, vector<64x640xbf16>
    %c0_1 = arith.constant 0 : index
    %c0_2 = arith.constant 0 : index
    %1 = vector.load %arg2[%c0_1, %c0_2] : memref<640x128xbf16, #tpu.memory_space<vmem>>, vector<640x128xbf16>
    %cst = arith.constant dense<0.000000e+00> : vector<64x128xf32>
    %2 = tpu.matmul %0, %1, %cst {dimension_numbers = #tpu.dot_dimension_numbers<[1], [0], [0], [1], [0, 0, 1, 1], [], []>} : vector<64x640xbf16>, vector<640x128xbf16>, vector<64x128xf32> -> vector<64x128xf32>
    %c0_3 = arith.constant 0 : index
    %c0_4 = arith.constant 0 : index
    %3 = vector.load %arg3[%c0_3, %c0_4] : memref<64x1xf32, #tpu.memory_space<vmem>>, vector<64x1xf32>
    %4 = vector.broadcast %3 : vector<64x1xf32> to vector<64x128xf32>
    %5 = arith.addf %2, %4 : vector<64x128xf32>
    %c0_5 = arith.constant 0 : index
    %c0_6 = arith.constant 0 : index
    %6 = vector.load %arg4[%c0_5, %c0_6] : memref<64x128xf32, #tpu.memory_space<vmem>>, vector<64x128xf32>
    %7 = arith.addf %5, %6 : vector<64x128xf32>
    %cst_7 = arith.constant 0.000000e+00 : f32
    %8 = vector.broadcast %cst_7 : f32 to vector<64x128xf32>
    %9 = arith.maximumf %7, %8 : vector<64x128xf32>
    %c0_8 = arith.constant 0 : index
    %c0_9 = arith.constant 0 : index
    %10 = vector.load %arg5[%c0_8, %c0_9] : memref<64x128xf32, #tpu.memory_space<vmem>>, vector<64x128xf32>
    tpu.vector_store %arg5[%c0_8, %c0_9], %9 {strides = array<i32>} : memref<64x128xf32, #tpu.memory_space<vmem>>, vector<64x128xf32>,
    return
  }
  func.func @transform_0(%arg0: i32) -> (i32, i32) {
    %c0_i32 = arith.constant 0 : i32
    %c0_i32_0 = arith.constant 0 : i32
    %c0_i32_1 = arith.constant 0 : i32
    return %c0_i32, %c0_i32_0 : i32, i32
  }
  func.func @transform_1(%arg0: i32) -> (i32, i32) {
    %c0_i32 = arith.constant 0 : i32
    %c0_i32_0 = arith.constant 0 : i32
    return %c0_i32, %arg0 : i32, i32
  }
  func.func @transform_2(%arg0: i32) -> (i32, i32) {
    %c0_i32 = arith.constant 0 : i32
    %c0_i32_0 = arith.constant 0 : i32
    %c0_i32_1 = arith.constant 0 : i32
    return %c0_i32, %c0_i32_0 : i32, i32
  }
  func.func @transform_3(%arg0: i32) -> (i32, i32) {
    %c0_i32 = arith.constant 0 : i32
    %c0_i32_0 = arith.constant 0 : i32
    return %c0_i32, %arg0 : i32, i32
  }
  func.func @transform_4(%arg0: i32) -> (i32, i32) {
    %c0_i32 = arith.constant 0 : i32
    %c0_i32_0 = arith.constant 0 : i32
    return %c0_i32, %arg0 : i32, i32
  }
}

</mosaic_0001>

<bundles_post_ra>
// kernel: _lambda_.12
= control target key start
LH: loop header
LB: loop body
LE: loop exit
PB: predicated region body
PF: predicated region fallthrough
CT: control target
= control target key end

     0   :  { %s883_s12 = smov 0   ;;  %s885_s13 = smov 0   ;;  %s1108_s0 = inlined_call_operand.vmem [shape: bf16[16,128], index: 0, kind: input, shape index: {}]   ;;  %s1109_s1 = inlined_call_operand.vmem [shape: bf16[128,2048], index: 1, kind: input, shape index: {}]   ;;  %s1110_s2 = inlined_call_operand.vmem [shape: f32[16,1], index: 2, kind: input, shape index: {}]   ;;  %s1111_s3 = inlined_call_operand.vmem [shape: f32[16,2048], index: 3, kind: output, shape index: {}]  }
   0x1   :  { %s887_s14 = smov 0  }
   0x2 LB: > { %s630_s15 = sadd.s32 4294967295, %s860_s14   ;;  %s900_s16 = sadd.s32 1, %s860_s14   ;;  %s860_s14 = sphi %s887_s14, %s1115_s14   ;;  %s856_s13 = sphi %s885_s13, %s1114_s13   ;;  %s852_s12 = sphi %s883_s12, %s1113_s12  }
   0x3   : > { %s38_s17 = ssub.s32 %s860_s14, %s900_s16  ;;  %s41_s18 = sadd.s32 1, %s856_s13 }
   0x4   : > { %p39_p0 = scmp.eq.s32.totalorder %s38_s17, 0  ;;  %p48_p1 = scmp.ne.s32.totalorder %s856_s13, %s852_s12 }
   0x5   : > { %p49_p2 = scmp.eq.s32.totalorder %s860_s14, 0  ;;  %p99_p3 = scmp.eq.s32.totalorder %s630_s15, 3 }
   0x6   : > { %s911_s19 = scalar_select %p39_p0, %s856_s13, %s41_s18  }
   0x7   : > { %p50_p4 = por %p49_p2, %p48_p1  ;;  %p913_p5 = por %p99_p3, %p48_p1 }
   0x8   : > { %p633_p6 = scmp.ge.s32.totalorder %s860_s14, 4 }
   0xa   : > { %127 = sbr.rel (%p633_p6) target bundleno = 51 (0x33), region = 24 }
   0xf   : > { %130 = sbr.rel (!%p50_p4) target bundleno = 51 (0x33), region = 28  ;;  %s132_s21 = sand.u32 (%p50_p4), 1, %s856_s13  }
  0x10   : > { %s777_s22 = sshll.u32 (%p50_p4), %s860_s14, 4  ;;  %s634_s23 = sshll.u32 (%p50_p4), %s132_s21, 8 }
  0x11   : > { %s923_s26 = scalar_lea.vmem (%p50_p4), %s1109_s1, %s777_s22  ;;  %s928_s27 = scalar_lea.vmem (%p50_p4), [#allocation2], %s634_s23 }
  0x12   : > { %v150_v0 = vld [vmem:[%s923_s26] sm:$0xff] (%p50_p4)  ;;  %v152_v1 = vld [vmem:[%s923_s26 + $0x8] sm:$0xff] (%p50_p4) }
  0x13   : > { %v154_v2 = vld [vmem:[%s923_s26 + $0x40] sm:$0xff] (%p50_p4)  ;;  %151 = vst [vmem:[%s928_s27] sm:$0xff] (%p50_p4), %v150_v0  ;;  %v156_v3 = vld [vmem:[%s923_s26 + $0x48] sm:$0xff] (%p50_p4) }
  0x14   : > { %153 = vst [vmem:[%s928_s27 + $0x8] sm:$0xff] %v152_v1  ;;  %v158_v4 = vld [vmem:[%s923_s26 + $0x80] sm:$0xff]  ;;  %v160_v5 = vld [vmem:[%s923_s26 + $0x88] sm:$0xff] }
  0x15   : > { %155 = vst [vmem:[%s928_s27 + $0x10] sm:$0xff] %v154_v2  ;;  %v162_v6 = vld [vmem:[%s923_s26 + $0xc0] sm:$0xff]  ;;  %v164_v7 = vld [vmem:[%s923_s26 + $0xc8] sm:$0xff] }
  0x16   : > { %157 = vst [vmem:[%s928_s27 + $0x18] sm:$0xff] %v156_v3  ;;  %v166_v8 = vld [vmem:[%s923_s26 + $0x100] sm:$0xff]  ;;  %v168_v9 = vld [vmem:[%s923_s26 + $0x108] sm:$0xff] }
  0x17   : > { %159 = vst [vmem:[%s928_s27 + $0x20] sm:$0xff] %v158_v4  ;;  %v170_v10 = vld [vmem:[%s923_s26 + $0x140] sm:$0xff]  ;;  %v172_v11 = vld [vmem:[%s923_s26 + $0x148] sm:$0xff] }
  0x18   : > { %161 = vst [vmem:[%s928_s27 + $0x28] sm:$0xff] %v160_v5  ;;  %v174_v12 = vld [vmem:[%s923_s26 + $0x180] sm:$0xff]  ;;  %v176_v13 = vld [vmem:[%s923_s26 + $0x188] sm:$0xff] }
  0x19   : > { %163 = vst [vmem:[%s928_s27 + $0x30] sm:$0xff] %v162_v6  ;;  %v178_v14 = vld [vmem:[%s923_s26 + $0x1c0] sm:$0xff]  ;;  %v180_v15 = vld [vmem:[%s923_s26 + $0x1c8] sm:$0xff] }
  0x1a   : > { %165 = vst [vmem:[%s928_s27 + $0x38] sm:$0xff] %v164_v7  ;;  %v182_v16 = vld [vmem:[%s923_s26 + $0x200] sm:$0xff]  ;;  %v184_v17 = vld [vmem:[%s923_s26 + $0x208] sm:$0xff] }
  0x1b   : > { %167 = vst [vmem:[%s928_s27 + $0x40] sm:$0xff] %v166_v8  ;;  %v186_v18 = vld [vmem:[%s923_s26 + $0x240] sm:$0xff]  ;;  %v188_v19 = vld [vmem:[%s923_s26 + $0x248] sm:$0xff] }
  0x1c   : > { %169 = vst [vmem:[%s928_s27 + $0x48] sm:$0xff] %v168_v9  ;;  %v190_v20 = vld [vmem:[%s923_s26 + $0x280] sm:$0xff]  ;;  %v192_v21 = vld [vmem:[%s923_s26 + $0x288] sm:$0xff] }
  0x1d   : > { %171 = vst [vmem:[%s928_s27 + $0x50] sm:$0xff] %v170_v10  ;;  %v194_v22 = vld [vmem:[%s923_s26 + $0x2c0] sm:$0xff]  ;;  %v196_v23 = vld [vmem:[%s923_s26 + $0x2c8] sm:$0xff] }
  0x1e   : > { %173 = vst [vmem:[%s928_s27 + $0x58] sm:$0xff] %v172_v11  ;;  %v198_v24 = vld [vmem:[%s923_s26 + $0x300] sm:$0xff]  ;;  %v200_v25 = vld [vmem:[%s923_s26 + $0x308] sm:$0xff] }
  0x1f   : > { %175 = vst [vmem:[%s928_s27 + $0x60] sm:$0xff] %v174_v12  ;;  %v202_v26 = vld [vmem:[%s923_s26 + $0x340] sm:$0xff]  ;;  %v204_v27 = vld [vmem:[%s923_s26 + $0x348] sm:$0xff] }
  0x20   : > { %177 = vst [vmem:[%s928_s27 + $0x68] sm:$0xff] %v176_v13  ;;  %v206_v28 = vld [vmem:[%s923_s26 + $0x380] sm:$0xff]  ;;  %v208_v29 = vld [vmem:[%s923_s26 + $0x388] sm:$0xff] }
  0x21   : > { %179 = vst [vmem:[%s928_s27 + $0x70] sm:$0xff] %v178_v14  ;;  %v210_v30 = vld [vmem:[%s923_s26 + $0x3c0] sm:$0xff]  ;;  %v212_v31 = vld [vmem:[%s923_s26 + $0x3c8] sm:$0xff] }
  0x22   : > { %181 = vst [vmem:[%s928_s27 + $0x78] sm:$0xff] %v180_v15 }
  0x23   : > { %183 = vst [vmem:[%s928_s27 + $0x80] sm:$0xff] %v182_v16 }
  0x24   : > { %185 = vst [vmem:[%s928_s27 + $0x88] sm:$0xff] %v184_v17 }
  0x25   : > { %187 = vst [vmem:[%s928_s27 + $0x90] sm:$0xff] %v186_v18 }
  0x26   : > { %189 = vst [vmem:[%s928_s27 + $0x98] sm:$0xff] %v188_v19 }
  0x27   : > { %191 = vst [vmem:[%s928_s27 + $0xa0] sm:$0xff] %v190_v20 }
  0x28   : > { %193 = vst [vmem:[%s928_s27 + $0xa8] sm:$0xff] %v192_v21 }
  0x29   : > { %195 = vst [vmem:[%s928_s27 + $0xb0] sm:$0xff] %v194_v22 }
  0x2a   : > { %197 = vst [vmem:[%s928_s27 + $0xb8] sm:$0xff] %v196_v23 }
  0x2b   : > { %199 = vst [vmem:[%s928_s27 + $0xc0] sm:$0xff] %v198_v24 }
  0x2c   : > { %201 = vst [vmem:[%s928_s27 + $0xc8] sm:$0xff] %v200_v25 }
  0x2d   : > { %203 = vst [vmem:[%s928_s27 + $0xd0] sm:$0xff] %v202_v26 }
  0x2e   : > { %205 = vst [vmem:[%s928_s27 + $0xd8] sm:$0xff] %v204_v27 }
  0x2f   : > { %207 = vst [vmem:[%s928_s27 + $0xe0] sm:$0xff] %v206_v28 }
  0x30   : > { %209 = vst [vmem:[%s928_s27 + $0xe8] sm:$0xff] %v208_v29 }
  0x31   : > { %211 = vst [vmem:[%s928_s27 + $0xf0] sm:$0xff] %v210_v30 }
  0x32   : > { %213 = vst [vmem:[%s928_s27 + $0xf8] sm:$0xff] %v212_v31 }
  0x33 PF: > { %p637_p7 = scmp.ge.s32.totalorder %s860_s14, 1  ;;  %p218_p8 = scmp.lt.s32.totalorder %s860_s14, 5 }
  0x35   : > { %p219_p9 = pnand %p637_p7, %p218_p8 }
  0x36   : > { %s225_s28 = sand.u32 (!%p219_p9), 1, %s852_s12  }
  0x37   : > { %222 = sbr.rel (%p219_p9) target bundleno = 249 (0xf9), region = 51  ;;  %s638_s29 = sshll.u32 (!%p219_p9), %s225_s28, 8 }
  0x38   : > { %s996_s30 = scalar_lea.vmem (!%p219_p9), [#allocation2], %s638_s29  ;;  %s639_s10 = sshll.u32 (!%p219_p9), %s225_s28, 6 }
  0x39   : > { %s1073_s11 = scalar_lea.vmem (!%p219_p9), [#allocation3], %s639_s10 }
  0x3c   : > { %v758_v32 = vld [vmem:[%s996_s30 + $0xe0] sm:$0xf]  ;;  %v809_v33 = vld [vmem:[%s996_s30 + $0xec] sm:$0xf0]  ;;  %v807_v34 = vld [vmem:[%s996_s30 + $0xe4] sm:$0xf] }
  0x3d   : > { %v759_v35 = vor.u32 %v809_v33, %v758_v32  ;;  %v760_v36 = vld [vmem:[%s996_s30 + $0xf0] sm:$0xf0]  ;;  %v766_v37 = vld [vmem:[%s996_s30 + $0xe8] sm:$0xf]  ;;  %v810_v38 = vld [vmem:[%s996_s30 + $0xf4] sm:$0xf0] }
  0x3e   : > { %v763_v39 = vor.u32 %v807_v34, %v760_v36  ;;  %v767_v40 = vor.u32 %v810_v38, %v766_v37  ;;  %v808_v41 = vld [vmem:[%s996_s30 + $0xec] sm:$0xf]  ;;  %v768_v42 = vld [vmem:[%s996_s30 + $0xf8] sm:$0xf0]  ;;  %v742_v43 = vld [vmem:[%s996_s30 + $0xc0] sm:$0xf] }
  0x3f   : > { %461 = vmatpush.bf16.msra.mxu0 %v759_v35  ;;  %v771_v44 = vor.u32 %v808_v41, %v768_v42  ;;  %v805_v45 = vld [vmem:[%s996_s30 + $0xcc] sm:$0xf0]  ;;  %v803_v46 = vld [vmem:[%s996_s30 + $0xc4] sm:$0xf]  ;;  %v744_v47 = vld [vmem:[%s996_s30 + $0xd0] sm:$0xf0] }
  0x40   : > { %475 = vmatpush.bf16.msra.mxu1 %v763_v39  ;;  %489 = vmatpush.bf16.msra.mxu2 %v767_v40  ;;  %v743_v48 = vor.u32 %v805_v45, %v742_v43  ;;  %v747_v49 = vor.u32 %v803_v46, %v744_v47  ;;  %v750_v50 = vld [vmem:[%s996_s30 + $0xc8] sm:$0xf]  ;;  %v806_v51 = vld [vmem:[%s996_s30 + $0xd4] sm:$0xf0]  ;;  %v804_v52 = vld [vmem:[%s996_s30 + $0xcc] sm:$0xf] }
  0x41   : > { %503 = vmatpush.bf16.msra.mxu3 %v771_v44  ;;  %v751_v53 = vor.u32 %v806_v51, %v750_v50  ;;  %v752_v54 = vld [vmem:[%s996_s30 + $0xd8] sm:$0xf0]  ;;  %v726_v55 = vld [vmem:[%s996_s30 + $0xa0] sm:$0xf]  ;;  %v801_v56 = vld [vmem:[%s996_s30 + $0xac] sm:$0xf0] }
  0x42   : > { %v755_v57 = vor.u32 %v804_v52, %v752_v54  ;;  %v799_v58 = vld [vmem:[%s996_s30 + $0xa4] sm:$0xf]  ;;  %v728_v59 = vld [vmem:[%s996_s30 + $0xb0] sm:$0xf0]  ;;  %v734_v60 = vld [vmem:[%s996_s30 + $0xa8] sm:$0xf]  ;;  %v727_v61 = vor.u32 %v801_v56, %v726_v55 }
  0x43   : > { %462 = vmatpush.bf16.msra.mxu0 %v743_v48  ;;  %v802_v62 = vld [vmem:[%s996_s30 + $0xb4] sm:$0xf0]  ;;  %v800_v63 = vld [vmem:[%s996_s30 + $0xac] sm:$0xf]  ;;  %v736_v0 = vld [vmem:[%s996_s30 + $0xb8] sm:$0xf0]  ;;  %v731_v1 = vor.u32 %v799_v58, %v728_v59 }
  0x44   : > { %476 = vmatpush.bf16.msra.mxu1 %v747_v49  ;;  %490 = vmatpush.bf16.msra.mxu2 %v751_v53  ;;  %v735_v2 = vor.u32 %v802_v62, %v734_v60  ;;  %v710_v3 = vld [vmem:[%s996_s30 + $0x80] sm:$0xf]  ;;  %v797_v4 = vld [vmem:[%s996_s30 + $0x8c] sm:$0xf0]  ;;  %v795_v5 = vld [vmem:[%s996_s30 + $0x84] sm:$0xf]  ;;  %v739_v6 = vor.u32 %v800_v63, %v736_v0 }
  0x45   : > { %504 = vmatpush.bf16.msra.mxu3 %v755_v57  ;;  %v712_v7 = vld [vmem:[%s996_s30 + $0x90] sm:$0xf0]  ;;  %v718_v8 = vld [vmem:[%s996_s30 + $0x88] sm:$0xf]  ;;  %v798_v9 = vld [vmem:[%s996_s30 + $0x94] sm:$0xf0]  ;;  %v711_v12 = vor.u32 %v797_v4, %v710_v3 }
  0x46   : > { %v796_v10 = vld [vmem:[%s996_s30 + $0x8c] sm:$0xf]  ;;  %v720_v11 = vld [vmem:[%s996_s30 + $0x98] sm:$0xf0]  ;;  %v715_v13 = vor.u32 %v795_v5, %v712_v7  ;;  %v719_v14 = vor.u32 %v798_v9, %v718_v8  ;;  %v694_v15 = vld [vmem:[%s996_s30 + $0x60] sm:$0xf] }
  0x47   : > { %463 = vmatpush.bf16.msra.mxu0 %v727_v61  ;;  %v793_v16 = vld [vmem:[%s996_s30 + $0x6c] sm:$0xf0]  ;;  %v791_v17 = vld [vmem:[%s996_s30 + $0x64] sm:$0xf]  ;;  %v723_v18 = vor.u32 %v796_v10, %v720_v11  ;;  %v696_v19 = vld [vmem:[%s996_s30 + $0x70] sm:$0xf0] }
  0x48   : > { %477 = vmatpush.bf16.msra.mxu1 %v731_v1  ;;  %491 = vmatpush.bf16.msra.mxu2 %v735_v2  ;;  %v702_v20 = vld [vmem:[%s996_s30 + $0x68] sm:$0xf]  ;;  %v794_v21 = vld [vmem:[%s996_s30 + $0x74] sm:$0xf0]  ;;  %v792_v22 = vld [vmem:[%s996_s30 + $0x6c] sm:$0xf]  ;;  %v695_v24 = vor.u32 %v793_v16, %v694_v15  ;;  %v699_v25 = vor.u32 %v791_v17, %v696_v19 }
  0x49   : > { %505 = vmatpush.bf16.msra.mxu3 %v739_v6  ;;  %v704_v23 = vld [vmem:[%s996_s30 + $0x78] sm:$0xf0]  ;;  %v703_v26 = vor.u32 %v794_v21, %v702_v20  ;;  %v678_v27 = vld [vmem:[%s996_s30 + $0x40] sm:$0xf]  ;;  %v789_v28 = vld [vmem:[%s996_s30 + $0x4c] sm:$0xf0] }
  0x4a   : > { %v787_v29 = vld [vmem:[%s996_s30 + $0x44] sm:$0xf]  ;;  %v707_v30 = vor.u32 %v792_v22, %v704_v23  ;;  %v680_v31 = vld [vmem:[%s996_s30 + $0x50] sm:$0xf0]  ;;  %v686_v32 = vld [vmem:[%s996_s30 + $0x48] sm:$0xf]  ;;  %v679_v36 = vor.u32 %v789_v28, %v678_v27 }
  0x4b   : > { %464 = vmatpush.bf16.msra.mxu0 %v711_v12  ;;  %v790_v33 = vld [vmem:[%s996_s30 + $0x54] sm:$0xf0]  ;;  %v788_v34 = vld [vmem:[%s996_s30 + $0x4c] sm:$0xf]  ;;  %v688_v35 = vld [vmem:[%s996_s30 + $0x58] sm:$0xf0]  ;;  %v683_v38 = vor.u32 %v787_v29, %v680_v31 }
  0x4c   : > { %478 = vmatpush.bf16.msra.mxu1 %v715_v13  ;;  %492 = vmatpush.bf16.msra.mxu2 %v719_v14  ;;  %v662_v37 = vld [vmem:[%s996_s30 + $0x20] sm:$0xf]  ;;  %v687_v39 = vor.u32 %v790_v33, %v686_v32  ;;  %v785_v40 = vld [vmem:[%s996_s30 + $0x2c] sm:$0xf0]  ;;  %v783_v41 = vld [vmem:[%s996_s30 + $0x24] sm:$0xf]  ;;  %v691_v43 = vor.u32 %v788_v34, %v688_v35 }
  0x4d   : > { %506 = vmatpush.bf16.msra.mxu3 %v723_v18  ;;  %v664_v42 = vld [vmem:[%s996_s30 + $0x30] sm:$0xf0]  ;;  %v670_v44 = vld [vmem:[%s996_s30 + $0x28] sm:$0xf]  ;;  %v786_v45 = vld [vmem:[%s996_s30 + $0x34] sm:$0xf0]  ;;  %v663_v50 = vor.u32 %v785_v40, %v662_v37 }
  0x4e   : > { %v283_v46 = vld [vmem:[%s1110_s2] sm:$0xff]  ;;  %v784_v47 = vld [vmem:[%s996_s30 + $0x2c] sm:$0xf]  ;;  %v672_v48 = vld [vmem:[%s996_s30 + $0x38] sm:$0xf0]  ;;  %v862_v49 = vmov 0   ;;  %v667_v51 = vor.u32 %v783_v41, %v664_v42  ;;  %v671_v52 = vor.u32 %v786_v45, %v670_v44 }
  0x4f   : > { %465 = vmatpush.bf16.msra.mxu0 %v695_v24  ;;  %837 = vset.pattern.permute.xlu0 %v862_v49  ;;  %v646_v53 = vld [vmem:[%s996_s30] sm:$0xf]  ;;  %v781_v54 = vld [vmem:[%s996_s30 + $0xc] sm:$0xf0]  ;;  %v779_v55 = vld [vmem:[%s996_s30 + $0x4] sm:$0xf]  ;;  %v675_v56 = vor.u32 %v784_v47, %v672_v48 }
  0x50   : > { %479 = vmatpush.bf16.msra.mxu1 %v699_v25  ;;  %493 = vmatpush.bf16.msra.mxu2 %v703_v26  ;;  %v648_v57 = vld [vmem:[%s996_s30 + $0x10] sm:$0xf0]  ;;  %v654_v58 = vld [vmem:[%s996_s30 + $0x8] sm:$0xf]  ;;  %v782_v59 = vld [vmem:[%s996_s30 + $0x14] sm:$0xf0]  ;;  %v647_v62 = vor.u32 %v781_v54, %v646_v53 }
  0x51   : > { %507 = vmatpush.bf16.msra.mxu3 %v707_v30  ;;  %287 = vperm.xlu0 %837, %v283_v46   ;;  %v780_v60 = vld [vmem:[%s996_s30 + $0xc] sm:$0xf]  ;;  %v656_v61 = vld [vmem:[%s996_s30 + $0x18] sm:$0xf0]  ;;  %v651_v63 = vor.u32 %v779_v55, %v648_v57  ;;  %v655_v0 = vor.u32 %v782_v59, %v654_v58  ;;  %v778_v3 = vld [vmem:[%s1108_s0] sm:$0xff]  ;;  %s811_s12 = sshll.u32 (%p913_p5), %s630_s15, 5 }
  0x52   : > { %v284_v1 = vld [vmem:[%s1110_s2 + $0x8] sm:$0xff]  ;;  %v659_v2 = vor.u32 %v780_v60, %v656_v61  ;;  %s542_s21 = scalar_lea.vmem (%p913_p5), %s1111_s3, %s811_s12 }
  0x53   : > { %466 = vmatpush.bf16.msra.mxu0 %v679_v36 }
  0x54   : > { %480 = vmatpush.bf16.msra.mxu1 %v683_v38  ;;  %494 = vmatpush.bf16.msra.mxu2 %v687_v39 }
  0x55   : > { %508 = vmatpush.bf16.msra.mxu3 %v691_v43 }
  0x57   : > { %467 = vmatpush.bf16.msra.mxu0 %v663_v50 }
  0x58   : > { %481 = vmatpush.bf16.msra.mxu1 %v667_v51  ;;  %495 = vmatpush.bf16.msra.mxu2 %v671_v52 }
  0x59   : > { %509 = vmatpush.bf16.msra.mxu3 %v675_v56  ;;  %292 = vperm.xlu0 %837, %v284_v1  }
  0x5b   : > { %468 = vmatpush.bf16.msra.mxu0 %v647_v62 }
  0x5c   : > { %482 = vmatpush.bf16.msra.mxu1 %v651_v63  ;;  %496 = vmatpush.bf16.msra.mxu2 %v655_v0 }
  0x5d   : > { %510 = vmatpush.bf16.msra.mxu3 %v659_v2 }
  0x5e   : > { %469 = vmatmul.bf16.vlgmr.msra.gmra.mxu0 %v778_v3 }
  0x5f   : > { %483 = vmatmul.bf16.vlgmr.msra.gmra.mxu1 %v778_v3  ;;  %497 = vmatmul.bf16.vlgmr.msra.gmra.mxu2 %v778_v3 }
  0x60   : > { %511 = vmatmul.bf16.vlgmr.msra.gmra.mxu3 %v778_v3 }
  0xc3   : > { %v288_v4 = vpop.permute.xlu0 %287 }
  0xcb   : > { %v293_v11 = vpop.permute.xlu0 %292 }
  0xdb   : > { %v470_v5 = vpop.f32.mrf.mxu0 }
  0xdc   : > { %v471_v6 = vadd.f32 %v470_v5, %v288_v4  ;;  %v484_v7 = vpop.f32.mrf.mxu1 }
  0xdd   : > { %v485_v8 = vadd.f32 %v484_v7, %v288_v4 }
  0xde   : > { %v517_v9 = vmax.f32 %v471_v6, 0.0 }
  0xdf   : > { %v518_v10 = vmax.f32 %v485_v8, 0.0 }
  0xe0   : > { %525 = vst [vmem:[%s1073_s11] sm:$0xff] %v517_v9 }
  0xe1   : > { %526 = vst [vmem:[%s1073_s11 + $0x8] sm:$0xff] %v518_v10 }
  0xe2   : > { %v498_v12 = vpop.f32.mrf.mxu2 }
  0xe3   : > { %v499_v13 = vadd.f32 %v498_v12, %v288_v4  ;;  %v512_v14 = vpop.f32.mrf.mxu3  ;;  %v472_v15 = vpop.f32.mrf.mxu0 }
  0xe4   : > { %v513_v16 = vadd.f32 %v512_v14, %v288_v4  ;;  %v473_v17 = vadd.f32 %v472_v15, %v293_v11  ;;  %v486_v18 = vpop.f32.mrf.mxu1 }
  0xe5   : > { %v519_v19 = vmax.f32 %v499_v13, 0.0  ;;  %v487_v20 = vadd.f32 %v486_v18, %v293_v11 }
  0xe6   : > { %v520_v21 = vmax.f32 %v513_v16, 0.0  ;;  %v521_v22 = vmax.f32 %v473_v17, 0.0 }
  0xe7   : > { %527 = vst [vmem:[%s1073_s11 + $0x10] sm:$0xff] %v519_v19  ;;  %v522_v23 = vmax.f32 %v487_v20, 0.0  ;;  %v555_v30 = vld [vmem:[%s1073_s11] sm:$0xff] (%p913_p5) }
  0xe8   : > { %528 = vst [vmem:[%s1073_s11 + $0x18] sm:$0xff] %v520_v21  ;;  %v557_v31 = vld [vmem:[%s1073_s11 + $0x8] sm:$0xff] (%p913_p5) }
  0xe9   : > { %529 = vst [vmem:[%s1073_s11 + $0x20] sm:$0xff] %v521_v22 }
  0xea   : > { %530 = vst [vmem:[%s1073_s11 + $0x28] sm:$0xff] %v522_v23  ;;  %v500_v24 = vpop.f32.mrf.mxu2 }
  0xeb   : > { %v501_v25 = vadd.f32 %v500_v24, %v293_v11  ;;  %v514_v26 = vpop.f32.mrf.mxu3  ;;  %556 = vst [vmem:[%s542_s21] sm:$0xff] (%p913_p5), %v555_v30 }
  0xec   : > { %v515_v27 = vadd.f32 %v514_v26, %v293_v11  ;;  %539 = sbr.rel (!%p913_p5) target bundleno = 249 (0xf9), region = 59  ;;  %558 = vst [vmem:[%s542_s21 + $0x8] sm:$0xff] (%p913_p5), %v557_v31 }
  0xed   : > { %v523_v28 = vmax.f32 %v501_v25, 0.0 }
  0xee   : > { %v524_v29 = vmax.f32 %v515_v27, 0.0  ;;  %v559_v32 = vld [vmem:[%s1073_s11 + $0x10] sm:$0xff] (%p913_p5) }
  0xef   : > { %531 = vst [vmem:[%s1073_s11 + $0x30] sm:$0xff] %v523_v28  ;;  %v561_v33 = vld [vmem:[%s1073_s11 + $0x18] sm:$0xff] (%p913_p5) }
  0xf0   : > { %532 = vst [vmem:[%s1073_s11 + $0x38] sm:$0xff] %v524_v29  ;;  %v563_v34 = vld [vmem:[%s1073_s11 + $0x20] sm:$0xff] (%p913_p5) }
  0xf1   : > { %560 = vst [vmem:[%s542_s21 + $0x10] sm:$0xff] %v559_v32  ;;  %v565_v35 = vld [vmem:[%s1073_s11 + $0x28] sm:$0xff] }
  0xf2   : > { %562 = vst [vmem:[%s542_s21 + $0x18] sm:$0xff] %v561_v33 }
  0xf3   : > { %564 = vst [vmem:[%s542_s21 + $0x80] sm:$0xff] %v563_v34 }
  0xf4   : > { %566 = vst [vmem:[%s542_s21 + $0x88] sm:$0xff] %v565_v35 }
  0xf6   : > { %v567_v36 = vld [vmem:[%s1073_s11 + $0x30] sm:$0xff] }
  0xf7   : > { %v569_v37 = vld [vmem:[%s1073_s11 + $0x38] sm:$0xff]  ;;  %568 = vst [vmem:[%s542_s21 + $0x90] sm:$0xff] %v567_v36 }
  0xf8   : > { %570 = vst [vmem:[%s542_s21 + $0x98] sm:$0xff] %v569_v37 }
  0xf9 PF: > { %p10_p10 = scmp.ge.s32.totalorder %s900_s16, 6   ;;  %s1113_s12 = smov %s856_s13 }
  0xfa   : > { %s1114_s13 = smov %s911_s19  ;;  %s1115_s14 = smov %s900_s16 }
  0xfb   :  { %12 = sbr.rel (!%p10_p10) target bundleno = 2 (0x2), region = 113 }

// kernel: _lambda_.14
= control target key start
LH: loop header
LB: loop body
LE: loop exit
PB: predicated region body
PF: predicated region fallthrough
CT: control target
= control target key end

     0   :  { %s1009_s15 = smov 0   ;;  %s1011_s16 = smov 0   ;;  %s1257_s0 = inlined_call_operand.vmem [shape: bf16[16,128], index: 0, kind: input, shape index: {}]   ;;  %s1258_s1 = inlined_call_operand.vmem [shape: bf16[128,2048], index: 1, kind: input, shape index: {}]   ;;  %s1259_s2 = inlined_call_operand.vmem [shape: f32[16,1], index: 2, kind: input, shape index: {}]   ;;  %s1260_s3 = inlined_call_operand.vmem [shape: f32[16,2048], index: 3, kind: input, shape index: {}]   ;;  %s1261_s4 = inlined_call_operand.vmem [shape: f32[16,2048], index: 4, kind: output, shape index: {}]  }
   0x1   :  { %s1013_s17 = smov 0  }
   0x2 LB: > { %s746_s18 = sadd.s32 4294967295, %s981_s17   ;;  %s1026_s19 = sadd.s32 1, %s981_s17   ;;  %s981_s17 = sphi %s1013_s17, %s1266_s17   ;;  %s977_s16 = sphi %s1011_s16, %s1265_s16   ;;  %s973_s15 = sphi %s1009_s15, %s1264_s15  }
   0x3   : > { %s39_s20 = ssub.s32 %s981_s17, %s1026_s19  ;;  %s42_s21 = sadd.s32 1, %s977_s16 }
   0x4   : > { %p40_p0 = scmp.eq.s32.totalorder %s39_s20, 0  ;;  %p49_p1 = scmp.ne.s32.totalorder %s977_s16, %s973_s15 }
   0x5   : > { %p50_p2 = scmp.eq.s32.totalorder %s981_s17, 0  ;;  %p126_p3 = scmp.eq.s32.totalorder %s746_s18, 3 }
   0x6   : > { %s1037_s22 = scalar_select %p40_p0, %s977_s16, %s42_s21  }
   0x7   : > { %p1039_p4 = por %p50_p2, %p49_p1  ;;  %p1043_p5 = por %p126_p3, %p49_p1 }
   0x8   : > { %p749_p6 = scmp.ge.s32.totalorder %s981_s17, 4 }
   0xa   : > { %154 = sbr.rel (%p749_p6) target bundleno = 63 (0x3f), region = 24 }
   0xf   : > { %157 = sbr.rel (!%p1039_p4) target bundleno = 51 (0x33), region = 28  ;;  %s159_s25 = sand.u32 (%p1039_p4), 1, %s977_s16  }
  0x10   : > { %s897_s26 = sshll.u32 (%p1039_p4), %s981_s17, 4  ;;  %s750_s27 = sshll.u32 (%p1039_p4), %s159_s25, 8 }
  0x11   : > { %s1055_s30 = scalar_lea.vmem (%p1039_p4), %s1258_s1, %s897_s26  ;;  %s1060_s5 = scalar_lea.vmem (%p1039_p4), [#allocation2], %s750_s27 }
  0x12   : > { %v177_v0 = vld [vmem:[%s1055_s30] sm:$0xff] (%p1039_p4)  ;;  %v179_v1 = vld [vmem:[%s1055_s30 + $0x8] sm:$0xff] (%p1039_p4) }
  0x13   : > { %v181_v2 = vld [vmem:[%s1055_s30 + $0x40] sm:$0xff] (%p1039_p4)  ;;  %178 = vst [vmem:[%s1060_s5] sm:$0xff] (%p1039_p4), %v177_v0  ;;  %v183_v3 = vld [vmem:[%s1055_s30 + $0x48] sm:$0xff] (%p1039_p4) }
  0x14   : > { %180 = vst [vmem:[%s1060_s5 + $0x8] sm:$0xff] %v179_v1  ;;  %v185_v4 = vld [vmem:[%s1055_s30 + $0x80] sm:$0xff]  ;;  %v187_v5 = vld [vmem:[%s1055_s30 + $0x88] sm:$0xff] }
  0x15   : > { %182 = vst [vmem:[%s1060_s5 + $0x10] sm:$0xff] %v181_v2  ;;  %v189_v6 = vld [vmem:[%s1055_s30 + $0xc0] sm:$0xff]  ;;  %v191_v7 = vld [vmem:[%s1055_s30 + $0xc8] sm:$0xff] }
  0x16   : > { %184 = vst [vmem:[%s1060_s5 + $0x18] sm:$0xff] %v183_v3  ;;  %v193_v8 = vld [vmem:[%s1055_s30 + $0x100] sm:$0xff]  ;;  %v195_v9 = vld [vmem:[%s1055_s30 + $0x108] sm:$0xff] }
  0x17   : > { %186 = vst [vmem:[%s1060_s5 + $0x20] sm:$0xff] %v185_v4  ;;  %v197_v10 = vld [vmem:[%s1055_s30 + $0x140] sm:$0xff]  ;;  %v199_v11 = vld [vmem:[%s1055_s30 + $0x148] sm:$0xff] }
  0x18   : > { %188 = vst [vmem:[%s1060_s5 + $0x28] sm:$0xff] %v187_v5  ;;  %v201_v12 = vld [vmem:[%s1055_s30 + $0x180] sm:$0xff]  ;;  %v203_v13 = vld [vmem:[%s1055_s30 + $0x188] sm:$0xff] }
  0x19   : > { %190 = vst [vmem:[%s1060_s5 + $0x30] sm:$0xff] %v189_v6  ;;  %v205_v14 = vld [vmem:[%s1055_s30 + $0x1c0] sm:$0xff]  ;;  %v207_v15 = vld [vmem:[%s1055_s30 + $0x1c8] sm:$0xff] }
  0x1a   : > { %192 = vst [vmem:[%s1060_s5 + $0x38] sm:$0xff] %v191_v7  ;;  %v209_v16 = vld [vmem:[%s1055_s30 + $0x200] sm:$0xff]  ;;  %v211_v17 = vld [vmem:[%s1055_s30 + $0x208] sm:$0xff] }
  0x1b   : > { %194 = vst [vmem:[%s1060_s5 + $0x40] sm:$0xff] %v193_v8  ;;  %v213_v18 = vld [vmem:[%s1055_s30 + $0x240] sm:$0xff]  ;;  %v215_v19 = vld [vmem:[%s1055_s30 + $0x248] sm:$0xff] }
  0x1c   : > { %196 = vst [vmem:[%s1060_s5 + $0x48] sm:$0xff] %v195_v9  ;;  %v217_v20 = vld [vmem:[%s1055_s30 + $0x280] sm:$0xff]  ;;  %v219_v21 = vld [vmem:[%s1055_s30 + $0x288] sm:$0xff] }
  0x1d   : > { %198 = vst [vmem:[%s1060_s5 + $0x50] sm:$0xff] %v197_v10  ;;  %v221_v22 = vld [vmem:[%s1055_s30 + $0x2c0] sm:$0xff]  ;;  %v223_v23 = vld [vmem:[%s1055_s30 + $0x2c8] sm:$0xff] }
  0x1e   : > { %200 = vst [vmem:[%s1060_s5 + $0x58] sm:$0xff] %v199_v11  ;;  %v225_v24 = vld [vmem:[%s1055_s30 + $0x300] sm:$0xff]  ;;  %v227_v25 = vld [vmem:[%s1055_s30 + $0x308] sm:$0xff] }
  0x1f   : > { %202 = vst [vmem:[%s1060_s5 + $0x60] sm:$0xff] %v201_v12  ;;  %v229_v26 = vld [vmem:[%s1055_s30 + $0x340] sm:$0xff]  ;;  %v231_v27 = vld [vmem:[%s1055_s30 + $0x348] sm:$0xff] }
  0x20   : > { %204 = vst [vmem:[%s1060_s5 + $0x68] sm:$0xff] %v203_v13  ;;  %v233_v28 = vld [vmem:[%s1055_s30 + $0x380] sm:$0xff]  ;;  %v235_v29 = vld [vmem:[%s1055_s30 + $0x388] sm:$0xff] }
  0x21   : > { %206 = vst [vmem:[%s1060_s5 + $0x70] sm:$0xff] %v205_v14  ;;  %v237_v30 = vld [vmem:[%s1055_s30 + $0x3c0] sm:$0xff]  ;;  %v239_v31 = vld [vmem:[%s1055_s30 + $0x3c8] sm:$0xff] }
  0x22   : > { %208 = vst [vmem:[%s1060_s5 + $0x78] sm:$0xff] %v207_v15 }
  0x23   : > { %210 = vst [vmem:[%s1060_s5 + $0x80] sm:$0xff] %v209_v16 }
  0x24   : > { %212 = vst [vmem:[%s1060_s5 + $0x88] sm:$0xff] %v211_v17 }
  0x25   : > { %214 = vst [vmem:[%s1060_s5 + $0x90] sm:$0xff] %v213_v18 }
  0x26   : > { %216 = vst [vmem:[%s1060_s5 + $0x98] sm:$0xff] %v215_v19 }
  0x27   : > { %218 = vst [vmem:[%s1060_s5 + $0xa0] sm:$0xff] %v217_v20 }
  0x28   : > { %220 = vst [vmem:[%s1060_s5 + $0xa8] sm:$0xff] %v219_v21 }
  0x29   : > { %222 = vst [vmem:[%s1060_s5 + $0xb0] sm:$0xff] %v221_v22 }
  0x2a   : > { %224 = vst [vmem:[%s1060_s5 + $0xb8] sm:$0xff] %v223_v23 }
  0x2b   : > { %226 = vst [vmem:[%s1060_s5 + $0xc0] sm:$0xff] %v225_v24 }
  0x2c   : > { %228 = vst [vmem:[%s1060_s5 + $0xc8] sm:$0xff] %v227_v25 }
  0x2d   : > { %230 = vst [vmem:[%s1060_s5 + $0xd0] sm:$0xff] %v229_v26 }
  0x2e   : > { %232 = vst [vmem:[%s1060_s5 + $0xd8] sm:$0xff] %v231_v27 }
  0x2f   : > { %234 = vst [vmem:[%s1060_s5 + $0xe0] sm:$0xff] %v233_v28 }
  0x30   : > { %236 = vst [vmem:[%s1060_s5 + $0xe8] sm:$0xff] %v235_v29 }
  0x31   : > { %238 = vst [vmem:[%s1060_s5 + $0xf0] sm:$0xff] %v237_v30 }
  0x32   : > { %240 = vst [vmem:[%s1060_s5 + $0xf8] sm:$0xff] %v239_v31 }
  0x33 PF: > { %246 = sbr.rel (!%p1039_p4) target bundleno = 63 (0x3f), region = 51  ;;  %s248_s6 = sand.u32 (%p1039_p4), 1, %s977_s16  }
  0x34   : > { %s898_s7 = sshll.u32 (%p1039_p4), %s981_s17, 5  ;;  %s753_s8 = sshll.u32 (%p1039_p4), %s248_s6, 6 }
  0x35   : > { %s253_s11 = scalar_lea.vmem (%p1039_p4), %s1260_s3, %s898_s7  ;;  %s250_s12 = scalar_lea.vmem (%p1039_p4), [#allocation3], %s753_s8 }
  0x36   : > { %v266_v32 = vld [vmem:[%s253_s11] sm:$0xff] (%p1039_p4)  ;;  %v268_v33 = vld [vmem:[%s253_s11 + $0x8] sm:$0xff] (%p1039_p4)  ;;  %v270_v34 = vld [vmem:[%s253_s11 + $0x10] sm:$0xff] (%p1039_p4) }
  0x37   : > { %267 = vst [vmem:[%s250_s12] sm:$0xff] (%p1039_p4), %v266_v32  ;;  %v272_v35 = vld [vmem:[%s253_s11 + $0x18] sm:$0xff] (%p1039_p4)  ;;  %v274_v36 = vld [vmem:[%s253_s11 + $0x80] sm:$0xff] (%p1039_p4)  ;;  %v276_v37 = vld [vmem:[%s253_s11 + $0x88] sm:$0xff] (%p1039_p4) }
  0x38   : > { %269 = vst [vmem:[%s250_s12 + $0x8] sm:$0xff] %v268_v33  ;;  %v278_v38 = vld [vmem:[%s253_s11 + $0x90] sm:$0xff]  ;;  %v280_v39 = vld [vmem:[%s253_s11 + $0x98] sm:$0xff] }
  0x39   : > { %271 = vst [vmem:[%s250_s12 + $0x10] sm:$0xff] %v270_v34 }
  0x3a   : > { %273 = vst [vmem:[%s250_s12 + $0x18] sm:$0xff] %v272_v35 }
  0x3b   : > { %275 = vst [vmem:[%s250_s12 + $0x20] sm:$0xff] %v274_v36 }
  0x3c   : > { %277 = vst [vmem:[%s250_s12 + $0x28] sm:$0xff] %v276_v37 }
  0x3d   : > { %279 = vst [vmem:[%s250_s12 + $0x30] sm:$0xff] %v278_v38 }
  0x3e   : > { %281 = vst [vmem:[%s250_s12 + $0x38] sm:$0xff] %v280_v39 }
  0x3f PF: > { %p756_p7 = scmp.ge.s32.totalorder %s981_s17, 1  ;;  %p286_p8 = scmp.lt.s32.totalorder %s981_s17, 5 }
  0x41   : > { %p287_p9 = pnand %p756_p7, %p286_p8 }
  0x42   : > { %s293_s13 = sand.u32 (!%p287_p9), 1, %s973_s15  }
  0x43   : > { %290 = sbr.rel (%p287_p9) target bundleno = 263 (0x107), region = 74  ;;  %s757_s14 = sshll.u32 (!%p287_p9), %s293_s13, 8 }
  0x44   : > { %s1135_s20 = scalar_lea.vmem (!%p287_p9), [#allocation2], %s757_s14  ;;  %s758_s29 = sshll.u32 (!%p287_p9), %s293_s13, 6 }
  0x45   : > { %s1212_s30 = scalar_lea.vmem (!%p287_p9), [#allocation3], %s758_s29  ;;  %s1216_s15 = scalar_lea.vmem (!%p287_p9), [#allocation4], %s758_s29 }
  0x48   : > { %v878_v40 = vld [vmem:[%s1135_s20 + $0xe0] sm:$0xf]  ;;  %v930_v41 = vld [vmem:[%s1135_s20 + $0xec] sm:$0xf0]  ;;  %v928_v42 = vld [vmem:[%s1135_s20 + $0xe4] sm:$0xf] }
  0x49   : > { %v879_v43 = vor.u32 %v930_v41, %v878_v40  ;;  %v880_v44 = vld [vmem:[%s1135_s20 + $0xf0] sm:$0xf0]  ;;  %v886_v45 = vld [vmem:[%s1135_s20 + $0xe8] sm:$0xf]  ;;  %v931_v46 = vld [vmem:[%s1135_s20 + $0xf4] sm:$0xf0] }
  0x4a   : > { %v883_v47 = vor.u32 %v928_v42, %v880_v44  ;;  %v887_v48 = vor.u32 %v931_v46, %v886_v45  ;;  %v929_v49 = vld [vmem:[%s1135_s20 + $0xec] sm:$0xf]  ;;  %v888_v50 = vld [vmem:[%s1135_s20 + $0xf8] sm:$0xf0]  ;;  %v862_v51 = vld [vmem:[%s1135_s20 + $0xc0] sm:$0xf] }
  0x4b   : > { %543 = vmatpush.bf16.msra.mxu0 %v879_v43  ;;  %v891_v52 = vor.u32 %v929_v49, %v888_v50  ;;  %v926_v53 = vld [vmem:[%s1135_s20 + $0xcc] sm:$0xf0]  ;;  %v924_v54 = vld [vmem:[%s1135_s20 + $0xc4] sm:$0xf]  ;;  %v864_v55 = vld [vmem:[%s1135_s20 + $0xd0] sm:$0xf0] }
  0x4c   : > { %557 = vmatpush.bf16.msra.mxu1 %v883_v47  ;;  %571 = vmatpush.bf16.msra.mxu2 %v887_v48  ;;  %v863_v56 = vor.u32 %v926_v53, %v862_v51  ;;  %v867_v57 = vor.u32 %v924_v54, %v864_v55  ;;  %v870_v58 = vld [vmem:[%s1135_s20 + $0xc8] sm:$0xf]  ;;  %v927_v59 = vld [vmem:[%s1135_s20 + $0xd4] sm:$0xf0]  ;;  %v925_v60 = vld [vmem:[%s1135_s20 + $0xcc] sm:$0xf] }
  0x4d   : > { %585 = vmatpush.bf16.msra.mxu3 %v891_v52  ;;  %v871_v61 = vor.u32 %v927_v59, %v870_v58  ;;  %v872_v62 = vld [vmem:[%s1135_s20 + $0xd8] sm:$0xf0]  ;;  %v846_v63 = vld [vmem:[%s1135_s20 + $0xa0] sm:$0xf]  ;;  %v922_v0 = vld [vmem:[%s1135_s20 + $0xac] sm:$0xf0] }
  0x4e   : > { %v875_v1 = vor.u32 %v925_v60, %v872_v62  ;;  %v920_v2 = vld [vmem:[%s1135_s20 + $0xa4] sm:$0xf]  ;;  %v848_v3 = vld [vmem:[%s1135_s20 + $0xb0] sm:$0xf0]  ;;  %v854_v4 = vld [vmem:[%s1135_s20 + $0xa8] sm:$0xf]  ;;  %v847_v5 = vor.u32 %v922_v0, %v846_v63 }
  0x4f   : > { %544 = vmatpush.bf16.msra.mxu0 %v863_v56  ;;  %v923_v6 = vld [vmem:[%s1135_s20 + $0xb4] sm:$0xf0]  ;;  %v921_v7 = vld [vmem:[%s1135_s20 + $0xac] sm:$0xf]  ;;  %v856_v8 = vld [vmem:[%s1135_s20 + $0xb8] sm:$0xf0]  ;;  %v851_v9 = vor.u32 %v920_v2, %v848_v3 }
  0x50   : > { %558 = vmatpush.bf16.msra.mxu1 %v867_v57  ;;  %572 = vmatpush.bf16.msra.mxu2 %v871_v61  ;;  %v855_v10 = vor.u32 %v923_v6, %v854_v4  ;;  %v830_v11 = vld [vmem:[%s1135_s20 + $0x80] sm:$0xf]  ;;  %v918_v12 = vld [vmem:[%s1135_s20 + $0x8c] sm:$0xf0]  ;;  %v916_v13 = vld [vmem:[%s1135_s20 + $0x84] sm:$0xf]  ;;  %v859_v14 = vor.u32 %v921_v7, %v856_v8 }
  0x51   : > { %586 = vmatpush.bf16.msra.mxu3 %v875_v1  ;;  %v832_v15 = vld [vmem:[%s1135_s20 + $0x90] sm:$0xf0]  ;;  %v838_v16 = vld [vmem:[%s1135_s20 + $0x88] sm:$0xf]  ;;  %v919_v17 = vld [vmem:[%s1135_s20 + $0x94] sm:$0xf0]  ;;  %v831_v20 = vor.u32 %v918_v12, %v830_v11 }
  0x52   : > { %v917_v18 = vld [vmem:[%s1135_s20 + $0x8c] sm:$0xf]  ;;  %v840_v19 = vld [vmem:[%s1135_s20 + $0x98] sm:$0xf0]  ;;  %v835_v21 = vor.u32 %v916_v13, %v832_v15  ;;  %v839_v22 = vor.u32 %v919_v17, %v838_v16  ;;  %v814_v23 = vld [vmem:[%s1135_s20 + $0x60] sm:$0xf] }
  0x53   : > { %545 = vmatpush.bf16.msra.mxu0 %v847_v5  ;;  %v914_v24 = vld [vmem:[%s1135_s20 + $0x6c] sm:$0xf0]  ;;  %v912_v25 = vld [vmem:[%s1135_s20 + $0x64] sm:$0xf]  ;;  %v843_v26 = vor.u32 %v917_v18, %v840_v19  ;;  %v816_v27 = vld [vmem:[%s1135_s20 + $0x70] sm:$0xf0] }
  0x54   : > { %559 = vmatpush.bf16.msra.mxu1 %v851_v9  ;;  %573 = vmatpush.bf16.msra.mxu2 %v855_v10  ;;  %v822_v28 = vld [vmem:[%s1135_s20 + $0x68] sm:$0xf]  ;;  %v915_v29 = vld [vmem:[%s1135_s20 + $0x74] sm:$0xf0]  ;;  %v913_v30 = vld [vmem:[%s1135_s20 + $0x6c] sm:$0xf]  ;;  %v815_v32 = vor.u32 %v914_v24, %v814_v23  ;;  %v819_v33 = vor.u32 %v912_v25, %v816_v27 }
  0x55   : > { %587 = vmatpush.bf16.msra.mxu3 %v859_v14  ;;  %v824_v31 = vld [vmem:[%s1135_s20 + $0x78] sm:$0xf0]  ;;  %v823_v34 = vor.u32 %v915_v29, %v822_v28  ;;  %v798_v35 = vld [vmem:[%s1135_s20 + $0x40] sm:$0xf]  ;;  %v910_v36 = vld [vmem:[%s1135_s20 + $0x4c] sm:$0xf0] }
  0x56   : > { %v908_v37 = vld [vmem:[%s1135_s20 + $0x44] sm:$0xf]  ;;  %v827_v38 = vor.u32 %v913_v30, %v824_v31  ;;  %v800_v39 = vld [vmem:[%s1135_s20 + $0x50] sm:$0xf0]  ;;  %v806_v40 = vld [vmem:[%s1135_s20 + $0x48] sm:$0xf]  ;;  %v799_v44 = vor.u32 %v910_v36, %v798_v35 }
  0x57   : > { %546 = vmatpush.bf16.msra.mxu0 %v831_v20  ;;  %v911_v41 = vld [vmem:[%s1135_s20 + $0x54] sm:$0xf0]  ;;  %v909_v42 = vld [vmem:[%s1135_s20 + $0x4c] sm:$0xf]  ;;  %v808_v43 = vld [vmem:[%s1135_s20 + $0x58] sm:$0xf0]  ;;  %v803_v46 = vor.u32 %v908_v37, %v800_v39 }
  0x58   : > { %560 = vmatpush.bf16.msra.mxu1 %v835_v21  ;;  %574 = vmatpush.bf16.msra.mxu2 %v839_v22  ;;  %v782_v45 = vld [vmem:[%s1135_s20 + $0x20] sm:$0xf]  ;;  %v807_v47 = vor.u32 %v911_v41, %v806_v40  ;;  %v906_v48 = vld [vmem:[%s1135_s20 + $0x2c] sm:$0xf0]  ;;  %v904_v49 = vld [vmem:[%s1135_s20 + $0x24] sm:$0xf]  ;;  %v811_v51 = vor.u32 %v909_v42, %v808_v43 }
  0x59   : > { %588 = vmatpush.bf16.msra.mxu3 %v843_v26  ;;  %v784_v50 = vld [vmem:[%s1135_s20 + $0x30] sm:$0xf0]  ;;  %v790_v52 = vld [vmem:[%s1135_s20 + $0x28] sm:$0xf]  ;;  %v907_v53 = vld [vmem:[%s1135_s20 + $0x34] sm:$0xf0]  ;;  %v783_v58 = vor.u32 %v906_v48, %v782_v45 }
  0x5a   : > { %v365_v54 = vld [vmem:[%s1259_s2] sm:$0xff]  ;;  %v905_v55 = vld [vmem:[%s1135_s20 + $0x2c] sm:$0xf]  ;;  %v792_v56 = vld [vmem:[%s1135_s20 + $0x38] sm:$0xf0]  ;;  %v983_v57 = vmov 0   ;;  %v787_v59 = vor.u32 %v904_v49, %v784_v50  ;;  %v791_v60 = vor.u32 %v907_v53, %v790_v52 }
  0x5b   : > { %547 = vmatpush.bf16.msra.mxu0 %v815_v32  ;;  %958 = vset.pattern.permute.xlu0 %v983_v57  ;;  %v766_v61 = vld [vmem:[%s1135_s20] sm:$0xf]  ;;  %v902_v62 = vld [vmem:[%s1135_s20 + $0xc] sm:$0xf0]  ;;  %v900_v63 = vld [vmem:[%s1135_s20 + $0x4] sm:$0xf]  ;;  %v795_v0 = vor.u32 %v905_v55, %v792_v56 }
  0x5c   : > { %561 = vmatpush.bf16.msra.mxu1 %v819_v33  ;;  %575 = vmatpush.bf16.msra.mxu2 %v823_v34  ;;  %v768_v1 = vld [vmem:[%s1135_s20 + $0x10] sm:$0xf0]  ;;  %v774_v2 = vld [vmem:[%s1135_s20 + $0x8] sm:$0xf]  ;;  %v903_v3 = vld [vmem:[%s1135_s20 + $0x14] sm:$0xf0]  ;;  %v767_v6 = vor.u32 %v902_v62, %v766_v61 }
  0x5d   : > { %589 = vmatpush.bf16.msra.mxu3 %v827_v38  ;;  %369 = vperm.xlu0 %958, %v365_v54   ;;  %v901_v4 = vld [vmem:[%s1135_s20 + $0xc] sm:$0xf]  ;;  %v776_v5 = vld [vmem:[%s1135_s20 + $0x18] sm:$0xf0]  ;;  %v771_v7 = vor.u32 %v900_v63, %v768_v1  ;;  %v775_v8 = vor.u32 %v903_v3, %v774_v2  ;;  %v899_v11 = vld [vmem:[%s1257_s0] sm:$0xff]  ;;  %s932_s5 = sshll.u32 (%p1043_p5), %s746_s18, 5 }
  0x5e   : > { %v366_v9 = vld [vmem:[%s1259_s2 + $0x8] sm:$0xff]  ;;  %v779_v10 = vor.u32 %v901_v4, %v776_v5  ;;  %v599_v14 = vld [vmem:[%s1212_s30] sm:$0xff]  ;;  %v601_v25 = vld [vmem:[%s1212_s30 + $0x10] sm:$0xff]  ;;  %s640_s8 = scalar_lea.vmem (%p1043_p5), %s1261_s4, %s932_s5 }
  0x5f   : > { %548 = vmatpush.bf16.msra.mxu0 %v799_v44  ;;  %v600_v17 = vld [vmem:[%s1212_s30 + $0x8] sm:$0xff]  ;;  %v602_v28 = vld [vmem:[%s1212_s30 + $0x18] sm:$0xff]  ;;  %v603_v30 = vld [vmem:[%s1212_s30 + $0x20] sm:$0xff] }
  0x60   : > { %562 = vmatpush.bf16.msra.mxu1 %v803_v46  ;;  %576 = vmatpush.bf16.msra.mxu2 %v807_v47  ;;  %v604_v34 = vld [vmem:[%s1212_s30 + $0x28] sm:$0xff]  ;;  %v605_v45 = vld [vmem:[%s1212_s30 + $0x30] sm:$0xff]  ;;  %v606_v48 = vld [vmem:[%s1212_s30 + $0x38] sm:$0xff] }
  0x61   : > { %590 = vmatpush.bf16.msra.mxu3 %v811_v51 }
  0x63   : > { %549 = vmatpush.bf16.msra.mxu0 %v783_v58 }
  0x64   : > { %563 = vmatpush.bf16.msra.mxu1 %v787_v59  ;;  %577 = vmatpush.bf16.msra.mxu2 %v791_v60 }
  0x65   : > { %591 = vmatpush.bf16.msra.mxu3 %v795_v0  ;;  %374 = vperm.xlu0 %958, %v366_v9  }
  0x67   : > { %550 = vmatpush.bf16.msra.mxu0 %v767_v6 }
  0x68   : > { %564 = vmatpush.bf16.msra.mxu1 %v771_v7  ;;  %578 = vmatpush.bf16.msra.mxu2 %v775_v8 }
  0x69   : > { %592 = vmatpush.bf16.msra.mxu3 %v779_v10 }
  0x6a   : > { %551 = vmatmul.bf16.vlgmr.msra.gmra.mxu0 %v899_v11 }
  0x6b   : > { %565 = vmatmul.bf16.vlgmr.msra.gmra.mxu1 %v899_v11  ;;  %579 = vmatmul.bf16.vlgmr.msra.gmra.mxu2 %v899_v11 }
  0x6c   : > { %593 = vmatmul.bf16.vlgmr.msra.gmra.mxu3 %v899_v11 }
  0xcf   : > { %v370_v12 = vpop.permute.xlu0 %369 }
  0xd7   : > { %v375_v23 = vpop.permute.xlu0 %374 }
  0xe7   : > { %v552_v13 = vpop.f32.mrf.mxu0 }
  0xe8   : > { %v553_v15 = vadd.f32 %v552_v13, %v370_v12  ;;  %v566_v16 = vpop.f32.mrf.mxu1 }
  0xe9   : > { %v567_v18 = vadd.f32 %v566_v16, %v370_v12 }
  0xea   : > { %v607_v19 = vadd.f32 %v599_v14, %v553_v15 }
  0xeb   : > { %v608_v20 = vadd.f32 %v600_v17, %v567_v18 }
  0xec   : > { %v615_v21 = vmax.f32 %v607_v19, 0.0 }
  0xed   : > { %v616_v22 = vmax.f32 %v608_v20, 0.0 }
  0xee   : > { %623 = vst [vmem:[%s1216_s15] sm:$0xff] %v615_v21  ;;  %v580_v24 = vpop.f32.mrf.mxu2 }
  0xef   : > { %624 = vst [vmem:[%s1216_s15 + $0x8] sm:$0xff] %v616_v22  ;;  %v581_v26 = vadd.f32 %v580_v24, %v370_v12  ;;  %v594_v27 = vpop.f32.mrf.mxu3  ;;  %v554_v29 = vpop.f32.mrf.mxu0 }
  0xf0   : > { %v595_v31 = vadd.f32 %v594_v27, %v370_v12  ;;  %v555_v32 = vadd.f32 %v554_v29, %v375_v23  ;;  %v568_v33 = vpop.f32.mrf.mxu1 }
  0xf1   : > { %v609_v35 = vadd.f32 %v601_v25, %v581_v26  ;;  %v569_v36 = vadd.f32 %v568_v33, %v375_v23 }
  0xf2   : > { %v610_v37 = vadd.f32 %v602_v28, %v595_v31  ;;  %v611_v38 = vadd.f32 %v603_v30, %v555_v32 }
  0xf3   : > { %v617_v39 = vmax.f32 %v609_v35, 0.0  ;;  %v612_v40 = vadd.f32 %v604_v34, %v569_v36 }
  0xf4   : > { %v618_v41 = vmax.f32 %v610_v37, 0.0  ;;  %v619_v42 = vmax.f32 %v611_v38, 0.0 }
  0xf5   : > { %625 = vst [vmem:[%s1216_s15 + $0x10] sm:$0xff] %v617_v39  ;;  %v620_v43 = vmax.f32 %v612_v40, 0.0  ;;  %v653_v54 = vld [vmem:[%s1216_s15] sm:$0xff] (%p1043_p5) }
  0xf6   : > { %626 = vst [vmem:[%s1216_s15 + $0x18] sm:$0xff] %v618_v41  ;;  %v582_v44 = vpop.f32.mrf.mxu2  ;;  %v655_v55 = vld [vmem:[%s1216_s15 + $0x8] sm:$0xff] (%p1043_p5) }
  0xf7   : > { %627 = vst [vmem:[%s1216_s15 + $0x20] sm:$0xff] %v619_v42  ;;  %v583_v46 = vadd.f32 %v582_v44, %v375_v23  ;;  %v596_v47 = vpop.f32.mrf.mxu3 }
  0xf8   : > { %628 = vst [vmem:[%s1216_s15 + $0x28] sm:$0xff] %v620_v43  ;;  %v597_v49 = vadd.f32 %v596_v47, %v375_v23 }
  0xf9   : > { %v613_v50 = vadd.f32 %v605_v45, %v583_v46  ;;  %654 = vst [vmem:[%s640_s8] sm:$0xff] (%p1043_p5), %v653_v54 }
  0xfa   : > { %v614_v51 = vadd.f32 %v606_v48, %v597_v49  ;;  %637 = sbr.rel (!%p1043_p5) target bundleno = 263 (0x107), region = 86  ;;  %656 = vst [vmem:[%s640_s8 + $0x8] sm:$0xff] (%p1043_p5), %v655_v55 }
  0xfb   : > { %v621_v52 = vmax.f32 %v613_v50, 0.0 }
  0xfc   : > { %v622_v53 = vmax.f32 %v614_v51, 0.0  ;;  %v657_v56 = vld [vmem:[%s1216_s15 + $0x10] sm:$0xff] (%p1043_p5) }
  0xfd   : > { %629 = vst [vmem:[%s1216_s15 + $0x30] sm:$0xff] %v621_v52  ;;  %v659_v57 = vld [vmem:[%s1216_s15 + $0x18] sm:$0xff] (%p1043_p5) }
  0xfe   : > { %630 = vst [vmem:[%s1216_s15 + $0x38] sm:$0xff] %v622_v53  ;;  %v661_v58 = vld [vmem:[%s1216_s15 + $0x20] sm:$0xff] (%p1043_p5) }
  0xff   : > { %658 = vst [vmem:[%s640_s8 + $0x10] sm:$0xff] %v657_v56  ;;  %v663_v59 = vld [vmem:[%s1216_s15 + $0x28] sm:$0xff] }
 0x100   : > { %660 = vst [vmem:[%s640_s8 + $0x18] sm:$0xff] %v659_v57 }
 0x101   : > { %662 = vst [vmem:[%s640_s8 + $0x80] sm:$0xff] %v661_v58 }
 0x102   : > { %664 = vst [vmem:[%s640_s8 + $0x88] sm:$0xff] %v663_v59 }
 0x104   : > { %v665_v60 = vld [vmem:[%s1216_s15 + $0x30] sm:$0xff] }
 0x105   : > { %v667_v61 = vld [vmem:[%s1216_s15 + $0x38] sm:$0xff]  ;;  %666 = vst [vmem:[%s640_s8 + $0x90] sm:$0xff] %v665_v60 }
 0x106   : > { %668 = vst [vmem:[%s640_s8 + $0x98] sm:$0xff] %v667_v61 }
 0x107 PF: > { %p11_p10 = scmp.ge.s32.totalorder %s1026_s19, 6   ;;  %s1264_s15 = smov %s977_s16 }
 0x108   : > { %s1265_s16 = smov %s1037_s22  ;;  %s1266_s17 = smov %s1026_s19 }
 0x109   :  { %13 = sbr.rel (!%p11_p10) target bundleno = 2 (0x2), region = 148 }

// kernel: _lambda_.15
= control target key start
LH: loop header
LB: loop body
LE: loop exit
PB: predicated region body
PF: predicated region fallthrough
CT: control target
= control target key end

     0   :  { %s715_s1 = inlined_call_operand.vmem [shape: bf16[128,512], index: 1, kind: input, shape index: {}]   ;;  %s716_s2 = inlined_call_operand.vmem [shape: f32[16,1], index: 2, kind: input, shape index: {}]   ;;  %s717_s0 = inlined_call_operand.vmem [shape: bf16[16,128], index: 0, kind: input, shape index: {}]   ;;  %s718_s3 = inlined_call_operand.vmem [shape: f32[16,512], index: 3, kind: output, shape index: {}]  }
   0x1   :  { %v420_v0 = vld [vmem:[%s715_s1 + $0xe0] sm:$0xf]  ;;  %v465_v1 = vld [vmem:[%s715_s1 + $0xec] sm:$0xf0]  ;;  %v463_v2 = vld [vmem:[%s715_s1 + $0xe4] sm:$0xf] }
   0x2   :  { %v421_v3 = vor.u32 %v465_v1, %v420_v0  ;;  %v422_v4 = vld [vmem:[%s715_s1 + $0xf0] sm:$0xf0]  ;;  %v428_v5 = vld [vmem:[%s715_s1 + $0xe8] sm:$0xf]  ;;  %v466_v6 = vld [vmem:[%s715_s1 + $0xf4] sm:$0xf0] }
   0x3   :  { %v425_v7 = vor.u32 %v463_v2, %v422_v4  ;;  %v429_v8 = vor.u32 %v466_v6, %v428_v5  ;;  %v464_v9 = vld [vmem:[%s715_s1 + $0xec] sm:$0xf]  ;;  %v430_v10 = vld [vmem:[%s715_s1 + $0xf8] sm:$0xf0]  ;;  %v404_v11 = vld [vmem:[%s715_s1 + $0xc0] sm:$0xf] }
   0x4   :  { %226 = vmatpush.bf16.msra.mxu0 %v421_v3  ;;  %v433_v12 = vor.u32 %v464_v9, %v430_v10  ;;  %v461_v13 = vld [vmem:[%s715_s1 + $0xcc] sm:$0xf0]  ;;  %v459_v14 = vld [vmem:[%s715_s1 + $0xc4] sm:$0xf]  ;;  %v406_v15 = vld [vmem:[%s715_s1 + $0xd0] sm:$0xf0] }
   0x5   :  { %240 = vmatpush.bf16.msra.mxu1 %v425_v7  ;;  %254 = vmatpush.bf16.msra.mxu2 %v429_v8  ;;  %v405_v16 = vor.u32 %v461_v13, %v404_v11  ;;  %v409_v17 = vor.u32 %v459_v14, %v406_v15  ;;  %v412_v18 = vld [vmem:[%s715_s1 + $0xc8] sm:$0xf]  ;;  %v462_v19 = vld [vmem:[%s715_s1 + $0xd4] sm:$0xf0]  ;;  %v460_v20 = vld [vmem:[%s715_s1 + $0xcc] sm:$0xf] }
   0x6   :  { %268 = vmatpush.bf16.msra.mxu3 %v433_v12  ;;  %v413_v21 = vor.u32 %v462_v19, %v412_v18  ;;  %v414_v22 = vld [vmem:[%s715_s1 + $0xd8] sm:$0xf0]  ;;  %v388_v23 = vld [vmem:[%s715_s1 + $0xa0] sm:$0xf]  ;;  %v457_v24 = vld [vmem:[%s715_s1 + $0xac] sm:$0xf0] }
   0x7   :  { %v417_v25 = vor.u32 %v460_v20, %v414_v22  ;;  %v455_v26 = vld [vmem:[%s715_s1 + $0xa4] sm:$0xf]  ;;  %v390_v27 = vld [vmem:[%s715_s1 + $0xb0] sm:$0xf0]  ;;  %v396_v28 = vld [vmem:[%s715_s1 + $0xa8] sm:$0xf]  ;;  %v389_v29 = vor.u32 %v457_v24, %v388_v23 }
   0x8   :  { %227 = vmatpush.bf16.msra.mxu0 %v405_v16  ;;  %v458_v30 = vld [vmem:[%s715_s1 + $0xb4] sm:$0xf0]  ;;  %v456_v31 = vld [vmem:[%s715_s1 + $0xac] sm:$0xf]  ;;  %v398_v32 = vld [vmem:[%s715_s1 + $0xb8] sm:$0xf0]  ;;  %v393_v33 = vor.u32 %v455_v26, %v390_v27 }
   0x9   :  { %241 = vmatpush.bf16.msra.mxu1 %v409_v17  ;;  %255 = vmatpush.bf16.msra.mxu2 %v413_v21  ;;  %v397_v34 = vor.u32 %v458_v30, %v396_v28  ;;  %v372_v35 = vld [vmem:[%s715_s1 + $0x80] sm:$0xf]  ;;  %v453_v36 = vld [vmem:[%s715_s1 + $0x8c] sm:$0xf0]  ;;  %v451_v37 = vld [vmem:[%s715_s1 + $0x84] sm:$0xf]  ;;  %v401_v38 = vor.u32 %v456_v31, %v398_v32 }
   0xa   :  { %269 = vmatpush.bf16.msra.mxu3 %v417_v25  ;;  %v374_v39 = vld [vmem:[%s715_s1 + $0x90] sm:$0xf0]  ;;  %v380_v40 = vld [vmem:[%s715_s1 + $0x88] sm:$0xf]  ;;  %v454_v41 = vld [vmem:[%s715_s1 + $0x94] sm:$0xf0]  ;;  %v373_v44 = vor.u32 %v453_v36, %v372_v35 }
   0xb   :  { %v452_v42 = vld [vmem:[%s715_s1 + $0x8c] sm:$0xf]  ;;  %v382_v43 = vld [vmem:[%s715_s1 + $0x98] sm:$0xf0]  ;;  %v377_v45 = vor.u32 %v451_v37, %v374_v39  ;;  %v381_v46 = vor.u32 %v454_v41, %v380_v40  ;;  %v356_v47 = vld [vmem:[%s715_s1 + $0x60] sm:$0xf] }
   0xc   :  { %228 = vmatpush.bf16.msra.mxu0 %v389_v29  ;;  %v449_v48 = vld [vmem:[%s715_s1 + $0x6c] sm:$0xf0]  ;;  %v447_v49 = vld [vmem:[%s715_s1 + $0x64] sm:$0xf]  ;;  %v385_v50 = vor.u32 %v452_v42, %v382_v43  ;;  %v358_v51 = vld [vmem:[%s715_s1 + $0x70] sm:$0xf0] }
   0xd   :  { %242 = vmatpush.bf16.msra.mxu1 %v393_v33  ;;  %256 = vmatpush.bf16.msra.mxu2 %v397_v34  ;;  %v364_v52 = vld [vmem:[%s715_s1 + $0x68] sm:$0xf]  ;;  %v450_v53 = vld [vmem:[%s715_s1 + $0x74] sm:$0xf0]  ;;  %v448_v54 = vld [vmem:[%s715_s1 + $0x6c] sm:$0xf]  ;;  %v357_v56 = vor.u32 %v449_v48, %v356_v47  ;;  %v361_v57 = vor.u32 %v447_v49, %v358_v51 }
   0xe   :  { %270 = vmatpush.bf16.msra.mxu3 %v401_v38  ;;  %v366_v55 = vld [vmem:[%s715_s1 + $0x78] sm:$0xf0]  ;;  %v365_v58 = vor.u32 %v450_v53, %v364_v52  ;;  %v340_v59 = vld [vmem:[%s715_s1 + $0x40] sm:$0xf]  ;;  %v445_v60 = vld [vmem:[%s715_s1 + $0x4c] sm:$0xf0] }
   0xf   :  { %v443_v61 = vld [vmem:[%s715_s1 + $0x44] sm:$0xf]  ;;  %v369_v62 = vor.u32 %v448_v54, %v366_v55  ;;  %v342_v63 = vld [vmem:[%s715_s1 + $0x50] sm:$0xf0]  ;;  %v348_v0 = vld [vmem:[%s715_s1 + $0x48] sm:$0xf]  ;;  %v341_v4 = vor.u32 %v445_v60, %v340_v59 }
  0x10   :  { %229 = vmatpush.bf16.msra.mxu0 %v373_v44  ;;  %v446_v1 = vld [vmem:[%s715_s1 + $0x54] sm:$0xf0]  ;;  %v444_v2 = vld [vmem:[%s715_s1 + $0x4c] sm:$0xf]  ;;  %v350_v3 = vld [vmem:[%s715_s1 + $0x58] sm:$0xf0]  ;;  %v345_v6 = vor.u32 %v443_v61, %v342_v63 }
  0x11   :  { %243 = vmatpush.bf16.msra.mxu1 %v377_v45  ;;  %257 = vmatpush.bf16.msra.mxu2 %v381_v46  ;;  %v324_v5 = vld [vmem:[%s715_s1 + $0x20] sm:$0xf]  ;;  %v349_v7 = vor.u32 %v446_v1, %v348_v0  ;;  %v441_v8 = vld [vmem:[%s715_s1 + $0x2c] sm:$0xf0]  ;;  %v439_v9 = vld [vmem:[%s715_s1 + $0x24] sm:$0xf]  ;;  %v353_v11 = vor.u32 %v444_v2, %v350_v3 }
  0x12   :  { %271 = vmatpush.bf16.msra.mxu3 %v385_v50  ;;  %v326_v10 = vld [vmem:[%s715_s1 + $0x30] sm:$0xf0]  ;;  %v332_v12 = vld [vmem:[%s715_s1 + $0x28] sm:$0xf]  ;;  %v442_v13 = vld [vmem:[%s715_s1 + $0x34] sm:$0xf0]  ;;  %v325_v18 = vor.u32 %v441_v8, %v324_v5 }
  0x13   :  { %v48_v14 = vld [vmem:[%s716_s2] sm:$0xff]  ;;  %v440_v15 = vld [vmem:[%s715_s1 + $0x2c] sm:$0xf]  ;;  %v334_v16 = vld [vmem:[%s715_s1 + $0x38] sm:$0xf0]  ;;  %v469_v17 = vmov 0   ;;  %v329_v19 = vor.u32 %v439_v9, %v326_v10  ;;  %v333_v20 = vor.u32 %v442_v13, %v332_v12 }
  0x14   :  { %230 = vmatpush.bf16.msra.mxu0 %v357_v56  ;;  %468 = vset.pattern.permute.xlu0 %v469_v17  ;;  %v308_v21 = vld [vmem:[%s715_s1] sm:$0xf]  ;;  %v437_v22 = vld [vmem:[%s715_s1 + $0xc] sm:$0xf0]  ;;  %v435_v23 = vld [vmem:[%s715_s1 + $0x4] sm:$0xf]  ;;  %v337_v24 = vor.u32 %v440_v15, %v334_v16 }
  0x15   :  { %244 = vmatpush.bf16.msra.mxu1 %v361_v57  ;;  %258 = vmatpush.bf16.msra.mxu2 %v365_v58  ;;  %v310_v25 = vld [vmem:[%s715_s1 + $0x10] sm:$0xf0]  ;;  %v316_v26 = vld [vmem:[%s715_s1 + $0x8] sm:$0xf]  ;;  %v438_v27 = vld [vmem:[%s715_s1 + $0x14] sm:$0xf0]  ;;  %v309_v30 = vor.u32 %v437_v22, %v308_v21 }
  0x16   :  { %272 = vmatpush.bf16.msra.mxu3 %v369_v62  ;;  %52 = vperm.xlu0 %468, %v48_v14   ;;  %v436_v28 = vld [vmem:[%s715_s1 + $0xc] sm:$0xf]  ;;  %v318_v29 = vld [vmem:[%s715_s1 + $0x18] sm:$0xf0]  ;;  %v313_v31 = vor.u32 %v435_v23, %v310_v25  ;;  %v317_v32 = vor.u32 %v438_v27, %v316_v26  ;;  %v434_v35 = vld [vmem:[%s717_s0] sm:$0xff] }
  0x17   :  { %v49_v33 = vld [vmem:[%s716_s2 + $0x8] sm:$0xff]  ;;  %v321_v34 = vor.u32 %v436_v28, %v318_v29 }
  0x18   :  { %231 = vmatpush.bf16.msra.mxu0 %v341_v4 }
  0x19   :  { %245 = vmatpush.bf16.msra.mxu1 %v345_v6  ;;  %259 = vmatpush.bf16.msra.mxu2 %v349_v7 }
  0x1a   :  { %273 = vmatpush.bf16.msra.mxu3 %v353_v11 }
  0x1c   :  { %232 = vmatpush.bf16.msra.mxu0 %v325_v18 }
  0x1d   :  { %246 = vmatpush.bf16.msra.mxu1 %v329_v19  ;;  %260 = vmatpush.bf16.msra.mxu2 %v333_v20 }
  0x1e   :  { %274 = vmatpush.bf16.msra.mxu3 %v337_v24  ;;  %57 = vperm.xlu0 %468, %v49_v33  }
  0x20   :  { %233 = vmatpush.bf16.msra.mxu0 %v309_v30 }
  0x21   :  { %247 = vmatpush.bf16.msra.mxu1 %v313_v31  ;;  %261 = vmatpush.bf16.msra.mxu2 %v317_v32 }
  0x22   :  { %275 = vmatpush.bf16.msra.mxu3 %v321_v34 }
  0x23   :  { %234 = vmatmul.bf16.vlgmr.msra.gmra.mxu0 %v434_v35 }
  0x24   :  { %248 = vmatmul.bf16.vlgmr.msra.gmra.mxu1 %v434_v35  ;;  %262 = vmatmul.bf16.vlgmr.msra.gmra.mxu2 %v434_v35 }
  0x25   :  { %276 = vmatmul.bf16.vlgmr.msra.gmra.mxu3 %v434_v35 }
  0x88   :  { %v53_v36 = vpop.permute.xlu0 %52 }
  0x90   :  { %v58_v43 = vpop.permute.xlu0 %57 }
  0xa0   :  { %v235_v37 = vpop.f32.mrf.mxu0 }
  0xa1   :  { %v236_v38 = vadd.f32 %v235_v37, %v53_v36  ;;  %v249_v39 = vpop.f32.mrf.mxu1 }
  0xa2   :  { %v250_v40 = vadd.f32 %v249_v39, %v53_v36 }
  0xa3   :  { %v282_v41 = vmax.f32 %v236_v38, 0.0 }
  0xa4   :  { %v283_v42 = vmax.f32 %v250_v40, 0.0 }
  0xa5   :  { %290 = vst [vmem:[%s718_s3] sm:$0xff] %v282_v41 }
  0xa6   :  { %291 = vst [vmem:[%s718_s3 + $0x8] sm:$0xff] %v283_v42 }
  0xa7   :  { %v263_v44 = vpop.f32.mrf.mxu2 }
  0xa8   :  { %v264_v45 = vadd.f32 %v263_v44, %v53_v36  ;;  %v277_v46 = vpop.f32.mrf.mxu3  ;;  %v237_v47 = vpop.f32.mrf.mxu0 }
  0xa9   :  { %v278_v48 = vadd.f32 %v277_v46, %v53_v36  ;;  %v238_v49 = vadd.f32 %v237_v47, %v58_v43  ;;  %v251_v50 = vpop.f32.mrf.mxu1 }
  0xaa   :  { %v284_v51 = vmax.f32 %v264_v45, 0.0  ;;  %v252_v52 = vadd.f32 %v251_v50, %v58_v43 }
  0xab   :  { %v285_v53 = vmax.f32 %v278_v48, 0.0  ;;  %v286_v54 = vmax.f32 %v238_v49, 0.0 }
  0xac   :  { %292 = vst [vmem:[%s718_s3 + $0x10] sm:$0xff] %v284_v51  ;;  %v287_v55 = vmax.f32 %v252_v52, 0.0 }
  0xad   :  { %293 = vst [vmem:[%s718_s3 + $0x18] sm:$0xff] %v285_v53 }
  0xae   :  { %294 = vst [vmem:[%s718_s3 + $0x20] sm:$0xff] %v286_v54 }
  0xaf   :  { %295 = vst [vmem:[%s718_s3 + $0x28] sm:$0xff] %v287_v55  ;;  %v265_v56 = vpop.f32.mrf.mxu2 }
  0xb0   :  { %v266_v57 = vadd.f32 %v265_v56, %v58_v43  ;;  %v279_v58 = vpop.f32.mrf.mxu3 }
  0xb1   :  { %v280_v59 = vadd.f32 %v279_v58, %v58_v43 }
  0xb2   :  { %v288_v60 = vmax.f32 %v266_v57, 0.0 }
  0xb3   :  { %v289_v61 = vmax.f32 %v280_v59, 0.0 }
  0xb4   :  { %296 = vst [vmem:[%s718_s3 + $0x30] sm:$0xff] %v288_v60 }
  0xb5   :  { %297 = vst [vmem:[%s718_s3 + $0x38] sm:$0xff] %v289_v61 }

// kernel: _lambda_.16
= control target key start
LH: loop header
LB: loop body
LE: loop exit
PB: predicated region body
PF: predicated region fallthrough
CT: control target
= control target key end

     0   :  { %s707_s1 = inlined_call_operand.vmem [shape: bf16[128,512], index: 1, kind: input, shape index: {}]   ;;  %s708_s2 = inlined_call_operand.vmem [shape: f32[16,1], index: 2, kind: input, shape index: {}]   ;;  %s709_s0 = inlined_call_operand.vmem [shape: bf16[16,128], index: 0, kind: input, shape index: {}]   ;;  %s710_s3 = inlined_call_operand.vmem [shape: f32[16,512], index: 3, kind: output, shape index: {}]  }
   0x1   :  { %v412_v0 = vld [vmem:[%s707_s1 + $0xe0] sm:$0xf]  ;;  %v457_v1 = vld [vmem:[%s707_s1 + $0xec] sm:$0xf0]  ;;  %v455_v2 = vld [vmem:[%s707_s1 + $0xe4] sm:$0xf] }
   0x2   :  { %v413_v3 = vor.u32 %v457_v1, %v412_v0  ;;  %v414_v4 = vld [vmem:[%s707_s1 + $0xf0] sm:$0xf0]  ;;  %v420_v5 = vld [vmem:[%s707_s1 + $0xe8] sm:$0xf]  ;;  %v458_v6 = vld [vmem:[%s707_s1 + $0xf4] sm:$0xf0] }
   0x3   :  { %v417_v7 = vor.u32 %v455_v2, %v414_v4  ;;  %v421_v8 = vor.u32 %v458_v6, %v420_v5  ;;  %v456_v9 = vld [vmem:[%s707_s1 + $0xec] sm:$0xf]  ;;  %v422_v10 = vld [vmem:[%s707_s1 + $0xf8] sm:$0xf0]  ;;  %v396_v11 = vld [vmem:[%s707_s1 + $0xc0] sm:$0xf] }
   0x4   :  { %226 = vmatpush.bf16.msra.mxu0 %v413_v3  ;;  %v425_v12 = vor.u32 %v456_v9, %v422_v10  ;;  %v453_v13 = vld [vmem:[%s707_s1 + $0xcc] sm:$0xf0]  ;;  %v451_v14 = vld [vmem:[%s707_s1 + $0xc4] sm:$0xf]  ;;  %v398_v15 = vld [vmem:[%s707_s1 + $0xd0] sm:$0xf0] }
   0x5   :  { %240 = vmatpush.bf16.msra.mxu1 %v417_v7  ;;  %254 = vmatpush.bf16.msra.mxu2 %v421_v8  ;;  %v397_v16 = vor.u32 %v453_v13, %v396_v11  ;;  %v401_v17 = vor.u32 %v451_v14, %v398_v15  ;;  %v404_v18 = vld [vmem:[%s707_s1 + $0xc8] sm:$0xf]  ;;  %v454_v19 = vld [vmem:[%s707_s1 + $0xd4] sm:$0xf0]  ;;  %v452_v20 = vld [vmem:[%s707_s1 + $0xcc] sm:$0xf] }
   0x6   :  { %268 = vmatpush.bf16.msra.mxu3 %v425_v12  ;;  %v405_v21 = vor.u32 %v454_v19, %v404_v18  ;;  %v406_v22 = vld [vmem:[%s707_s1 + $0xd8] sm:$0xf0]  ;;  %v380_v23 = vld [vmem:[%s707_s1 + $0xa0] sm:$0xf]  ;;  %v449_v24 = vld [vmem:[%s707_s1 + $0xac] sm:$0xf0] }
   0x7   :  { %v409_v25 = vor.u32 %v452_v20, %v406_v22  ;;  %v447_v26 = vld [vmem:[%s707_s1 + $0xa4] sm:$0xf]  ;;  %v382_v27 = vld [vmem:[%s707_s1 + $0xb0] sm:$0xf0]  ;;  %v388_v28 = vld [vmem:[%s707_s1 + $0xa8] sm:$0xf]  ;;  %v381_v29 = vor.u32 %v449_v24, %v380_v23 }
   0x8   :  { %227 = vmatpush.bf16.msra.mxu0 %v397_v16  ;;  %v450_v30 = vld [vmem:[%s707_s1 + $0xb4] sm:$0xf0]  ;;  %v448_v31 = vld [vmem:[%s707_s1 + $0xac] sm:$0xf]  ;;  %v390_v32 = vld [vmem:[%s707_s1 + $0xb8] sm:$0xf0]  ;;  %v385_v33 = vor.u32 %v447_v26, %v382_v27 }
   0x9   :  { %241 = vmatpush.bf16.msra.mxu1 %v401_v17  ;;  %255 = vmatpush.bf16.msra.mxu2 %v405_v21  ;;  %v389_v34 = vor.u32 %v450_v30, %v388_v28  ;;  %v364_v35 = vld [vmem:[%s707_s1 + $0x80] sm:$0xf]  ;;  %v445_v36 = vld [vmem:[%s707_s1 + $0x8c] sm:$0xf0]  ;;  %v443_v37 = vld [vmem:[%s707_s1 + $0x84] sm:$0xf]  ;;  %v393_v38 = vor.u32 %v448_v31, %v390_v32 }
   0xa   :  { %269 = vmatpush.bf16.msra.mxu3 %v409_v25  ;;  %v366_v39 = vld [vmem:[%s707_s1 + $0x90] sm:$0xf0]  ;;  %v372_v40 = vld [vmem:[%s707_s1 + $0x88] sm:$0xf]  ;;  %v446_v41 = vld [vmem:[%s707_s1 + $0x94] sm:$0xf0]  ;;  %v365_v44 = vor.u32 %v445_v36, %v364_v35 }
   0xb   :  { %v444_v42 = vld [vmem:[%s707_s1 + $0x8c] sm:$0xf]  ;;  %v374_v43 = vld [vmem:[%s707_s1 + $0x98] sm:$0xf0]  ;;  %v369_v45 = vor.u32 %v443_v37, %v366_v39  ;;  %v373_v46 = vor.u32 %v446_v41, %v372_v40  ;;  %v348_v47 = vld [vmem:[%s707_s1 + $0x60] sm:$0xf] }
   0xc   :  { %228 = vmatpush.bf16.msra.mxu0 %v381_v29  ;;  %v441_v48 = vld [vmem:[%s707_s1 + $0x6c] sm:$0xf0]  ;;  %v439_v49 = vld [vmem:[%s707_s1 + $0x64] sm:$0xf]  ;;  %v377_v50 = vor.u32 %v444_v42, %v374_v43  ;;  %v350_v51 = vld [vmem:[%s707_s1 + $0x70] sm:$0xf0] }
   0xd   :  { %242 = vmatpush.bf16.msra.mxu1 %v385_v33  ;;  %256 = vmatpush.bf16.msra.mxu2 %v389_v34  ;;  %v356_v52 = vld [vmem:[%s707_s1 + $0x68] sm:$0xf]  ;;  %v442_v53 = vld [vmem:[%s707_s1 + $0x74] sm:$0xf0]  ;;  %v440_v54 = vld [vmem:[%s707_s1 + $0x6c] sm:$0xf]  ;;  %v349_v56 = vor.u32 %v441_v48, %v348_v47  ;;  %v353_v57 = vor.u32 %v439_v49, %v350_v51 }
   0xe   :  { %270 = vmatpush.bf16.msra.mxu3 %v393_v38  ;;  %v358_v55 = vld [vmem:[%s707_s1 + $0x78] sm:$0xf0]  ;;  %v357_v58 = vor.u32 %v442_v53, %v356_v52  ;;  %v332_v59 = vld [vmem:[%s707_s1 + $0x40] sm:$0xf]  ;;  %v437_v60 = vld [vmem:[%s707_s1 + $0x4c] sm:$0xf0] }
   0xf   :  { %v435_v61 = vld [vmem:[%s707_s1 + $0x44] sm:$0xf]  ;;  %v361_v62 = vor.u32 %v440_v54, %v358_v55  ;;  %v334_v63 = vld [vmem:[%s707_s1 + $0x50] sm:$0xf0]  ;;  %v340_v0 = vld [vmem:[%s707_s1 + $0x48] sm:$0xf]  ;;  %v333_v4 = vor.u32 %v437_v60, %v332_v59 }
  0x10   :  { %229 = vmatpush.bf16.msra.mxu0 %v365_v44  ;;  %v438_v1 = vld [vmem:[%s707_s1 + $0x54] sm:$0xf0]  ;;  %v436_v2 = vld [vmem:[%s707_s1 + $0x4c] sm:$0xf]  ;;  %v342_v3 = vld [vmem:[%s707_s1 + $0x58] sm:$0xf0]  ;;  %v337_v6 = vor.u32 %v435_v61, %v334_v63 }
  0x11   :  { %243 = vmatpush.bf16.msra.mxu1 %v369_v45  ;;  %257 = vmatpush.bf16.msra.mxu2 %v373_v46  ;;  %v316_v5 = vld [vmem:[%s707_s1 + $0x20] sm:$0xf]  ;;  %v341_v7 = vor.u32 %v438_v1, %v340_v0  ;;  %v433_v8 = vld [vmem:[%s707_s1 + $0x2c] sm:$0xf0]  ;;  %v431_v9 = vld [vmem:[%s707_s1 + $0x24] sm:$0xf]  ;;  %v345_v11 = vor.u32 %v436_v2, %v342_v3 }
  0x12   :  { %271 = vmatpush.bf16.msra.mxu3 %v377_v50  ;;  %v318_v10 = vld [vmem:[%s707_s1 + $0x30] sm:$0xf0]  ;;  %v324_v12 = vld [vmem:[%s707_s1 + $0x28] sm:$0xf]  ;;  %v434_v13 = vld [vmem:[%s707_s1 + $0x34] sm:$0xf0]  ;;  %v317_v18 = vor.u32 %v433_v8, %v316_v5 }
  0x13   :  { %v48_v14 = vld [vmem:[%s708_s2] sm:$0xff]  ;;  %v432_v15 = vld [vmem:[%s707_s1 + $0x2c] sm:$0xf]  ;;  %v326_v16 = vld [vmem:[%s707_s1 + $0x38] sm:$0xf0]  ;;  %v461_v17 = vmov 0   ;;  %v321_v19 = vor.u32 %v431_v9, %v318_v10  ;;  %v325_v20 = vor.u32 %v434_v13, %v324_v12 }
  0x14   :  { %230 = vmatpush.bf16.msra.mxu0 %v349_v56  ;;  %460 = vset.pattern.permute.xlu0 %v461_v17  ;;  %v300_v21 = vld [vmem:[%s707_s1] sm:$0xf]  ;;  %v429_v22 = vld [vmem:[%s707_s1 + $0xc] sm:$0xf0]  ;;  %v427_v23 = vld [vmem:[%s707_s1 + $0x4] sm:$0xf]  ;;  %v329_v24 = vor.u32 %v432_v15, %v326_v16 }
  0x15   :  { %244 = vmatpush.bf16.msra.mxu1 %v353_v57  ;;  %258 = vmatpush.bf16.msra.mxu2 %v357_v58  ;;  %v302_v25 = vld [vmem:[%s707_s1 + $0x10] sm:$0xf0]  ;;  %v308_v26 = vld [vmem:[%s707_s1 + $0x8] sm:$0xf]  ;;  %v430_v27 = vld [vmem:[%s707_s1 + $0x14] sm:$0xf0]  ;;  %v301_v30 = vor.u32 %v429_v22, %v300_v21 }
  0x16   :  { %272 = vmatpush.bf16.msra.mxu3 %v361_v62  ;;  %52 = vperm.xlu0 %460, %v48_v14   ;;  %v428_v28 = vld [vmem:[%s707_s1 + $0xc] sm:$0xf]  ;;  %v310_v29 = vld [vmem:[%s707_s1 + $0x18] sm:$0xf0]  ;;  %v305_v31 = vor.u32 %v427_v23, %v302_v25  ;;  %v309_v32 = vor.u32 %v430_v27, %v308_v26  ;;  %v426_v35 = vld [vmem:[%s709_s0] sm:$0xff] }
  0x17   :  { %v49_v33 = vld [vmem:[%s708_s2 + $0x8] sm:$0xff]  ;;  %v313_v34 = vor.u32 %v428_v28, %v310_v29 }
  0x18   :  { %231 = vmatpush.bf16.msra.mxu0 %v333_v4 }
  0x19   :  { %245 = vmatpush.bf16.msra.mxu1 %v337_v6  ;;  %259 = vmatpush.bf16.msra.mxu2 %v341_v7 }
  0x1a   :  { %273 = vmatpush.bf16.msra.mxu3 %v345_v11 }
  0x1c   :  { %232 = vmatpush.bf16.msra.mxu0 %v317_v18 }
  0x1d   :  { %246 = vmatpush.bf16.msra.mxu1 %v321_v19  ;;  %260 = vmatpush.bf16.msra.mxu2 %v325_v20 }
  0x1e   :  { %274 = vmatpush.bf16.msra.mxu3 %v329_v24  ;;  %57 = vperm.xlu0 %460, %v49_v33  }
  0x20   :  { %233 = vmatpush.bf16.msra.mxu0 %v301_v30 }
  0x21   :  { %247 = vmatpush.bf16.msra.mxu1 %v305_v31  ;;  %261 = vmatpush.bf16.msra.mxu2 %v309_v32 }
  0x22   :  { %275 = vmatpush.bf16.msra.mxu3 %v313_v34 }
  0x23   :  { %234 = vmatmul.bf16.vlgmr.msra.gmra.mxu0 %v426_v35 }
  0x24   :  { %248 = vmatmul.bf16.vlgmr.msra.gmra.mxu1 %v426_v35  ;;  %262 = vmatmul.bf16.vlgmr.msra.gmra.mxu2 %v426_v35 }
  0x25   :  { %276 = vmatmul.bf16.vlgmr.msra.gmra.mxu3 %v426_v35 }
  0x88   :  { %v53_v36 = vpop.permute.xlu0 %52 }
  0x90   :  { %v58_v41 = vpop.permute.xlu0 %57 }
  0xa0   :  { %v235_v37 = vpop.f32.mrf.mxu0 }
  0xa1   :  { %v236_v38 = vadd.f32 %v235_v37, %v53_v36  ;;  %v249_v39 = vpop.f32.mrf.mxu1 }
  0xa2   :  { %v250_v40 = vadd.f32 %v249_v39, %v53_v36 }
  0xa3   :  { %282 = vst [vmem:[%s710_s3] sm:$0xff] %v236_v38 }
  0xa4   :  { %283 = vst [vmem:[%s710_s3 + $0x8] sm:$0xff] %v250_v40 }
  0xa7   :  { %v263_v42 = vpop.f32.mrf.mxu2 }
  0xa8   :  { %v264_v43 = vadd.f32 %v263_v42, %v53_v36  ;;  %v277_v44 = vpop.f32.mrf.mxu3  ;;  %v237_v45 = vpop.f32.mrf.mxu0 }
  0xa9   :  { %v278_v46 = vadd.f32 %v277_v44, %v53_v36  ;;  %v238_v47 = vadd.f32 %v237_v45, %v58_v41  ;;  %v251_v48 = vpop.f32.mrf.mxu1 }
  0xaa   :  { %284 = vst [vmem:[%s710_s3 + $0x10] sm:$0xff] %v264_v43  ;;  %v252_v49 = vadd.f32 %v251_v48, %v58_v41 }
  0xab   :  { %285 = vst [vmem:[%s710_s3 + $0x18] sm:$0xff] %v278_v46 }
  0xac   :  { %286 = vst [vmem:[%s710_s3 + $0x20] sm:$0xff] %v238_v47 }
  0xad   :  { %287 = vst [vmem:[%s710_s3 + $0x28] sm:$0xff] %v252_v49 }
  0xaf   :  { %v265_v50 = vpop.f32.mrf.mxu2 }
  0xb0   :  { %v266_v51 = vadd.f32 %v265_v50, %v58_v41  ;;  %v279_v52 = vpop.f32.mrf.mxu3 }
  0xb1   :  { %v280_v53 = vadd.f32 %v279_v52, %v58_v41 }
  0xb2   :  { %288 = vst [vmem:[%s710_s3 + $0x30] sm:$0xff] %v266_v51 }
  0xb3   :  { %289 = vst [vmem:[%s710_s3 + $0x38] sm:$0xff] %v280_v53 }

// kernel: _lambda_.17
= control target key start
LH: loop header
LB: loop body
LE: loop exit
PB: predicated region body
PF: predicated region fallthrough
CT: control target
= control target key end

     0   :  { %s1393_s1 = inlined_call_operand.vmem [shape: bf16[256,512], index: 1, kind: input, shape index: {}]   ;;  %s1394_s0 = inlined_call_operand.vmem [shape: bf16[16,256], index: 0, kind: input, shape index: {}]   ;;  %s1395_s2 = inlined_call_operand.vmem [shape: f32[16,1], index: 2, kind: input, shape index: {}]   ;;  %s1396_s3 = inlined_call_operand.vmem [shape: f32[16,512], index: 3, kind: input, shape index: {}]   ;;  %s1397_s4 = inlined_call_operand.vmem [shape: f32[16,512], index: 4, kind: output, shape index: {}]  }
   0x1   :  { %v695_v0 = vld [vmem:[%s1393_s1 + $0xe0] sm:$0xf]  ;;  %v869_v1 = vld [vmem:[%s1393_s1 + $0xec] sm:$0xf0]  ;;  %v867_v5 = vld [vmem:[%s1393_s1 + $0xe4] sm:$0xf] }
   0x2   :  { %v823_v2 = vld [vmem:[%s1393_s1 + $0x1e0] sm:$0xf]  ;;  %v696_v3 = vor.u32 %v869_v1, %v695_v0  ;;  %v901_v4 = vld [vmem:[%s1393_s1 + $0x1ec] sm:$0xf0]  ;;  %v697_v6 = vld [vmem:[%s1393_s1 + $0xf0] sm:$0xf0] }
   0x3   :  { %v824_v7 = vor.u32 %v901_v4, %v823_v2  ;;  %v700_v8 = vor.u32 %v867_v5, %v697_v6  ;;  %v899_v9 = vld [vmem:[%s1393_s1 + $0x1e4] sm:$0xf]  ;;  %v825_v10 = vld [vmem:[%s1393_s1 + $0x1f0] sm:$0xf0]  ;;  %v679_v11 = vld [vmem:[%s1393_s1 + $0xc0] sm:$0xf] }
   0x4   :  { %425 = vmatpush.bf16.msra.mxu0 %v696_v3  ;;  %v828_v12 = vor.u32 %v899_v9, %v825_v10  ;;  %v865_v13 = vld [vmem:[%s1393_s1 + $0xcc] sm:$0xf0]  ;;  %v807_v14 = vld [vmem:[%s1393_s1 + $0x1c0] sm:$0xf]  ;;  %v863_v18 = vld [vmem:[%s1393_s1 + $0xc4] sm:$0xf] }
   0x5   :  { %v897_v15 = vld [vmem:[%s1393_s1 + $0x1cc] sm:$0xf0]  ;;  %439 = vmatpush.bf16.msra.mxu1 %v824_v7  ;;  %453 = vmatpush.bf16.msra.mxu2 %v700_v8  ;;  %v680_v16 = vor.u32 %v865_v13, %v679_v11  ;;  %v681_v19 = vld [vmem:[%s1393_s1 + $0xd0] sm:$0xf0]  ;;  %v895_v20 = vld [vmem:[%s1393_s1 + $0x1c4] sm:$0xf] }
   0x6   :  { %v808_v17 = vor.u32 %v897_v15, %v807_v14  ;;  %467 = vmatpush.bf16.msra.mxu3 %v828_v12  ;;  %v684_v21 = vor.u32 %v863_v18, %v681_v19  ;;  %v809_v22 = vld [vmem:[%s1393_s1 + $0x1d0] sm:$0xf0]  ;;  %v663_v23 = vld [vmem:[%s1393_s1 + $0xa0] sm:$0xf]  ;;  %v861_v24 = vld [vmem:[%s1393_s1 + $0xac] sm:$0xf0] }
   0x7   :  { %v812_v25 = vor.u32 %v895_v20, %v809_v22  ;;  %v791_v26 = vld [vmem:[%s1393_s1 + $0x1a0] sm:$0xf]  ;;  %v893_v27 = vld [vmem:[%s1393_s1 + $0x1ac] sm:$0xf0]  ;;  %v859_v28 = vld [vmem:[%s1393_s1 + $0xa4] sm:$0xf]  ;;  %v664_v29 = vor.u32 %v861_v24, %v663_v23 }
   0x8   :  { %426 = vmatpush.bf16.msra.mxu0 %v680_v16  ;;  %v665_v30 = vld [vmem:[%s1393_s1 + $0xb0] sm:$0xf0]  ;;  %v891_v31 = vld [vmem:[%s1393_s1 + $0x1a4] sm:$0xf]  ;;  %v792_v33 = vor.u32 %v893_v27, %v791_v26  ;;  %v647_v35 = vld [vmem:[%s1393_s1 + $0x80] sm:$0xf] }
   0x9   :  { %v793_v32 = vld [vmem:[%s1393_s1 + $0x1b0] sm:$0xf0]  ;;  %440 = vmatpush.bf16.msra.mxu1 %v808_v17  ;;  %454 = vmatpush.bf16.msra.mxu2 %v684_v21  ;;  %v668_v34 = vor.u32 %v859_v28, %v665_v30  ;;  %v857_v36 = vld [vmem:[%s1393_s1 + $0x8c] sm:$0xf0]  ;;  %v775_v37 = vld [vmem:[%s1393_s1 + $0x180] sm:$0xf] }
   0xa   :  { %468 = vmatpush.bf16.msra.mxu3 %v812_v25  ;;  %v796_v38 = vor.u32 %v891_v31, %v793_v32  ;;  %v889_v39 = vld [vmem:[%s1393_s1 + $0x18c] sm:$0xf0]  ;;  %v855_v40 = vld [vmem:[%s1393_s1 + $0x84] sm:$0xf]  ;;  %v649_v41 = vld [vmem:[%s1393_s1 + $0x90] sm:$0xf0]  ;;  %v648_v44 = vor.u32 %v857_v36, %v647_v35 }
   0xb   :  { %v887_v42 = vld [vmem:[%s1393_s1 + $0x184] sm:$0xf]  ;;  %v777_v43 = vld [vmem:[%s1393_s1 + $0x190] sm:$0xf0]  ;;  %v776_v45 = vor.u32 %v889_v39, %v775_v37  ;;  %v652_v46 = vor.u32 %v855_v40, %v649_v41  ;;  %v631_v47 = vld [vmem:[%s1393_s1 + $0x60] sm:$0xf] }
   0xc   :  { %427 = vmatpush.bf16.msra.mxu0 %v664_v29  ;;  %v853_v48 = vld [vmem:[%s1393_s1 + $0x6c] sm:$0xf0]  ;;  %v759_v49 = vld [vmem:[%s1393_s1 + $0x160] sm:$0xf]  ;;  %v780_v50 = vor.u32 %v887_v42, %v777_v43  ;;  %v851_v52 = vld [vmem:[%s1393_s1 + $0x64] sm:$0xf] }
   0xd   :  { %441 = vmatpush.bf16.msra.mxu1 %v792_v33  ;;  %455 = vmatpush.bf16.msra.mxu2 %v668_v34  ;;  %v885_v51 = vld [vmem:[%s1393_s1 + $0x16c] sm:$0xf0]  ;;  %v633_v53 = vld [vmem:[%s1393_s1 + $0x70] sm:$0xf0]  ;;  %v883_v54 = vld [vmem:[%s1393_s1 + $0x164] sm:$0xf]  ;;  %v632_v56 = vor.u32 %v853_v48, %v631_v47 }
   0xe   :  { %469 = vmatpush.bf16.msra.mxu3 %v796_v38  ;;  %v761_v55 = vld [vmem:[%s1393_s1 + $0x170] sm:$0xf0]  ;;  %v760_v57 = vor.u32 %v885_v51, %v759_v49  ;;  %v636_v58 = vor.u32 %v851_v52, %v633_v53  ;;  %v615_v59 = vld [vmem:[%s1393_s1 + $0x40] sm:$0xf]  ;;  %v849_v60 = vld [vmem:[%s1393_s1 + $0x4c] sm:$0xf0] }
   0xf   :  { %v743_v61 = vld [vmem:[%s1393_s1 + $0x140] sm:$0xf]  ;;  %v764_v62 = vor.u32 %v883_v54, %v761_v55  ;;  %v881_v63 = vld [vmem:[%s1393_s1 + $0x14c] sm:$0xf0]  ;;  %v847_v0 = vld [vmem:[%s1393_s1 + $0x44] sm:$0xf]  ;;  %v616_v4 = vor.u32 %v849_v60, %v615_v59 }
  0x10   :  { %428 = vmatpush.bf16.msra.mxu0 %v648_v44  ;;  %v617_v1 = vld [vmem:[%s1393_s1 + $0x50] sm:$0xf0]  ;;  %v879_v2 = vld [vmem:[%s1393_s1 + $0x144] sm:$0xf]  ;;  %v744_v5 = vor.u32 %v881_v63, %v743_v61  ;;  %v599_v7 = vld [vmem:[%s1393_s1 + $0x20] sm:$0xf] }
  0x11   :  { %442 = vmatpush.bf16.msra.mxu1 %v776_v45  ;;  %456 = vmatpush.bf16.msra.mxu2 %v652_v46  ;;  %v745_v3 = vld [vmem:[%s1393_s1 + $0x150] sm:$0xf0]  ;;  %v620_v6 = vor.u32 %v847_v0, %v617_v1  ;;  %v845_v8 = vld [vmem:[%s1393_s1 + $0x2c] sm:$0xf0]  ;;  %v727_v9 = vld [vmem:[%s1393_s1 + $0x120] sm:$0xf] }
  0x12   :  { %470 = vmatpush.bf16.msra.mxu3 %v780_v50  ;;  %v748_v10 = vor.u32 %v879_v2, %v745_v3  ;;  %v877_v11 = vld [vmem:[%s1393_s1 + $0x12c] sm:$0xf0]  ;;  %v843_v12 = vld [vmem:[%s1393_s1 + $0x24] sm:$0xf]  ;;  %v601_v13 = vld [vmem:[%s1393_s1 + $0x30] sm:$0xf0]  ;;  %v600_v16 = vor.u32 %v845_v8, %v599_v7 }
  0x13   :  { %v875_v14 = vld [vmem:[%s1393_s1 + $0x124] sm:$0xf]  ;;  %v729_v15 = vld [vmem:[%s1393_s1 + $0x130] sm:$0xf0]  ;;  %v583_v17 = vld [vmem:[%s1393_s1] sm:$0xf]  ;;  %v728_v20 = vor.u32 %v877_v11, %v727_v9  ;;  %v604_v21 = vor.u32 %v843_v12, %v601_v13 }
  0x14   :  { %429 = vmatpush.bf16.msra.mxu0 %v632_v56  ;;  %v841_v18 = vld [vmem:[%s1393_s1 + $0xc] sm:$0xf0]  ;;  %v711_v19 = vld [vmem:[%s1393_s1 + $0x100] sm:$0xf]  ;;  %v839_v23 = vld [vmem:[%s1393_s1 + $0x4] sm:$0xf]  ;;  %v732_v25 = vor.u32 %v875_v14, %v729_v15 }
  0x15   :  { %443 = vmatpush.bf16.msra.mxu1 %v760_v57  ;;  %457 = vmatpush.bf16.msra.mxu2 %v636_v58  ;;  %v873_v22 = vld [vmem:[%s1393_s1 + $0x10c] sm:$0xf0]  ;;  %v585_v24 = vld [vmem:[%s1393_s1 + $0x10] sm:$0xf0]  ;;  %v871_v26 = vld [vmem:[%s1393_s1 + $0x104] sm:$0xf]  ;;  %v584_v32 = vor.u32 %v841_v18, %v583_v17 }
  0x16   :  { %471 = vmatpush.bf16.msra.mxu3 %v764_v62  ;;  %v713_v27 = vld [vmem:[%s1393_s1 + $0x110] sm:$0xf0]  ;;  %v703_v28 = vld [vmem:[%s1393_s1 + $0xe8] sm:$0xf]  ;;  %v870_v29 = vld [vmem:[%s1393_s1 + $0xf4] sm:$0xf0]  ;;  %v712_v36 = vor.u32 %v873_v22, %v711_v19  ;;  %v588_v37 = vor.u32 %v839_v23, %v585_v24 }
  0x17   :  { %v831_v30 = vld [vmem:[%s1393_s1 + $0x1e8] sm:$0xf]  ;;  %v902_v31 = vld [vmem:[%s1393_s1 + $0x1f4] sm:$0xf0]  ;;  %v868_v33 = vld [vmem:[%s1393_s1 + $0xec] sm:$0xf]  ;;  %v716_v41 = vor.u32 %v871_v26, %v713_v27  ;;  %v704_v42 = vor.u32 %v870_v29, %v703_v28 }
  0x18   :  { %430 = vmatpush.bf16.msra.mxu0 %v616_v4  ;;  %v705_v34 = vld [vmem:[%s1393_s1 + $0xf8] sm:$0xf0]  ;;  %v900_v35 = vld [vmem:[%s1393_s1 + $0x1ec] sm:$0xf]  ;;  %v575_v39 = vld [vmem:[%s1394_s0] sm:$0xf]  ;;  %v832_v45 = vor.u32 %v902_v31, %v831_v30 }
  0x19   :  { %444 = vmatpush.bf16.msra.mxu1 %v744_v5  ;;  %458 = vmatpush.bf16.msra.mxu2 %v620_v6  ;;  %v833_v38 = vld [vmem:[%s1393_s1 + $0x1f8] sm:$0xf0]  ;;  %v838_v40 = vld [vmem:[%s1394_s0 + $0x4] sm:$0xf0]  ;;  %v866_v44 = vld [vmem:[%s1393_s1 + $0xd4] sm:$0xf0]  ;;  %v708_v46 = vor.u32 %v868_v33, %v705_v34 }
  0x1a   :  { %472 = vmatpush.bf16.msra.mxu3 %v748_v10  ;;  %v687_v43 = vld [vmem:[%s1393_s1 + $0xc8] sm:$0xf]  ;;  %v837_v48 = vld [vmem:[%s1394_s0 + $0x4] sm:$0xf]  ;;  %v577_v49 = vld [vmem:[%s1394_s0 + $0x8] sm:$0xf0]  ;;  %v836_v50 = vor.u32 %v900_v35, %v833_v38  ;;  %v1177_v54 = vor.u32 %v838_v40, %v575_v39 }
  0x1b   :  { %v815_v47 = vld [vmem:[%s1393_s1 + $0x1c8] sm:$0xf]  ;;  %v898_v51 = vld [vmem:[%s1393_s1 + $0x1d4] sm:$0xf0]  ;;  %v864_v52 = vld [vmem:[%s1393_s1 + $0xcc] sm:$0xf]  ;;  %v1185_v57 = vor.u32 %v837_v48, %v577_v49  ;;  %v688_v58 = vor.u32 %v866_v44, %v687_v43 }
  0x1c   :  { %431 = vmatpush.bf16.msra.mxu0 %v600_v16  ;;  %v689_v53 = vld [vmem:[%s1393_s1 + $0xd8] sm:$0xf0]  ;;  %v896_v55 = vld [vmem:[%s1393_s1 + $0x1cc] sm:$0xf]  ;;  %v816_v59 = vor.u32 %v898_v51, %v815_v47  ;;  %v671_v61 = vld [vmem:[%s1393_s1 + $0xa8] sm:$0xf] }
  0x1d   :  { %445 = vmatpush.bf16.msra.mxu1 %v728_v20  ;;  %459 = vmatpush.bf16.msra.mxu2 %v604_v21  ;;  %v817_v56 = vld [vmem:[%s1393_s1 + $0x1d8] sm:$0xf0]  ;;  %v692_v60 = vor.u32 %v864_v52, %v689_v53  ;;  %v862_v62 = vld [vmem:[%s1393_s1 + $0xb4] sm:$0xf0]  ;;  %v799_v63 = vld [vmem:[%s1393_s1 + $0x1a8] sm:$0xf] }
  0x1e   :  { %473 = vmatpush.bf16.msra.mxu3 %v732_v25  ;;  %v820_v0 = vor.u32 %v896_v55, %v817_v56  ;;  %v894_v1 = vld [vmem:[%s1393_s1 + $0x1b4] sm:$0xf0]  ;;  %v860_v2 = vld [vmem:[%s1393_s1 + $0xac] sm:$0xf]  ;;  %v673_v3 = vld [vmem:[%s1393_s1 + $0xb8] sm:$0xf0]  ;;  %v672_v6 = vor.u32 %v862_v62, %v671_v61 }
  0x1f   :  { %v892_v4 = vld [vmem:[%s1393_s1 + $0x1ac] sm:$0xf]  ;;  %v801_v5 = vld [vmem:[%s1393_s1 + $0x1b8] sm:$0xf0]  ;;  %v655_v7 = vld [vmem:[%s1393_s1 + $0x88] sm:$0xf]  ;;  %v800_v8 = vor.u32 %v894_v1, %v799_v63  ;;  %v676_v9 = vor.u32 %v860_v2, %v673_v3 }
  0x20   :  { %432 = vmatpush.bf16.msra.mxu0 %v584_v32  ;;  %v858_v10 = vld [vmem:[%s1393_s1 + $0x94] sm:$0xf0]  ;;  %v783_v11 = vld [vmem:[%s1393_s1 + $0x188] sm:$0xf]  ;;  %v83_v12 = vld [vmem:[%s1395_s2] sm:$0xff]  ;;  %v804_v13 = vor.u32 %v892_v4, %v801_v5  ;;  %v905_v17 = vmov 0  }
  0x21   :  { %446 = vmatpush.bf16.msra.mxu1 %v712_v36  ;;  %460 = vmatpush.bf16.msra.mxu2 %v588_v37  ;;  %v890_v14 = vld [vmem:[%s1393_s1 + $0x194] sm:$0xf0]  ;;  %v856_v15 = vld [vmem:[%s1393_s1 + $0x8c] sm:$0xf]  ;;  %v657_v16 = vld [vmem:[%s1393_s1 + $0x98] sm:$0xf0]  ;;  %v656_v20 = vor.u32 %v858_v10, %v655_v7 }
  0x22   :  { %474 = vmatpush.bf16.msra.mxu3 %v716_v41  ;;  %904 = vset.pattern.permute.xlu0 %v905_v17  ;;  %v888_v18 = vld [vmem:[%s1393_s1 + $0x18c] sm:$0xf]  ;;  %v785_v19 = vld [vmem:[%s1393_s1 + $0x198] sm:$0xf0]  ;;  %v784_v21 = vor.u32 %v890_v14, %v783_v11  ;;  %v660_v22 = vor.u32 %v856_v15, %v657_v16  ;;  %v639_v23 = vld [vmem:[%s1393_s1 + $0x68] sm:$0xf] }
  0x23   :  { %433 = vmatmul.bf16.vlgmr.msra.gmra.mxu0 %v1177_v54  ;;  %87 = vperm.xlu0 %904, %v83_v12   ;;  %v854_v24 = vld [vmem:[%s1393_s1 + $0x74] sm:$0xf0]  ;;  %v767_v25 = vld [vmem:[%s1393_s1 + $0x168] sm:$0xf]  ;;  %v788_v26 = vor.u32 %v888_v18, %v785_v19  ;;  %v852_v28 = vld [vmem:[%s1393_s1 + $0x6c] sm:$0xf] }
  0x24   :  { %481 = vmatpush.bf16.msrb.mxu0 %v704_v42  ;;  %461 = vmatmul.bf16.vlgmr.msra.gmra.mxu2 %v1177_v54  ;;  %v886_v27 = vld [vmem:[%s1393_s1 + $0x174] sm:$0xf0]  ;;  %v641_v29 = vld [vmem:[%s1393_s1 + $0x78] sm:$0xf0]  ;;  %v884_v30 = vld [vmem:[%s1393_s1 + $0x16c] sm:$0xf]  ;;  %v640_v32 = vor.u32 %v854_v24, %v639_v23 }
  0x25   :  { %495 = vmatpush.bf16.msrb.mxu1 %v832_v45  ;;  %509 = vmatpush.bf16.msrb.mxu2 %v708_v46  ;;  %v769_v31 = vld [vmem:[%s1393_s1 + $0x178] sm:$0xf0]  ;;  %v84_v33 = vld [vmem:[%s1395_s2 + $0x8] sm:$0xff]  ;;  %v768_v34 = vor.u32 %v886_v27, %v767_v25  ;;  %v644_v35 = vor.u32 %v852_v28, %v641_v29  ;;  %v850_v37 = vld [vmem:[%s1393_s1 + $0x54] sm:$0xf0] }
  0x26   :  { %523 = vmatpush.bf16.msrb.mxu3 %v836_v50  ;;  %447 = vmatmul.bf16.vlgmr.msra.gmra.mxu1 %v1185_v57  ;;  %v623_v36 = vld [vmem:[%s1393_s1 + $0x48] sm:$0xf]  ;;  %v772_v39 = vor.u32 %v884_v30, %v769_v31  ;;  %v882_v40 = vld [vmem:[%s1393_s1 + $0x154] sm:$0xf0]  ;;  %v848_v41 = vld [vmem:[%s1393_s1 + $0x4c] sm:$0xf] }
  0x27   :  { %475 = vmatmul.bf16.vlgmr.msra.gmra.mxu3 %v1185_v57  ;;  %v751_v38 = vld [vmem:[%s1393_s1 + $0x148] sm:$0xf]  ;;  %v625_v42 = vld [vmem:[%s1393_s1 + $0x58] sm:$0xf0]  ;;  %v880_v43 = vld [vmem:[%s1393_s1 + $0x14c] sm:$0xf]  ;;  %v624_v45 = vor.u32 %v850_v37, %v623_v36 }
  0x28   :  { %482 = vmatpush.bf16.msrb.mxu0 %v688_v58  ;;  %v753_v44 = vld [vmem:[%s1393_s1 + $0x158] sm:$0xf0]  ;;  %v752_v46 = vor.u32 %v882_v40, %v751_v38  ;;  %v628_v47 = vor.u32 %v848_v41, %v625_v42  ;;  %v607_v48 = vld [vmem:[%s1393_s1 + $0x28] sm:$0xf]  ;;  %v846_v49 = vld [vmem:[%s1393_s1 + $0x34] sm:$0xf0] }
  0x29   :  { %496 = vmatpush.bf16.msrb.mxu1 %v816_v59  ;;  %510 = vmatpush.bf16.msrb.mxu2 %v692_v60  ;;  %v735_v50 = vld [vmem:[%s1393_s1 + $0x128] sm:$0xf]  ;;  %v756_v51 = vor.u32 %v880_v43, %v753_v44  ;;  %v878_v52 = vld [vmem:[%s1393_s1 + $0x134] sm:$0xf0]  ;;  %v844_v53 = vld [vmem:[%s1393_s1 + $0x2c] sm:$0xf]  ;;  %v608_v59 = vor.u32 %v846_v49, %v607_v48 }
  0x2a   :  { %524 = vmatpush.bf16.msrb.mxu3 %v820_v0  ;;  %v609_v55 = vld [vmem:[%s1393_s1 + $0x38] sm:$0xf0]  ;;  %v876_v56 = vld [vmem:[%s1393_s1 + $0x12c] sm:$0xf]  ;;  %v736_v60 = vor.u32 %v878_v52, %v735_v50  ;;  %v591_v62 = vld [vmem:[%s1393_s1 + $0x8] sm:$0xf] }
  0x2b   :  { %92 = vperm.xlu0 %904, %v84_v33   ;;  %v737_v58 = vld [vmem:[%s1393_s1 + $0x138] sm:$0xf0]  ;;  %v612_v61 = vor.u32 %v844_v53, %v609_v55  ;;  %v842_v63 = vld [vmem:[%s1393_s1 + $0x14] sm:$0xf0]  ;;  %v719_v0 = vld [vmem:[%s1393_s1 + $0x108] sm:$0xf] }
  0x2c   :  { %483 = vmatpush.bf16.msrb.mxu0 %v672_v6  ;;  %v740_v1 = vor.u32 %v876_v56, %v737_v58  ;;  %v874_v2 = vld [vmem:[%s1393_s1 + $0x114] sm:$0xf0]  ;;  %v840_v3 = vld [vmem:[%s1393_s1 + $0xc] sm:$0xf]  ;;  %v593_v4 = vld [vmem:[%s1393_s1 + $0x18] sm:$0xf0]  ;;  %v592_v7 = vor.u32 %v842_v63, %v591_v62 }
  0x2d   :  { %497 = vmatpush.bf16.msrb.mxu1 %v800_v8  ;;  %511 = vmatpush.bf16.msrb.mxu2 %v676_v9  ;;  %v872_v5 = vld [vmem:[%s1393_s1 + $0x10c] sm:$0xf]  ;;  %v721_v6 = vld [vmem:[%s1393_s1 + $0x118] sm:$0xf0]  ;;  %v720_v8 = vor.u32 %v874_v2, %v719_v0  ;;  %v596_v9 = vor.u32 %v840_v3, %v593_v4  ;;  %v537_v15 = vld [vmem:[%s1396_s3] sm:$0xff] }
  0x2e   :  { %525 = vmatpush.bf16.msrb.mxu3 %v804_v13  ;;  %v724_v10 = vor.u32 %v872_v5, %v721_v6  ;;  %v541_v27 = vld [vmem:[%s1396_s3 + $0x20] sm:$0xff]  ;;  %v539_v42 = vld [vmem:[%s1396_s3 + $0x10] sm:$0xff]  ;;  %v540_v50 = vld [vmem:[%s1396_s3 + $0x18] sm:$0xff] }
  0x2f   :  { %v543_v55 = vld [vmem:[%s1396_s3 + $0x30] sm:$0xff] }
  0x30   :  { %484 = vmatpush.bf16.msrb.mxu0 %v656_v20 }
  0x31   :  { %498 = vmatpush.bf16.msrb.mxu1 %v784_v21  ;;  %512 = vmatpush.bf16.msrb.mxu2 %v660_v22 }
  0x32   :  { %526 = vmatpush.bf16.msrb.mxu3 %v788_v26 }
  0x34   :  { %485 = vmatpush.bf16.msrb.mxu0 %v640_v32 }
  0x35   :  { %499 = vmatpush.bf16.msrb.mxu1 %v768_v34  ;;  %513 = vmatpush.bf16.msrb.mxu2 %v644_v35  ;;  %v542_v35 = vld [vmem:[%s1396_s3 + $0x28] sm:$0xff] }
  0x36   :  { %527 = vmatpush.bf16.msrb.mxu3 %v772_v39 }
  0x38   :  { %486 = vmatpush.bf16.msrb.mxu0 %v624_v45 }
  0x39   :  { %500 = vmatpush.bf16.msrb.mxu1 %v752_v46  ;;  %514 = vmatpush.bf16.msrb.mxu2 %v628_v47 }
  0x3a   :  { %528 = vmatpush.bf16.msrb.mxu3 %v756_v51 }
  0x3c   :  { %487 = vmatpush.bf16.msrb.mxu0 %v608_v59 }
  0x3d   :  { %501 = vmatpush.bf16.msrb.mxu1 %v736_v60  ;;  %515 = vmatpush.bf16.msrb.mxu2 %v612_v61 }
  0x3e   :  { %529 = vmatpush.bf16.msrb.mxu3 %v740_v1  ;;  %v544_v1 = vld [vmem:[%s1396_s3 + $0x38] sm:$0xff] }
  0x40   :  { %488 = vmatpush.bf16.msrb.mxu0 %v592_v7 }
  0x41   :  { %502 = vmatpush.bf16.msrb.mxu1 %v720_v8  ;;  %516 = vmatpush.bf16.msrb.mxu2 %v596_v9 }
  0x42   :  { %530 = vmatpush.bf16.msrb.mxu3 %v724_v10 }
  0x43   :  { %489 = vmatmul.bf16.vlgmr.msrb.gmra.mxu0 %v1177_v54 }
  0x44   :  { %503 = vmatmul.bf16.vlgmr.msrb.gmra.mxu1 %v1185_v57  ;;  %517 = vmatmul.bf16.vlgmr.msrb.gmra.mxu2 %v1177_v54  ;;  %v538_v54 = vld [vmem:[%s1396_s3 + $0x8] sm:$0xff] }
  0x45   :  { %531 = vmatmul.bf16.vlgmr.msrb.gmra.mxu3 %v1185_v57 }
  0x95   :  { %v88_v11 = vpop.permute.xlu0 %87 }
  0x9d   :  { %v93_v21 = vpop.permute.xlu0 %92 }
  0xa0   :  { %v434_v12 = vpop.f32.mrf.mxu0 }
  0xa1   :  { %v435_v13 = vadd.f32 %v434_v12, %v88_v11 }
  0xa3   :  { %v448_v14 = vpop.f32.mrf.mxu1 }
  0xa4   :  { %v449_v16 = vadd.f32 %v448_v14, %v435_v13 }
  0xa6   :  { %v545_v18 = vadd.f32 %v537_v15, %v449_v16 }
  0xa7   :  { %v462_v17 = vpop.f32.mrf.mxu2 }
  0xa8   :  { %v463_v19 = vadd.f32 %v462_v17, %v88_v11  ;;  %v553_v22 = vmax.f32 %v545_v18, 0.0  ;;  %v436_v23 = vpop.f32.mrf.mxu0 }
  0xa9   :  { %v437_v24 = vadd.f32 %v436_v23, %v93_v21 }
  0xaa   :  { %v476_v20 = vpop.f32.mrf.mxu3  ;;  %561 = vst [vmem:[%s1397_s4] sm:$0xff] %v553_v22 }
  0xab   :  { %v477_v57 = vadd.f32 %v476_v20, %v463_v19  ;;  %v450_v25 = vpop.f32.mrf.mxu1 }
  0xac   :  { %v451_v28 = vadd.f32 %v450_v25, %v437_v24 }
  0xad   :  { %v546_v26 = vadd.f32 %v538_v54, %v477_v57 }
  0xae   :  { %v549_v31 = vadd.f32 %v541_v27, %v451_v28 }
  0xaf   :  { %v554_v29 = vmax.f32 %v546_v26, 0.0  ;;  %v464_v30 = vpop.f32.mrf.mxu2 }
  0xb0   :  { %v465_v32 = vadd.f32 %v464_v30, %v93_v21  ;;  %v557_v34 = vmax.f32 %v549_v31, 0.0 }
  0xb1   :  { %562 = vst [vmem:[%s1397_s4 + $0x8] sm:$0xff] %v554_v29 }
  0xb2   :  { %v478_v33 = vpop.f32.mrf.mxu3  ;;  %565 = vst [vmem:[%s1397_s4 + $0x20] sm:$0xff] %v557_v34 }
  0xb3   :  { %v479_v36 = vadd.f32 %v478_v33, %v465_v32 }
  0xb5   :  { %v550_v37 = vadd.f32 %v542_v35, %v479_v36 }
  0xb7   :  { %v558_v38 = vmax.f32 %v550_v37, 0.0 }
  0xb9   :  { %566 = vst [vmem:[%s1397_s4 + $0x28] sm:$0xff] %v558_v38 }
  0xc0   :  { %v490_v39 = vpop.f32.mrf.mxu0 }
  0xc1   :  { %v491_v40 = vadd.f32 %v490_v39, %v88_v11  ;;  %v504_v41 = vpop.f32.mrf.mxu1 }
  0xc3   :  { %v505_v43 = vadd.f32 %v504_v41, %v491_v40 }
  0xc5   :  { %v547_v44 = vadd.f32 %v539_v42, %v505_v43 }
  0xc7   :  { %v555_v45 = vmax.f32 %v547_v44, 0.0  ;;  %v518_v46 = vpop.f32.mrf.mxu2 }
  0xc8   :  { %v519_v47 = vadd.f32 %v518_v46, %v88_v11  ;;  %v532_v48 = vpop.f32.mrf.mxu3  ;;  %v492_v49 = vpop.f32.mrf.mxu0 }
  0xc9   :  { %563 = vst [vmem:[%s1397_s4 + $0x10] sm:$0xff] %v555_v45  ;;  %v493_v51 = vadd.f32 %v492_v49, %v93_v21  ;;  %v506_v53 = vpop.f32.mrf.mxu1 }
  0xca   :  { %v533_v52 = vadd.f32 %v532_v48, %v519_v47 }
  0xcb   :  { %v507_v56 = vadd.f32 %v506_v53, %v493_v51 }
  0xcc   :  { %v548_v58 = vadd.f32 %v540_v50, %v533_v52 }
  0xcd   :  { %v551_v59 = vadd.f32 %v543_v55, %v507_v56 }
  0xce   :  { %v556_v60 = vmax.f32 %v548_v58, 0.0 }
  0xcf   :  { %v559_v61 = vmax.f32 %v551_v59, 0.0  ;;  %v520_v62 = vpop.f32.mrf.mxu2 }
  0xd0   :  { %564 = vst [vmem:[%s1397_s4 + $0x18] sm:$0xff] %v556_v60  ;;  %v521_v63 = vadd.f32 %v520_v62, %v93_v21  ;;  %v534_v0 = vpop.f32.mrf.mxu3 }
  0xd1   :  { %567 = vst [vmem:[%s1397_s4 + $0x30] sm:$0xff] %v559_v61 }
  0xd2   :  { %v535_v2 = vadd.f32 %v534_v0, %v521_v63 }
  0xd4   :  { %v552_v3 = vadd.f32 %v544_v1, %v535_v2 }
  0xd6   :  { %v560_v4 = vmax.f32 %v552_v3, 0.0 }
  0xd8   :  { %568 = vst [vmem:[%s1397_s4 + $0x38] sm:$0xff] %v560_v4 }

// kernel: _lambda_.18
= control target key start
LH: loop header
LB: loop body
LE: loop exit
PB: predicated region body
PF: predicated region fallthrough
CT: control target
= control target key end

     0   :  { %v359_v4 = vmov 0   ;;  %s476_s1 = inlined_call_operand.vmem [shape: bf16[256,128], index: 1, kind: input, shape index: {}]   ;;  %s477_s2 = inlined_call_operand.vmem [shape: f32[32,1], index: 2, kind: input, shape index: {}]   ;;  %s478_s0 = inlined_call_operand.vmem [shape: bf16[32,256], index: 0, kind: input, shape index: {}]   ;;  %s479_s3 = inlined_call_operand.vmem [shape: f32[32,128], index: 3, kind: output, shape index: {}]  }
   0x1   :  { %v331_v0 = vld [vmem:[%s476_s1 + $0x38] sm:$0xff]  ;;  %v330_v2 = vld [vmem:[%s476_s1 + $0x30] sm:$0xff]  ;;  %358 = vset.pattern.permute.xlu1 %v359_v4  ;;  %357 = vset.pattern.permute.xlu0 %v359_v4  ;;  %v329_v5 = vld [vmem:[%s476_s1 + $0x28] sm:$0xff] }
   0x2   :  { %v339_v1 = vld [vmem:[%s476_s1 + $0x78] sm:$0xff]  ;;  %190 = vmatpush.bf16.msra.mxu0 %v331_v0  ;;  %340 = vmatpush.bf16.msra.mxu2 %v331_v0  ;;  %v338_v3 = vld [vmem:[%s476_s1 + $0x70] sm:$0xff]  ;;  %v337_v6 = vld [vmem:[%s476_s1 + $0x68] sm:$0xff] }
   0x3   :  { %209 = vmatpush.bf16.msra.mxu1 %v339_v1  ;;  %348 = vmatpush.bf16.msra.mxu3 %v339_v1  ;;  %v52_v7 = vld [vmem:[%s477_s2 + $0x10] sm:$0xff]  ;;  %v50_v8 = vld [vmem:[%s477_s2] sm:$0xff]  ;;  %v327_v11 = vld [vmem:[%s476_s1 + $0x18] sm:$0xff] }
   0x4   :  { %66 = vperm.xlu1 %358, %v52_v7   ;;  %56 = vperm.xlu0 %357, %v50_v8   ;;  %v328_v9 = vld [vmem:[%s476_s1 + $0x20] sm:$0xff]  ;;  %v53_v12 = vld [vmem:[%s477_s2 + $0x18] sm:$0xff]  ;;  %v51_v13 = vld [vmem:[%s477_s2 + $0x8] sm:$0xff] }
   0x5   :  { %v336_v10 = vld [vmem:[%s476_s1 + $0x60] sm:$0xff]  ;;  %v335_v14 = vld [vmem:[%s476_s1 + $0x58] sm:$0xff]  ;;  %v326_v15 = vld [vmem:[%s476_s1 + $0x10] sm:$0xff] }
   0x6   :  { %191 = vmatpush.bf16.msra.mxu0 %v330_v2  ;;  %341 = vmatpush.bf16.msra.mxu2 %v330_v2  ;;  %v334_v16 = vld [vmem:[%s476_s1 + $0x50] sm:$0xff]  ;;  %v325_v17 = vld [vmem:[%s476_s1 + $0x8] sm:$0xff]  ;;  %v324_v19 = vld [vmem:[%s476_s1] sm:$0xff] }
   0x7   :  { %210 = vmatpush.bf16.msra.mxu1 %v338_v3  ;;  %349 = vmatpush.bf16.msra.mxu3 %v338_v3  ;;  %v333_v18 = vld [vmem:[%s476_s1 + $0x48] sm:$0xff]  ;;  %v332_v20 = vld [vmem:[%s476_s1 + $0x40] sm:$0xff]  ;;  %v250_v23 = vld [vmem:[%s478_s0 + $0x10] sm:$0xf] }
   0x8   :  { %v242_v21 = vld [vmem:[%s478_s0] sm:$0xf]  ;;  %v321_v22 = vld [vmem:[%s478_s0 + $0x4] sm:$0xf0]  ;;  %v323_v24 = vld [vmem:[%s478_s0 + $0x14] sm:$0xf0] }
   0x9   :  { %v320_v25 = vld [vmem:[%s478_s0 + $0x4] sm:$0xf]  ;;  %v244_v26 = vld [vmem:[%s478_s0 + $0x8] sm:$0xf0]  ;;  %v322_v27 = vld [vmem:[%s478_s0 + $0x14] sm:$0xf]  ;;  %v243_v29 = vor.u32 %v321_v22, %v242_v21  ;;  %v251_v30 = vor.u32 %v323_v24, %v250_v23 }
   0xa   :  { %192 = vmatpush.bf16.msra.mxu0 %v329_v5  ;;  %342 = vmatpush.bf16.msra.mxu2 %v329_v5  ;;  %v252_v28 = vld [vmem:[%s478_s0 + $0x18] sm:$0xf0]  ;;  %v247_v31 = vor.u32 %v320_v25, %v244_v26 }
   0xb   :  { %211 = vmatpush.bf16.msra.mxu1 %v337_v6  ;;  %350 = vmatpush.bf16.msra.mxu3 %v337_v6  ;;  %v255_v32 = vor.u32 %v322_v27, %v252_v28 }
   0xc   :  { %71 = vperm.xlu1 %358, %v53_v12   ;;  %61 = vperm.xlu0 %357, %v51_v13  }
   0xe   :  { %193 = vmatpush.bf16.msra.mxu0 %v328_v9  ;;  %343 = vmatpush.bf16.msra.mxu2 %v328_v9 }
   0xf   :  { %212 = vmatpush.bf16.msra.mxu1 %v336_v10  ;;  %351 = vmatpush.bf16.msra.mxu3 %v336_v10 }
  0x12   :  { %194 = vmatpush.bf16.msra.mxu0 %v327_v11  ;;  %344 = vmatpush.bf16.msra.mxu2 %v327_v11 }
  0x13   :  { %213 = vmatpush.bf16.msra.mxu1 %v335_v14  ;;  %352 = vmatpush.bf16.msra.mxu3 %v335_v14 }
  0x16   :  { %195 = vmatpush.bf16.msra.mxu0 %v326_v15  ;;  %345 = vmatpush.bf16.msra.mxu2 %v326_v15 }
  0x17   :  { %214 = vmatpush.bf16.msra.mxu1 %v334_v16  ;;  %353 = vmatpush.bf16.msra.mxu3 %v334_v16 }
  0x1a   :  { %196 = vmatpush.bf16.msra.mxu0 %v325_v17  ;;  %346 = vmatpush.bf16.msra.mxu2 %v325_v17 }
  0x1b   :  { %215 = vmatpush.bf16.msra.mxu1 %v333_v18  ;;  %354 = vmatpush.bf16.msra.mxu3 %v333_v18 }
  0x1e   :  { %197 = vmatpush.bf16.msra.mxu0 %v324_v19  ;;  %347 = vmatpush.bf16.msra.mxu2 %v324_v19 }
  0x1f   :  { %216 = vmatpush.bf16.msra.mxu1 %v332_v20  ;;  %355 = vmatpush.bf16.msra.mxu3 %v332_v20 }
  0x21   :  { %198 = vmatmul.bf16.vlgmr.msra.gmra.mxu0 %v243_v29  ;;  %203 = vmatmul.bf16.vlgmr.msra.gmra.mxu2 %v251_v30 }
  0x22   :  { %217 = vmatmul.bf16.vlgmr.msra.gmra.mxu1 %v247_v31  ;;  %222 = vmatmul.bf16.vlgmr.msra.gmra.mxu3 %v255_v32 }
  0x76   :  { %v57_v33 = vpop.permute.xlu0 %56  ;;  %v67_v38 = vpop.permute.xlu1 %66 }
  0x7e   :  { %v62_v43 = vpop.permute.xlu0 %61  ;;  %v72_v51 = vpop.permute.xlu1 %71 }
  0x9e   :  { %v199_v34 = vpop.f32.mrf.mxu0 }
  0x9f   :  { %v200_v35 = vadd.f32 %v199_v34, %v57_v33  ;;  %v218_v36 = vpop.f32.mrf.mxu1 }
  0xa1   :  { %v219_v37 = vadd.f32 %v218_v36, %v200_v35 }
  0xa3   :  { %v228_v39 = vmax.f32 %v219_v37, 0.0 }
  0xa4   :  { %v204_v40 = vpop.f32.mrf.mxu2 }
  0xa5   :  { %232 = vst [vmem:[%s479_s3] sm:$0xff] %v228_v39  ;;  %v205_v41 = vadd.f32 %v204_v40, %v67_v38  ;;  %v223_v42 = vpop.f32.mrf.mxu3 }
  0xa6   :  { %v201_v44 = vpop.f32.mrf.mxu0 }
  0xa7   :  { %v224_v45 = vadd.f32 %v223_v42, %v205_v41  ;;  %v202_v46 = vadd.f32 %v201_v44, %v62_v43  ;;  %v220_v47 = vpop.f32.mrf.mxu1 }
  0xa9   :  { %v230_v48 = vmax.f32 %v224_v45, 0.0  ;;  %v221_v49 = vadd.f32 %v220_v47, %v202_v46 }
  0xab   :  { %234 = vst [vmem:[%s479_s3 + $0x10] sm:$0xff] %v230_v48  ;;  %v229_v50 = vmax.f32 %v221_v49, 0.0 }
  0xac   :  { %v206_v52 = vpop.f32.mrf.mxu2 }
  0xad   :  { %233 = vst [vmem:[%s479_s3 + $0x8] sm:$0xff] %v229_v50  ;;  %v207_v53 = vadd.f32 %v206_v52, %v72_v51  ;;  %v225_v54 = vpop.f32.mrf.mxu3 }
  0xaf   :  { %v226_v55 = vadd.f32 %v225_v54, %v207_v53 }
  0xb1   :  { %v231_v56 = vmax.f32 %v226_v55, 0.0 }
  0xb3   :  { %235 = vst [vmem:[%s479_s3 + $0x18] sm:$0xff] %v231_v56 }

// kernel: _lambda_.19
= control target key start
LH: loop header
LB: loop body
LE: loop exit
PB: predicated region body
PF: predicated region fallthrough
CT: control target
= control target key end

     0   :  { %v206_v2 = vmov 0   ;;  %s281_s1 = inlined_call_operand.vmem [shape: bf16[128,128], index: 1, kind: input, shape index: {}]   ;;  %s282_s2 = inlined_call_operand.vmem [shape: f32[32,1], index: 2, kind: input, shape index: {}]   ;;  %s283_s0 = inlined_call_operand.vmem [shape: bf16[32,128], index: 0, kind: input, shape index: {}]   ;;  %s284_s3 = inlined_call_operand.vmem [shape: f32[32,128], index: 3, kind: output, shape index: {}]  }
   0x1   :  { %v194_v0 = vld [vmem:[%s281_s1 + $0x38] sm:$0xff]  ;;  %v193_v1 = vld [vmem:[%s281_s1 + $0x30] sm:$0xff]  ;;  %205 = vset.pattern.permute.xlu1 %v206_v2  ;;  %204 = vset.pattern.permute.xlu0 %v206_v2  ;;  %v34_v4 = vld [vmem:[%s282_s2] sm:$0xff] }
   0x2   :  { %118 = vmatpush.bf16.msra.mxu0 %v194_v0  ;;  %195 = vmatpush.bf16.msra.mxu1 %v194_v0  ;;  %v36_v3 = vld [vmem:[%s282_s2 + $0x10] sm:$0xff]  ;;  %v192_v5 = vld [vmem:[%s281_s1 + $0x28] sm:$0xff]  ;;  %v37_v6 = vld [vmem:[%s282_s2 + $0x18] sm:$0xff] }
   0x3   :  { %50 = vperm.xlu1 %205, %v36_v3   ;;  %40 = vperm.xlu0 %204, %v34_v4   ;;  %v35_v7 = vld [vmem:[%s282_s2 + $0x8] sm:$0xff]  ;;  %v191_v8 = vld [vmem:[%s281_s1 + $0x20] sm:$0xff]  ;;  %v190_v9 = vld [vmem:[%s281_s1 + $0x18] sm:$0xff] }
   0x4   :  { %v189_v10 = vld [vmem:[%s281_s1 + $0x10] sm:$0xff]  ;;  %v188_v11 = vld [vmem:[%s281_s1 + $0x8] sm:$0xff]  ;;  %v187_v12 = vld [vmem:[%s281_s1] sm:$0xff] }
   0x5   :  { %v185_v13 = vld [vmem:[%s283_s0] sm:$0xff]  ;;  %v186_v14 = vld [vmem:[%s283_s0 + $0x8] sm:$0xff] }
   0x6   :  { %119 = vmatpush.bf16.msra.mxu0 %v193_v1  ;;  %196 = vmatpush.bf16.msra.mxu1 %v193_v1 }
   0xa   :  { %120 = vmatpush.bf16.msra.mxu0 %v192_v5  ;;  %197 = vmatpush.bf16.msra.mxu1 %v192_v5 }
   0xb   :  { %55 = vperm.xlu1 %205, %v37_v6   ;;  %45 = vperm.xlu0 %204, %v35_v7  }
   0xe   :  { %121 = vmatpush.bf16.msra.mxu0 %v191_v8  ;;  %198 = vmatpush.bf16.msra.mxu1 %v191_v8 }
  0x12   :  { %122 = vmatpush.bf16.msra.mxu0 %v190_v9  ;;  %199 = vmatpush.bf16.msra.mxu1 %v190_v9 }
  0x16   :  { %123 = vmatpush.bf16.msra.mxu0 %v189_v10  ;;  %200 = vmatpush.bf16.msra.mxu1 %v189_v10 }
  0x1a   :  { %124 = vmatpush.bf16.msra.mxu0 %v188_v11  ;;  %201 = vmatpush.bf16.msra.mxu1 %v188_v11 }
  0x1e   :  { %125 = vmatpush.bf16.msra.mxu0 %v187_v12  ;;  %202 = vmatpush.bf16.msra.mxu1 %v187_v12 }
  0x21   :  { %126 = vmatmul.bf16.vlgmr.msra.gmra.mxu0 %v185_v13  ;;  %131 = vmatmul.bf16.vlgmr.msra.gmra.mxu1 %v186_v14 }
  0x75   :  { %v51_v15 = vpop.permute.xlu1 %50  ;;  %v41_v16 = vpop.permute.xlu0 %40 }
  0x7d   :  { %v56_v21 = vpop.permute.xlu1 %55  ;;  %v46_v22 = vpop.permute.xlu0 %45 }
  0x9e   :  { %v127_v17 = vpop.f32.mrf.mxu0  ;;  %v132_v18 = vpop.f32.mrf.mxu1 }
  0x9f   :  { %v128_v19 = vadd.f32 %v127_v17, %v41_v16  ;;  %v133_v20 = vadd.f32 %v132_v18, %v51_v15 }
  0xa1   :  { %137 = vst [vmem:[%s284_s3] sm:$0xff] %v128_v19 }
  0xa2   :  { %139 = vst [vmem:[%s284_s3 + $0x10] sm:$0xff] %v133_v20 }
  0xa6   :  { %v129_v23 = vpop.f32.mrf.mxu0  ;;  %v134_v24 = vpop.f32.mrf.mxu1 }
  0xa7   :  { %v130_v25 = vadd.f32 %v129_v23, %v46_v22  ;;  %v135_v26 = vadd.f32 %v134_v24, %v56_v21 }
  0xa9   :  { %138 = vst [vmem:[%s284_s3 + $0x8] sm:$0xff] %v130_v25 }
  0xaa   :  { %140 = vst [vmem:[%s284_s3 + $0x18] sm:$0xff] %v135_v26 }

// kernel: _lambda_.20
= control target key start
LH: loop header
LB: loop body
LE: loop exit
PB: predicated region body
PF: predicated region fallthrough
CT: control target
= control target key end

     0   :  { %v511_v6 = vmov 0   ;;  %s681_s1 = inlined_call_operand.vmem [shape: bf16[384,128], index: 1, kind: input, shape index: {}]   ;;  %s682_s2 = inlined_call_operand.vmem [shape: f32[32,1], index: 2, kind: input, shape index: {}]   ;;  %s683_s0 = inlined_call_operand.vmem [shape: bf16[32,384], index: 0, kind: input, shape index: {}]   ;;  %s684_s3 = inlined_call_operand.vmem [shape: f32[32,128], index: 3, kind: input, shape index: {}]   ;;  %s685_s4 = inlined_call_operand.vmem [shape: f32[32,128], index: 4, kind: output, shape index: {}]  }
   0x1   :  { %v483_v0 = vld [vmem:[%s681_s1 + $0x38] sm:$0xff]  ;;  %v482_v3 = vld [vmem:[%s681_s1 + $0x30] sm:$0xff]  ;;  %509 = vset.pattern.permute.xlu0 %v511_v6  ;;  %510 = vset.pattern.permute.xlu1 %v511_v6  ;;  %v481_v7 = vld [vmem:[%s681_s1 + $0x28] sm:$0xff] }
   0x2   :  { %v491_v1 = vld [vmem:[%s681_s1 + $0x78] sm:$0xff]  ;;  %273 = vmatpush.bf16.msra.mxu0 %v483_v0  ;;  %v490_v4 = vld [vmem:[%s681_s1 + $0x70] sm:$0xff]  ;;  %500 = vmatpush.bf16.msra.mxu3 %v483_v0  ;;  %v489_v8 = vld [vmem:[%s681_s1 + $0x68] sm:$0xff] }
   0x3   :  { %v499_v2 = vld [vmem:[%s681_s1 + $0xb8] sm:$0xff]  ;;  %292 = vmatpush.bf16.msra.mxu1 %v491_v1  ;;  %v498_v5 = vld [vmem:[%s681_s1 + $0xb0] sm:$0xff]  ;;  %v497_v9 = vld [vmem:[%s681_s1 + $0xa8] sm:$0xff] }
   0x4   :  { %311 = vmatpush.bf16.msra.mxu2 %v499_v2  ;;  %v480_v10 = vld [vmem:[%s681_s1 + $0x20] sm:$0xff]  ;;  %v479_v14 = vld [vmem:[%s681_s1 + $0x18] sm:$0xff]  ;;  %v478_v17 = vld [vmem:[%s681_s1 + $0x10] sm:$0xff] }
   0x5   :  { %v488_v11 = vld [vmem:[%s681_s1 + $0x60] sm:$0xff]  ;;  %v487_v15 = vld [vmem:[%s681_s1 + $0x58] sm:$0xff]  ;;  %v486_v18 = vld [vmem:[%s681_s1 + $0x50] sm:$0xff] }
   0x6   :  { %274 = vmatpush.bf16.msra.mxu0 %v482_v3  ;;  %501 = vmatpush.bf16.msra.mxu3 %v482_v3  ;;  %v73_v12 = vld [vmem:[%s682_s2] sm:$0xff]  ;;  %v495_v16 = vld [vmem:[%s681_s1 + $0x98] sm:$0xff]  ;;  %v74_v19 = vld [vmem:[%s682_s2 + $0x8] sm:$0xff] }
   0x7   :  { %293 = vmatpush.bf16.msra.mxu1 %v490_v4  ;;  %v496_v13 = vld [vmem:[%s681_s1 + $0xa0] sm:$0xff]  ;;  %79 = vperm.xlu0 %509, %v73_v12   ;;  %v75_v20 = vld [vmem:[%s682_s2 + $0x10] sm:$0xff]  ;;  %v477_v22 = vld [vmem:[%s681_s1 + $0x8] sm:$0xff] }
   0x8   :  { %312 = vmatpush.bf16.msra.mxu2 %v498_v5  ;;  %v494_v21 = vld [vmem:[%s681_s1 + $0x90] sm:$0xff]  ;;  %89 = vperm.xlu1 %510, %v75_v20   ;;  %v485_v23 = vld [vmem:[%s681_s1 + $0x48] sm:$0xff]  ;;  %v476_v25 = vld [vmem:[%s681_s1] sm:$0xff] }
   0x9   :  { %v493_v24 = vld [vmem:[%s681_s1 + $0x88] sm:$0xff]  ;;  %v484_v26 = vld [vmem:[%s681_s1 + $0x40] sm:$0xff]  ;;  %v76_v30 = vld [vmem:[%s682_s2 + $0x18] sm:$0xff] }
   0xa   :  { %275 = vmatpush.bf16.msra.mxu0 %v481_v7  ;;  %502 = vmatpush.bf16.msra.mxu3 %v481_v7  ;;  %v492_v27 = vld [vmem:[%s681_s1 + $0x80] sm:$0xff]  ;;  %v471_v29 = vld [vmem:[%s683_s0 + $0x8] sm:$0xf0]  ;;  %v354_v32 = vld [vmem:[%s683_s0 + $0xc] sm:$0xf0] }
   0xb   :  { %294 = vmatpush.bf16.msra.mxu1 %v489_v8  ;;  %v352_v28 = vld [vmem:[%s683_s0] sm:$0xf]  ;;  %v470_v31 = vld [vmem:[%s683_s0 + $0x4] sm:$0xf]  ;;  %v360_v33 = vld [vmem:[%s683_s0 + $0x8] sm:$0xf] }
   0xc   :  { %313 = vmatpush.bf16.msra.mxu2 %v497_v9  ;;  %v472_v34 = vld [vmem:[%s683_s0 + $0x10] sm:$0xf0]  ;;  %v364_v35 = vld [vmem:[%s683_s0 + $0x18] sm:$0xf]  ;;  %v474_v36 = vld [vmem:[%s683_s0 + $0x20] sm:$0xf0]  ;;  %v353_v37 = vor.u32 %v471_v29, %v352_v28  ;;  %v357_v38 = vor.u32 %v470_v31, %v354_v32 }
   0xd   :  { %v361_v39 = vor.u32 %v472_v34, %v360_v33  ;;  %v365_v40 = vor.u32 %v474_v36, %v364_v35  ;;  %v473_v41 = vld [vmem:[%s683_s0 + $0x1c] sm:$0xf]  ;;  %v366_v42 = vld [vmem:[%s683_s0 + $0x24] sm:$0xf0]  ;;  %v372_v43 = vld [vmem:[%s683_s0 + $0x20] sm:$0xf] }
   0xe   :  { %276 = vmatpush.bf16.msra.mxu0 %v480_v10  ;;  %503 = vmatpush.bf16.msra.mxu3 %v480_v10  ;;  %v475_v44 = vld [vmem:[%s683_s0 + $0x28] sm:$0xf0]  ;;  %v369_v45 = vor.u32 %v473_v41, %v366_v42  ;;  %v330_v53 = vld [vmem:[%s684_s3] sm:$0xff]  ;;  %v332_v9 = vld [vmem:[%s684_s3 + $0x10] sm:$0xff] }
   0xf   :  { %295 = vmatpush.bf16.msra.mxu1 %v488_v11  ;;  %84 = vperm.xlu0 %509, %v74_v19   ;;  %v373_v46 = vor.u32 %v475_v44, %v372_v43  ;;  %v331_v1 = vld [vmem:[%s684_s3 + $0x8] sm:$0xff]  ;;  %v333_v19 = vld [vmem:[%s684_s3 + $0x18] sm:$0xff] }
  0x10   :  { %314 = vmatpush.bf16.msra.mxu2 %v496_v13  ;;  %94 = vperm.xlu1 %510, %v76_v30  }
  0x12   :  { %277 = vmatpush.bf16.msra.mxu0 %v479_v14  ;;  %504 = vmatpush.bf16.msra.mxu3 %v479_v14 }
  0x13   :  { %296 = vmatpush.bf16.msra.mxu1 %v487_v15 }
  0x14   :  { %315 = vmatpush.bf16.msra.mxu2 %v495_v16 }
  0x16   :  { %278 = vmatpush.bf16.msra.mxu0 %v478_v17  ;;  %505 = vmatpush.bf16.msra.mxu3 %v478_v17 }
  0x17   :  { %297 = vmatpush.bf16.msra.mxu1 %v486_v18 }
  0x18   :  { %316 = vmatpush.bf16.msra.mxu2 %v494_v21 }
  0x1a   :  { %279 = vmatpush.bf16.msra.mxu0 %v477_v22  ;;  %506 = vmatpush.bf16.msra.mxu3 %v477_v22 }
  0x1b   :  { %298 = vmatpush.bf16.msra.mxu1 %v485_v23 }
  0x1c   :  { %317 = vmatpush.bf16.msra.mxu2 %v493_v24 }
  0x1e   :  { %280 = vmatpush.bf16.msra.mxu0 %v476_v25  ;;  %507 = vmatpush.bf16.msra.mxu3 %v476_v25 }
  0x1f   :  { %299 = vmatpush.bf16.msra.mxu1 %v484_v26 }
  0x20   :  { %318 = vmatpush.bf16.msra.mxu2 %v492_v27 }
  0x21   :  { %281 = vmatmul.bf16.vlgmr.msra.gmra.mxu0 %v353_v37  ;;  %286 = vmatmul.bf16.vlgmr.msra.gmra.mxu3 %v365_v40 }
  0x22   :  { %300 = vmatmul.bf16.vlgmr.msra.gmra.mxu1 %v357_v38 }
  0x23   :  { %319 = vmatmul.bf16.vlgmr.msra.gmra.mxu2 %v361_v39 }
  0x32   :  { %305 = vmatmul.bf16.gmra.mxu1 %v369_v45 }
  0x33   :  { %324 = vmatmul.bf16.gmra.mxu2 %v373_v46 }
  0x79   :  { %v80_v47 = vpop.permute.xlu0 %79 }
  0x7a   :  { %v90_v62 = vpop.permute.xlu1 %89 }
  0x81   :  { %v85_v54 = vpop.permute.xlu0 %84 }
  0x82   :  { %v95_v11 = vpop.permute.xlu1 %94 }
  0x9e   :  { %v282_v48 = vpop.f32.mrf.mxu0 }
  0x9f   :  { %v301_v49 = vpop.f32.mrf.mxu1  ;;  %v283_v50 = vadd.f32 %v282_v48, %v80_v47 }
  0xa1   :  { %v302_v51 = vadd.f32 %v301_v49, %v283_v50 }
  0xa4   :  { %v287_v63 = vpop.f32.mrf.mxu3 }
  0xa5   :  { %v288_v2 = vadd.f32 %v287_v63, %v90_v62 }
  0xa6   :  { %v320_v52 = vpop.f32.mrf.mxu2  ;;  %v284_v56 = vpop.f32.mrf.mxu0 }
  0xa7   :  { %v321_v55 = vadd.f32 %v320_v52, %v302_v51  ;;  %v303_v57 = vpop.f32.mrf.mxu1  ;;  %v285_v59 = vadd.f32 %v284_v56, %v85_v54 }
  0xa9   :  { %v334_v58 = vadd.f32 %v330_v53, %v321_v55  ;;  %v304_v61 = vadd.f32 %v303_v57, %v285_v59 }
  0xab   :  { %v338_v60 = vmax.f32 %v334_v58, 0.0 }
  0xac   :  { %v289_v12 = vpop.f32.mrf.mxu3 }
  0xad   :  { %342 = vst [vmem:[%s685_s4] sm:$0xff] %v338_v60  ;;  %v290_v15 = vadd.f32 %v289_v12, %v95_v11 }
  0xae   :  { %v322_v0 = vpop.f32.mrf.mxu2 }
  0xaf   :  { %v323_v3 = vadd.f32 %v322_v0, %v304_v61  ;;  %v306_v4 = vpop.f32.mrf.mxu1 }
  0xb0   :  { %v307_v7 = vadd.f32 %v306_v4, %v288_v2 }
  0xb1   :  { %v335_v5 = vadd.f32 %v331_v1, %v323_v3 }
  0xb3   :  { %v339_v6 = vmax.f32 %v335_v5, 0.0 }
  0xb5   :  { %343 = vst [vmem:[%s685_s4 + $0x8] sm:$0xff] %v339_v6 }
  0xb6   :  { %v325_v8 = vpop.f32.mrf.mxu2 }
  0xb7   :  { %v326_v10 = vadd.f32 %v325_v8, %v307_v7  ;;  %v308_v14 = vpop.f32.mrf.mxu1 }
  0xb8   :  { %v309_v17 = vadd.f32 %v308_v14, %v290_v15 }
  0xb9   :  { %v336_v13 = vadd.f32 %v332_v9, %v326_v10 }
  0xbb   :  { %v340_v16 = vmax.f32 %v336_v13, 0.0 }
  0xbd   :  { %344 = vst [vmem:[%s685_s4 + $0x10] sm:$0xff] %v340_v16 }
  0xbe   :  { %v327_v18 = vpop.f32.mrf.mxu2 }
  0xbf   :  { %v328_v20 = vadd.f32 %v327_v18, %v309_v17 }
  0xc1   :  { %v337_v21 = vadd.f32 %v333_v19, %v328_v20 }
  0xc3   :  { %v341_v22 = vmax.f32 %v337_v21, 0.0 }
  0xc5   :  { %345 = vst [vmem:[%s685_s4 + $0x18] sm:$0xff] %v341_v22 }

// kernel: _lambda_.21
= control target key start
LH: loop header
LB: loop body
LE: loop exit
PB: predicated region body
PF: predicated region fallthrough
CT: control target
= control target key end

     0   :  { %v633_v6 = vmov 0   ;;  %s846_s1 = inlined_call_operand.vmem [shape: bf16[384,128], index: 1, kind: input, shape index: {}]   ;;  %s847_s2 = inlined_call_operand.vmem [shape: f32[64,1], index: 2, kind: input, shape index: {}]   ;;  %s848_s0 = inlined_call_operand.vmem [shape: bf16[64,384], index: 0, kind: input, shape index: {}]   ;;  %s849_s3 = inlined_call_operand.vmem [shape: f32[64,128], index: 3, kind: output, shape index: {}]  }
   0x1   :  { %v604_v0 = vld [vmem:[%s846_s1 + $0x38] sm:$0xff]  ;;  %v603_v3 = vld [vmem:[%s846_s1 + $0x30] sm:$0xff]  ;;  %630 = vset.pattern.permute.xlu0 %v633_v6  ;;  %631 = vset.pattern.permute.xlu1 %v633_v6  ;;  %v602_v7 = vld [vmem:[%s846_s1 + $0x28] sm:$0xff] }
   0x2   :  { %v612_v1 = vld [vmem:[%s846_s1 + $0x78] sm:$0xff]  ;;  %334 = vmatpush.bf16.msra.mxu0 %v604_v0  ;;  %621 = vmatpush.bf16.msra.mxu3 %v604_v0  ;;  %v611_v4 = vld [vmem:[%s846_s1 + $0x70] sm:$0xff]  ;;  %v610_v8 = vld [vmem:[%s846_s1 + $0x68] sm:$0xff] }
   0x3   :  { %v620_v2 = vld [vmem:[%s846_s1 + $0xb8] sm:$0xff]  ;;  %363 = vmatpush.bf16.msra.mxu1 %v612_v1  ;;  %v619_v5 = vld [vmem:[%s846_s1 + $0xb0] sm:$0xff]  ;;  %632 = vset.pattern.permute.xlu2 %v633_v6  ;;  %v618_v9 = vld [vmem:[%s846_s1 + $0xa8] sm:$0xff] }
   0x4   :  { %392 = vmatpush.bf16.msra.mxu2 %v620_v2  ;;  %v601_v10 = vld [vmem:[%s846_s1 + $0x20] sm:$0xff]  ;;  %v600_v14 = vld [vmem:[%s846_s1 + $0x18] sm:$0xff]  ;;  %v599_v17 = vld [vmem:[%s846_s1 + $0x10] sm:$0xff] }
   0x5   :  { %v78_v11 = vld [vmem:[%s847_s2] sm:$0xff]  ;;  %v608_v15 = vld [vmem:[%s846_s1 + $0x58] sm:$0xff]  ;;  %v79_v18 = vld [vmem:[%s847_s2 + $0x8] sm:$0xff] }
   0x6   :  { %335 = vmatpush.bf16.msra.mxu0 %v603_v3  ;;  %622 = vmatpush.bf16.msra.mxu3 %v603_v3  ;;  %v609_v12 = vld [vmem:[%s846_s1 + $0x60] sm:$0xff]  ;;  %v616_v16 = vld [vmem:[%s846_s1 + $0x98] sm:$0xff]  ;;  %v80_v19 = vld [vmem:[%s847_s2 + $0x10] sm:$0xff] }
   0x7   :  { %364 = vmatpush.bf16.msra.mxu1 %v611_v4  ;;  %v617_v13 = vld [vmem:[%s846_s1 + $0xa0] sm:$0xff]  ;;  %88 = vperm.xlu0 %630, %v78_v11   ;;  %v607_v20 = vld [vmem:[%s846_s1 + $0x50] sm:$0xff]  ;;  %v598_v22 = vld [vmem:[%s846_s1 + $0x8] sm:$0xff] }
   0x8   :  { %393 = vmatpush.bf16.msra.mxu2 %v619_v5  ;;  %v615_v21 = vld [vmem:[%s846_s1 + $0x90] sm:$0xff]  ;;  %98 = vperm.xlu1 %631, %v80_v19   ;;  %v606_v23 = vld [vmem:[%s846_s1 + $0x48] sm:$0xff]  ;;  %v597_v25 = vld [vmem:[%s846_s1] sm:$0xff] }
   0x9   :  { %v614_v24 = vld [vmem:[%s846_s1 + $0x88] sm:$0xff]  ;;  %v605_v26 = vld [vmem:[%s846_s1 + $0x40] sm:$0xff]  ;;  %v81_v30 = vld [vmem:[%s847_s2 + $0x18] sm:$0xff] }
   0xa   :  { %336 = vmatpush.bf16.msra.mxu0 %v602_v7  ;;  %623 = vmatpush.bf16.msra.mxu3 %v602_v7  ;;  %v613_v27 = vld [vmem:[%s846_s1 + $0x80] sm:$0xff]  ;;  %v586_v29 = vld [vmem:[%s848_s0 + $0x8] sm:$0xf0]  ;;  %v455_v31 = vld [vmem:[%s848_s0 + $0x18] sm:$0xf] }
   0xb   :  { %365 = vmatpush.bf16.msra.mxu1 %v610_v8  ;;  %v443_v28 = vld [vmem:[%s848_s0] sm:$0xf]  ;;  %v589_v32 = vld [vmem:[%s848_s0 + $0x20] sm:$0xf0]  ;;  %v445_v34 = vld [vmem:[%s848_s0 + $0xc] sm:$0xf0] }
   0xc   :  { %394 = vmatpush.bf16.msra.mxu2 %v618_v9  ;;  %v585_v33 = vld [vmem:[%s848_s0 + $0x4] sm:$0xf]  ;;  %v451_v35 = vld [vmem:[%s848_s0 + $0x8] sm:$0xf]  ;;  %v587_v36 = vld [vmem:[%s848_s0 + $0x10] sm:$0xf0]  ;;  %v444_v37 = vor.u32 %v586_v29, %v443_v28  ;;  %v456_v38 = vor.u32 %v589_v32, %v455_v31 }
   0xd   :  { %v448_v39 = vor.u32 %v585_v33, %v445_v34  ;;  %v452_v40 = vor.u32 %v587_v36, %v451_v35  ;;  %v467_v41 = vld [vmem:[%s848_s0 + $0x30] sm:$0xf]  ;;  %v592_v42 = vld [vmem:[%s848_s0 + $0x38] sm:$0xf0]  ;;  %v457_v44 = vld [vmem:[%s848_s0 + $0x24] sm:$0xf0] }
   0xe   :  { %337 = vmatpush.bf16.msra.mxu0 %v601_v10  ;;  %624 = vmatpush.bf16.msra.mxu3 %v601_v10  ;;  %v588_v43 = vld [vmem:[%s848_s0 + $0x1c] sm:$0xf]  ;;  %v463_v45 = vld [vmem:[%s848_s0 + $0x20] sm:$0xf]  ;;  %v590_v46 = vld [vmem:[%s848_s0 + $0x28] sm:$0xf0]  ;;  %v468_v47 = vor.u32 %v592_v42, %v467_v41 }
   0xf   :  { %366 = vmatpush.bf16.msra.mxu1 %v609_v12  ;;  %93 = vperm.xlu0 %630, %v79_v18   ;;  %v460_v48 = vor.u32 %v588_v43, %v457_v44  ;;  %v464_v49 = vor.u32 %v590_v46, %v463_v45  ;;  %v85_v50 = vld [vmem:[%s847_s2 + $0x38] sm:$0xff]  ;;  %v84_v51 = vld [vmem:[%s847_s2 + $0x30] sm:$0xff]  ;;  %v82_v52 = vld [vmem:[%s847_s2 + $0x20] sm:$0xff] }
  0x10   :  { %395 = vmatpush.bf16.msra.mxu2 %v617_v13  ;;  %103 = vperm.xlu1 %631, %v81_v30   ;;  %v83_v53 = vld [vmem:[%s847_s2 + $0x28] sm:$0xff]  ;;  %v595_v55 = vld [vmem:[%s848_s0 + $0x50] sm:$0xf0]  ;;  %v469_v57 = vld [vmem:[%s848_s0 + $0x3c] sm:$0xf0] }
  0x11   :  { %108 = vperm.xlu2 %632, %v82_v52   ;;  %v479_v54 = vld [vmem:[%s848_s0 + $0x48] sm:$0xf]  ;;  %v591_v56 = vld [vmem:[%s848_s0 + $0x34] sm:$0xf]  ;;  %v475_v58 = vld [vmem:[%s848_s0 + $0x38] sm:$0xf] }
  0x12   :  { %338 = vmatpush.bf16.msra.mxu0 %v600_v14  ;;  %625 = vmatpush.bf16.msra.mxu3 %v600_v14  ;;  %v593_v59 = vld [vmem:[%s848_s0 + $0x40] sm:$0xf0]  ;;  %v480_v60 = vor.u32 %v595_v55, %v479_v54  ;;  %v472_v61 = vor.u32 %v591_v56, %v469_v57  ;;  %v594_v63 = vld [vmem:[%s848_s0 + $0x4c] sm:$0xf]  ;;  %v481_v0 = vld [vmem:[%s848_s0 + $0x54] sm:$0xf0] }
  0x13   :  { %367 = vmatpush.bf16.msra.mxu1 %v608_v15  ;;  %v476_v62 = vor.u32 %v593_v59, %v475_v58  ;;  %v487_v1 = vld [vmem:[%s848_s0 + $0x50] sm:$0xf]  ;;  %v596_v2 = vld [vmem:[%s848_s0 + $0x58] sm:$0xf0]  ;;  %v484_v3 = vor.u32 %v594_v63, %v481_v0 }
  0x14   :  { %396 = vmatpush.bf16.msra.mxu2 %v616_v16  ;;  %v488_v4 = vor.u32 %v596_v2, %v487_v1 }
  0x16   :  { %339 = vmatpush.bf16.msra.mxu0 %v599_v17  ;;  %626 = vmatpush.bf16.msra.mxu3 %v599_v17 }
  0x17   :  { %368 = vmatpush.bf16.msra.mxu1 %v607_v20  ;;  %118 = vperm.xlu0 %630, %v84_v51  }
  0x18   :  { %397 = vmatpush.bf16.msra.mxu2 %v615_v21  ;;  %123 = vperm.xlu1 %631, %v85_v50  }
  0x19   :  { %113 = vperm.xlu2 %632, %v83_v53  }
  0x1a   :  { %340 = vmatpush.bf16.msra.mxu0 %v598_v22  ;;  %627 = vmatpush.bf16.msra.mxu3 %v598_v22 }
  0x1b   :  { %369 = vmatpush.bf16.msra.mxu1 %v606_v23 }
  0x1c   :  { %398 = vmatpush.bf16.msra.mxu2 %v614_v24 }
  0x1e   :  { %341 = vmatpush.bf16.msra.mxu0 %v597_v25  ;;  %628 = vmatpush.bf16.msra.mxu3 %v597_v25 }
  0x1f   :  { %370 = vmatpush.bf16.msra.mxu1 %v605_v26 }
  0x20   :  { %399 = vmatpush.bf16.msra.mxu2 %v613_v27 }
  0x21   :  { %342 = vmatmul.bf16.vlgmr.msra.gmra.mxu0 %v444_v37  ;;  %347 = vmatmul.bf16.vlgmr.msra.gmra.mxu3 %v456_v38 }
  0x22   :  { %371 = vmatmul.bf16.vlgmr.msra.gmra.mxu1 %v448_v39 }
  0x23   :  { %400 = vmatmul.bf16.vlgmr.msra.gmra.mxu2 %v452_v40 }
  0x31   :  { %352 = vmatmul.bf16.gmra.mxu3 %v468_v47 }
  0x32   :  { %376 = vmatmul.bf16.gmra.mxu1 %v460_v48 }
  0x33   :  { %405 = vmatmul.bf16.gmra.mxu2 %v464_v49 }
  0x41   :  { %357 = vmatmul.bf16.gmra.mxu3 %v480_v60 }
  0x42   :  { %381 = vmatmul.bf16.gmra.mxu1 %v472_v61 }
  0x43   :  { %410 = vmatmul.bf16.gmra.mxu2 %v476_v62 }
  0x52   :  { %386 = vmatmul.bf16.gmra.mxu1 %v484_v3 }
  0x53   :  { %415 = vmatmul.bf16.gmra.mxu2 %v488_v4 }
  0x6b   :  { %v109_v35 = vpop.permute.xlu2 %108 }
  0x73   :  { %v114_v45 = vpop.permute.xlu2 %113 }
  0x79   :  { %v89_v5 = vpop.permute.xlu0 %88 }
  0x7a   :  { %v99_v19 = vpop.permute.xlu1 %98 }
  0x81   :  { %v94_v10 = vpop.permute.xlu0 %93 }
  0x82   :  { %v104_v29 = vpop.permute.xlu1 %103 }
  0x89   :  { %v119_v53 = vpop.permute.xlu0 %118 }
  0x8a   :  { %v124_v62 = vpop.permute.xlu1 %123 }
  0x9e   :  { %v343_v6 = vpop.f32.mrf.mxu0 }
  0x9f   :  { %v344_v7 = vadd.f32 %v343_v6, %v89_v5  ;;  %v372_v8 = vpop.f32.mrf.mxu1 }
  0xa1   :  { %v373_v9 = vadd.f32 %v372_v8, %v344_v7 }
  0xa4   :  { %v348_v11 = vpop.f32.mrf.mxu3 }
  0xa5   :  { %v349_v21 = vadd.f32 %v348_v11, %v99_v19 }
  0xa6   :  { %v401_v12 = vpop.f32.mrf.mxu2  ;;  %v345_v14 = vpop.f32.mrf.mxu0 }
  0xa7   :  { %v402_v13 = vadd.f32 %v401_v12, %v373_v9  ;;  %v374_v15 = vpop.f32.mrf.mxu1  ;;  %v346_v17 = vadd.f32 %v345_v14, %v94_v10 }
  0xa9   :  { %v421_v16 = vmax.f32 %v402_v13, 0.0  ;;  %v375_v18 = vadd.f32 %v374_v15, %v346_v17 }
  0xab   :  { %429 = vst [vmem:[%s849_s3] sm:$0xff] %v421_v16 }
  0xac   :  { %v350_v23 = vpop.f32.mrf.mxu3 }
  0xad   :  { %v351_v33 = vadd.f32 %v350_v23, %v104_v29 }
  0xae   :  { %v403_v20 = vpop.f32.mrf.mxu2 }
  0xaf   :  { %v404_v22 = vadd.f32 %v403_v20, %v375_v18  ;;  %v377_v24 = vpop.f32.mrf.mxu1 }
  0xb0   :  { %v378_v26 = vadd.f32 %v377_v24, %v349_v21 }
  0xb1   :  { %v422_v25 = vmax.f32 %v404_v22, 0.0 }
  0xb3   :  { %430 = vst [vmem:[%s849_s3 + $0x8] sm:$0xff] %v422_v25 }
  0xb4   :  { %v353_v32 = vpop.f32.mrf.mxu3 }
  0xb5   :  { %v354_v37 = vadd.f32 %v353_v32, %v109_v35 }
  0xb6   :  { %v406_v27 = vpop.f32.mrf.mxu2 }
  0xb7   :  { %v407_v28 = vadd.f32 %v406_v27, %v378_v26  ;;  %v379_v30 = vpop.f32.mrf.mxu1 }
  0xb8   :  { %v380_v34 = vadd.f32 %v379_v30, %v351_v33 }
  0xb9   :  { %v423_v31 = vmax.f32 %v407_v28, 0.0 }
  0xbb   :  { %431 = vst [vmem:[%s849_s3 + $0x10] sm:$0xff] %v423_v31 }
  0xbc   :  { %v355_v42 = vpop.f32.mrf.mxu3 }
  0xbd   :  { %v356_v48 = vadd.f32 %v355_v42, %v114_v45 }
  0xbe   :  { %v408_v36 = vpop.f32.mrf.mxu2 }
  0xbf   :  { %v409_v38 = vadd.f32 %v408_v36, %v380_v34  ;;  %v382_v39 = vpop.f32.mrf.mxu1 }
  0xc0   :  { %v383_v41 = vadd.f32 %v382_v39, %v354_v37 }
  0xc1   :  { %v424_v40 = vmax.f32 %v409_v38, 0.0 }
  0xc3   :  { %432 = vst [vmem:[%s849_s3 + $0x18] sm:$0xff] %v424_v40 }
  0xc4   :  { %v358_v50 = vpop.f32.mrf.mxu3 }
  0xc5   :  { %v359_v56 = vadd.f32 %v358_v50, %v119_v53 }
  0xc6   :  { %v411_v43 = vpop.f32.mrf.mxu2 }
  0xc7   :  { %v412_v44 = vadd.f32 %v411_v43, %v383_v41  ;;  %v384_v46 = vpop.f32.mrf.mxu1 }
  0xc8   :  { %v385_v49 = vadd.f32 %v384_v46, %v356_v48 }
  0xc9   :  { %v425_v47 = vmax.f32 %v412_v44, 0.0 }
  0xcb   :  { %433 = vst [vmem:[%s849_s3 + $0x20] sm:$0xff] %v425_v47 }
  0xcc   :  { %v360_v60 = vpop.f32.mrf.mxu3 }
  0xcd   :  { %v361_v0 = vadd.f32 %v360_v60, %v124_v62 }
  0xce   :  { %v413_v51 = vpop.f32.mrf.mxu2 }
  0xcf   :  { %v414_v52 = vadd.f32 %v413_v51, %v385_v49  ;;  %v387_v54 = vpop.f32.mrf.mxu1 }
  0xd0   :  { %v388_v57 = vadd.f32 %v387_v54, %v359_v56 }
  0xd1   :  { %v426_v55 = vmax.f32 %v414_v52, 0.0 }
  0xd3   :  { %434 = vst [vmem:[%s849_s3 + $0x28] sm:$0xff] %v426_v55 }
  0xd6   :  { %v416_v58 = vpop.f32.mrf.mxu2 }
  0xd7   :  { %v417_v59 = vadd.f32 %v416_v58, %v388_v57  ;;  %v389_v63 = vpop.f32.mrf.mxu1 }
  0xd8   :  { %v390_v1 = vadd.f32 %v389_v63, %v361_v0 }
  0xd9   :  { %v427_v61 = vmax.f32 %v417_v59, 0.0 }
  0xdb   :  { %435 = vst [vmem:[%s849_s3 + $0x30] sm:$0xff] %v427_v61 }
  0xde   :  { %v418_v2 = vpop.f32.mrf.mxu2 }
  0xdf   :  { %v419_v3 = vadd.f32 %v418_v2, %v390_v1 }
  0xe1   :  { %v428_v4 = vmax.f32 %v419_v3, 0.0 }
  0xe3   :  { %436 = vst [vmem:[%s849_s3 + $0x38] sm:$0xff] %v428_v4 }

// kernel: _lambda_.22
= control target key start
LH: loop header
LB: loop body
LE: loop exit
PB: predicated region body
PF: predicated region fallthrough
CT: control target
= control target key end

     0   :  { %v287_v1 = vmov 0   ;;  %s392_s1 = inlined_call_operand.vmem [shape: bf16[128,128], index: 1, kind: input, shape index: {}]   ;;  %s393_s2 = inlined_call_operand.vmem [shape: f32[64,1], index: 2, kind: input, shape index: {}]   ;;  %s394_s0 = inlined_call_operand.vmem [shape: bf16[64,128], index: 0, kind: input, shape index: {}]   ;;  %s395_s3 = inlined_call_operand.vmem [shape: f32[64,128], index: 3, kind: output, shape index: {}]  }
   0x1   :  { %v258_v0 = vld [vmem:[%s392_s1 + $0x38] sm:$0xff]  ;;  %285 = vset.pattern.permute.xlu1 %v287_v1  ;;  %284 = vset.pattern.permute.xlu0 %v287_v1  ;;  %v257_v2 = vld [vmem:[%s392_s1 + $0x30] sm:$0xff]  ;;  %v38_v4 = vld [vmem:[%s393_s2] sm:$0xff] }
   0x2   :  { %286 = vset.pattern.permute.xlu2 %v287_v1  ;;  %158 = vmatpush.bf16.msra.mxu0 %v258_v0  ;;  %v40_v3 = vld [vmem:[%s393_s2 + $0x10] sm:$0xff]  ;;  %v256_v5 = vld [vmem:[%s392_s1 + $0x28] sm:$0xff]  ;;  %v42_v6 = vld [vmem:[%s393_s2 + $0x20] sm:$0xff] }
   0x3   :  { %259 = vmatpush.bf16.msra.mxu1 %v258_v0  ;;  %260 = vmatpush.bf16.msra.mxu2 %v258_v0  ;;  %v41_v7 = vld [vmem:[%s393_s2 + $0x18] sm:$0xff]  ;;  %v39_v8 = vld [vmem:[%s393_s2 + $0x8] sm:$0xff]  ;;  %v255_v9 = vld [vmem:[%s392_s1 + $0x20] sm:$0xff] }
   0x4   :  { %261 = vmatpush.bf16.msra.mxu3 %v258_v0  ;;  %58 = vperm.xlu1 %285, %v40_v3   ;;  %v43_v10 = vld [vmem:[%s393_s2 + $0x28] sm:$0xff]  ;;  %v254_v11 = vld [vmem:[%s392_s1 + $0x18] sm:$0xff]  ;;  %v44_v13 = vld [vmem:[%s393_s2 + $0x30] sm:$0xff] }
   0x5   :  { %48 = vperm.xlu0 %284, %v38_v4   ;;  %68 = vperm.xlu2 %286, %v42_v6   ;;  %v45_v12 = vld [vmem:[%s393_s2 + $0x38] sm:$0xff]  ;;  %v253_v14 = vld [vmem:[%s392_s1 + $0x10] sm:$0xff]  ;;  %v252_v15 = vld [vmem:[%s392_s1 + $0x8] sm:$0xff] }
   0x6   :  { %159 = vmatpush.bf16.msra.mxu0 %v257_v2  ;;  %v251_v16 = vld [vmem:[%s392_s1] sm:$0xff]  ;;  %v248_v18 = vld [vmem:[%s394_s0 + $0x8] sm:$0xff]  ;;  %v249_v19 = vld [vmem:[%s394_s0 + $0x10] sm:$0xff] }
   0x7   :  { %262 = vmatpush.bf16.msra.mxu1 %v257_v2  ;;  %263 = vmatpush.bf16.msra.mxu2 %v257_v2  ;;  %v247_v17 = vld [vmem:[%s394_s0] sm:$0xff]  ;;  %v250_v20 = vld [vmem:[%s394_s0 + $0x18] sm:$0xff] }
   0x8   :  { %264 = vmatpush.bf16.msra.mxu3 %v257_v2 }
   0xa   :  { %160 = vmatpush.bf16.msra.mxu0 %v256_v5 }
   0xb   :  { %265 = vmatpush.bf16.msra.mxu1 %v256_v5  ;;  %266 = vmatpush.bf16.msra.mxu2 %v256_v5 }
   0xc   :  { %267 = vmatpush.bf16.msra.mxu3 %v256_v5  ;;  %63 = vperm.xlu1 %285, %v41_v7  }
   0xd   :  { %53 = vperm.xlu0 %284, %v39_v8   ;;  %73 = vperm.xlu2 %286, %v43_v10  }
   0xe   :  { %161 = vmatpush.bf16.msra.mxu0 %v255_v9 }
   0xf   :  { %268 = vmatpush.bf16.msra.mxu1 %v255_v9  ;;  %269 = vmatpush.bf16.msra.mxu2 %v255_v9 }
  0x10   :  { %270 = vmatpush.bf16.msra.mxu3 %v255_v9 }
  0x12   :  { %162 = vmatpush.bf16.msra.mxu0 %v254_v11 }
  0x13   :  { %271 = vmatpush.bf16.msra.mxu1 %v254_v11  ;;  %272 = vmatpush.bf16.msra.mxu2 %v254_v11 }
  0x14   :  { %273 = vmatpush.bf16.msra.mxu3 %v254_v11  ;;  %83 = vperm.xlu1 %285, %v45_v12  }
  0x15   :  { %78 = vperm.xlu0 %284, %v44_v13  }
  0x16   :  { %163 = vmatpush.bf16.msra.mxu0 %v253_v14 }
  0x17   :  { %274 = vmatpush.bf16.msra.mxu1 %v253_v14  ;;  %275 = vmatpush.bf16.msra.mxu2 %v253_v14 }
  0x18   :  { %276 = vmatpush.bf16.msra.mxu3 %v253_v14 }
  0x1a   :  { %164 = vmatpush.bf16.msra.mxu0 %v252_v15 }
  0x1b   :  { %277 = vmatpush.bf16.msra.mxu1 %v252_v15  ;;  %278 = vmatpush.bf16.msra.mxu2 %v252_v15 }
  0x1c   :  { %279 = vmatpush.bf16.msra.mxu3 %v252_v15 }
  0x1e   :  { %165 = vmatpush.bf16.msra.mxu0 %v251_v16 }
  0x1f   :  { %280 = vmatpush.bf16.msra.mxu1 %v251_v16  ;;  %281 = vmatpush.bf16.msra.mxu2 %v251_v16 }
  0x20   :  { %282 = vmatpush.bf16.msra.mxu3 %v251_v16 }
  0x21   :  { %166 = vmatmul.bf16.vlgmr.msra.gmra.mxu0 %v247_v17 }
  0x22   :  { %171 = vmatmul.bf16.vlgmr.msra.gmra.mxu1 %v248_v18  ;;  %176 = vmatmul.bf16.vlgmr.msra.gmra.mxu2 %v249_v19 }
  0x23   :  { %181 = vmatmul.bf16.vlgmr.msra.gmra.mxu3 %v250_v20 }
  0x5f   :  { %v69_v29 = vpop.permute.xlu2 %68 }
  0x67   :  { %v74_v40 = vpop.permute.xlu2 %73 }
  0x76   :  { %v59_v22 = vpop.permute.xlu1 %58 }
  0x77   :  { %v49_v21 = vpop.permute.xlu0 %48 }
  0x7e   :  { %v64_v28 = vpop.permute.xlu1 %63 }
  0x7f   :  { %v54_v23 = vpop.permute.xlu0 %53 }
  0x86   :  { %v84_v39 = vpop.permute.xlu1 %83 }
  0x87   :  { %v79_v30 = vpop.permute.xlu0 %78 }
  0x9e   :  { %v167_v24 = vpop.f32.mrf.mxu0 }
  0x9f   :  { %v172_v25 = vpop.f32.mrf.mxu1  ;;  %v168_v26 = vadd.f32 %v167_v24, %v49_v21 }
  0xa0   :  { %v173_v27 = vadd.f32 %v172_v25, %v59_v22 }
  0xa1   :  { %187 = vst [vmem:[%s395_s3] sm:$0xff] %v168_v26 }
  0xa2   :  { %189 = vst [vmem:[%s395_s3 + $0x10] sm:$0xff] %v173_v27 }
  0xa5   :  { %v177_v31 = vpop.f32.mrf.mxu2 }
  0xa6   :  { %v182_v32 = vpop.f32.mrf.mxu3  ;;  %v178_v33 = vadd.f32 %v177_v31, %v69_v29  ;;  %v169_v35 = vpop.f32.mrf.mxu0 }
  0xa7   :  { %v183_v34 = vadd.f32 %v182_v32, %v79_v30  ;;  %v174_v36 = vpop.f32.mrf.mxu1  ;;  %v170_v37 = vadd.f32 %v169_v35, %v54_v23 }
  0xa8   :  { %v175_v38 = vadd.f32 %v174_v36, %v64_v28  ;;  %191 = vst [vmem:[%s395_s3 + $0x20] sm:$0xff] %v178_v33 }
  0xa9   :  { %193 = vst [vmem:[%s395_s3 + $0x30] sm:$0xff] %v183_v34 }
  0xaa   :  { %188 = vst [vmem:[%s395_s3 + $0x8] sm:$0xff] %v170_v37 }
  0xab   :  { %190 = vst [vmem:[%s395_s3 + $0x18] sm:$0xff] %v175_v38 }
  0xad   :  { %v179_v41 = vpop.f32.mrf.mxu2 }
  0xae   :  { %v184_v42 = vpop.f32.mrf.mxu3  ;;  %v180_v43 = vadd.f32 %v179_v41, %v74_v40 }
  0xaf   :  { %v185_v44 = vadd.f32 %v184_v42, %v84_v39 }
  0xb0   :  { %192 = vst [vmem:[%s395_s3 + $0x28] sm:$0xff] %v180_v43 }
  0xb1   :  { %194 = vst [vmem:[%s395_s3 + $0x38] sm:$0xff] %v185_v44 }

// kernel: _lambda_.23
= control target key start
LH: loop header
LB: loop body
LE: loop exit
PB: predicated region body
PF: predicated region fallthrough
CT: control target
= control target key end

     0   :  { %v1014_v8 = vmov 0   ;;  %s1364_s1 = inlined_call_operand.vmem [shape: bf16[640,128], index: 1, kind: input, shape index: {}]   ;;  %s1365_s2 = inlined_call_operand.vmem [shape: f32[64,1], index: 2, kind: input, shape index: {}]   ;;  %s1366_s0 = inlined_call_operand.vmem [shape: bf16[64,640], index: 0, kind: input, shape index: {}]   ;;  %s1367_s3 = inlined_call_operand.vmem [shape: f32[64,128], index: 3, kind: input, shape index: {}]   ;;  %s1368_s4 = inlined_call_operand.vmem [shape: f32[64,128], index: 4, kind: output, shape index: {}]  }
   0x1   :  { %v961_v0 = vld [vmem:[%s1364_s1 + $0x38] sm:$0xff]  ;;  %v960_v2 = vld [vmem:[%s1364_s1 + $0x30] sm:$0xff]  ;;  %v959_v6 = vld [vmem:[%s1364_s1 + $0x28] sm:$0xff]  ;;  %1011 = vset.pattern.permute.xlu0 %v1014_v8  ;;  %1012 = vset.pattern.permute.xlu1 %v1014_v8 }
   0x2   :  { %v977_v1 = vld [vmem:[%s1364_s1 + $0xb8] sm:$0xff]  ;;  %994 = vmatpush.bf16.msra.mxu1 %v961_v0  ;;  %513 = vmatpush.bf16.msra.mxu0 %v961_v0  ;;  %v976_v3 = vld [vmem:[%s1364_s1 + $0xb0] sm:$0xff]  ;;  %v975_v7 = vld [vmem:[%s1364_s1 + $0xa8] sm:$0xff] }
   0x3   :  { %571 = vmatpush.bf16.msra.mxu2 %v977_v1  ;;  %v985_v4 = vld [vmem:[%s1364_s1 + $0xf8] sm:$0xff]  ;;  %v984_v5 = vld [vmem:[%s1364_s1 + $0xf0] sm:$0xff]  ;;  %v983_v9 = vld [vmem:[%s1364_s1 + $0xe8] sm:$0xff]  ;;  %1013 = vset.pattern.permute.xlu2 %v1014_v8 }
   0x4   :  { %600 = vmatpush.bf16.msra.mxu3 %v985_v4  ;;  %v958_v10 = vld [vmem:[%s1364_s1 + $0x20] sm:$0xff]  ;;  %v957_v14 = vld [vmem:[%s1364_s1 + $0x18] sm:$0xff]  ;;  %v123_v17 = vld [vmem:[%s1365_s2 + $0x10] sm:$0xff] }
   0x5   :  { %v121_v11 = vld [vmem:[%s1365_s2] sm:$0xff]  ;;  %v973_v15 = vld [vmem:[%s1364_s1 + $0x98] sm:$0xff]  ;;  %v122_v18 = vld [vmem:[%s1365_s2 + $0x8] sm:$0xff]  ;;  %141 = vperm.xlu1 %1012, %v123_v17  }
   0x6   :  { %995 = vmatpush.bf16.msra.mxu1 %v960_v2  ;;  %514 = vmatpush.bf16.msra.mxu0 %v960_v2  ;;  %v974_v12 = vld [vmem:[%s1364_s1 + $0xa0] sm:$0xff]  ;;  %v981_v16 = vld [vmem:[%s1364_s1 + $0xd8] sm:$0xff]  ;;  %v956_v19 = vld [vmem:[%s1364_s1 + $0x10] sm:$0xff] }
   0x7   :  { %572 = vmatpush.bf16.msra.mxu2 %v976_v3  ;;  %131 = vperm.xlu0 %1011, %v121_v11   ;;  %v982_v13 = vld [vmem:[%s1364_s1 + $0xe0] sm:$0xff]  ;;  %v972_v20 = vld [vmem:[%s1364_s1 + $0x90] sm:$0xff]  ;;  %v955_v22 = vld [vmem:[%s1364_s1 + $0x8] sm:$0xff] }
   0x8   :  { %601 = vmatpush.bf16.msra.mxu3 %v984_v5  ;;  %v980_v21 = vld [vmem:[%s1364_s1 + $0xd0] sm:$0xff]  ;;  %v971_v23 = vld [vmem:[%s1364_s1 + $0x88] sm:$0xff]  ;;  %v954_v24 = vld [vmem:[%s1364_s1] sm:$0xff] }
   0x9   :  { %v736_v25 = vld [vmem:[%s1366_s0 + $0x50] sm:$0xf]  ;;  %v124_v26 = vld [vmem:[%s1365_s2 + $0x18] sm:$0xff]  ;;  %v946_v27 = vld [vmem:[%s1366_s0 + $0x60] sm:$0xf0] }
   0xa   :  { %996 = vmatpush.bf16.msra.mxu1 %v959_v6  ;;  %515 = vmatpush.bf16.msra.mxu0 %v959_v6  ;;  %v979_v28 = vld [vmem:[%s1364_s1 + $0xc8] sm:$0xff]  ;;  %v127_v29 = vld [vmem:[%s1365_s2 + $0x30] sm:$0xff]  ;;  %v969_v30 = vld [vmem:[%s1364_s1 + $0x78] sm:$0xff]  ;;  %v737_v37 = vor.u32 %v946_v27, %v736_v25 }
   0xb   :  { %573 = vmatpush.bf16.msra.mxu2 %v975_v7  ;;  %v696_v31 = vld [vmem:[%s1366_s0] sm:$0xf]  ;;  %v936_v32 = vld [vmem:[%s1366_s0 + $0x10] sm:$0xf0]  ;;  %v704_v34 = vld [vmem:[%s1366_s0 + $0x8] sm:$0xf] }
   0xc   :  { %602 = vmatpush.bf16.msra.mxu3 %v983_v9  ;;  %v970_v33 = vld [vmem:[%s1364_s1 + $0x80] sm:$0xff]  ;;  %v937_v35 = vld [vmem:[%s1366_s0 + $0x18] sm:$0xf0]  ;;  %v697_v38 = vor.u32 %v936_v32, %v696_v31  ;;  %v935_v41 = vld [vmem:[%s1366_s0 + $0xc] sm:$0xf] }
   0xd   :  { %146 = vperm.xlu1 %1012, %v124_v26   ;;  %v993_v36 = vld [vmem:[%s1364_s1 + $0x138] sm:$0xff]  ;;  %v705_v39 = vor.u32 %v937_v35, %v704_v34  ;;  %v978_v40 = vld [vmem:[%s1364_s1 + $0xc0] sm:$0xff]  ;;  %v968_v43 = vld [vmem:[%s1364_s1 + $0x70] sm:$0xff] }
   0xe   :  { %997 = vmatpush.bf16.msra.mxu1 %v958_v10  ;;  %516 = vmatpush.bf16.msra.mxu0 %v958_v10  ;;  %v706_v42 = vld [vmem:[%s1366_s0 + $0x1c] sm:$0xf0]  ;;  %v992_v44 = vld [vmem:[%s1364_s1 + $0x130] sm:$0xff]  ;;  %v128_v47 = vld [vmem:[%s1365_s2 + $0x38] sm:$0xff] }
   0xf   :  { %574 = vmatpush.bf16.msra.mxu2 %v974_v12  ;;  %136 = vperm.xlu0 %1011, %v122_v18   ;;  %v709_v45 = vor.u32 %v935_v41, %v706_v42  ;;  %v125_v46 = vld [vmem:[%s1365_s2 + $0x20] sm:$0xff]  ;;  %v967_v48 = vld [vmem:[%s1364_s1 + $0x68] sm:$0xff]  ;;  %v756_v53 = vld [vmem:[%s1366_s0 + $0x78] sm:$0xf] }
  0x10   :  { %603 = vmatpush.bf16.msra.mxu3 %v982_v13  ;;  %151 = vperm.xlu2 %1013, %v125_v46   ;;  %v991_v49 = vld [vmem:[%s1364_s1 + $0x128] sm:$0xff]  ;;  %v966_v50 = vld [vmem:[%s1364_s1 + $0x60] sm:$0xff]  ;;  %v941_v56 = vld [vmem:[%s1366_s0 + $0x38] sm:$0xf0] }
  0x11   :  { %v990_v51 = vld [vmem:[%s1364_s1 + $0x120] sm:$0xff]  ;;  %v126_v52 = vld [vmem:[%s1365_s2 + $0x28] sm:$0xff]  ;;  %v965_v57 = vld [vmem:[%s1364_s1 + $0x58] sm:$0xff] }
  0x12   :  { %998 = vmatpush.bf16.msra.mxu1 %v957_v14  ;;  %517 = vmatpush.bf16.msra.mxu0 %v957_v14  ;;  %v951_v54 = vld [vmem:[%s1366_s0 + $0x88] sm:$0xf0]  ;;  %v716_v55 = vld [vmem:[%s1366_s0 + $0x28] sm:$0xf]  ;;  %v724_v58 = vld [vmem:[%s1366_s0 + $0x30] sm:$0xf] }
  0x13   :  { %575 = vmatpush.bf16.msra.mxu2 %v973_v15  ;;  %v942_v59 = vld [vmem:[%s1366_s0 + $0x40] sm:$0xf0]  ;;  %v989_v60 = vld [vmem:[%s1364_s1 + $0x118] sm:$0xff]  ;;  %v757_v61 = vor.u32 %v951_v54, %v756_v53  ;;  %v717_v62 = vor.u32 %v941_v56, %v716_v55  ;;  %v940_v0 = vld [vmem:[%s1366_s0 + $0x34] sm:$0xf] }
  0x14   :  { %604 = vmatpush.bf16.msra.mxu3 %v981_v16  ;;  %v725_v63 = vor.u32 %v942_v59, %v724_v58  ;;  %v726_v1 = vld [vmem:[%s1366_s0 + $0x44] sm:$0xf0]  ;;  %v964_v2 = vld [vmem:[%s1364_s1 + $0x50] sm:$0xff]  ;;  %v962_v7 = vld [vmem:[%s1364_s1 + $0x40] sm:$0xff] }
  0x15   :  { %166 = vperm.xlu1 %1012, %v128_v47   ;;  %v988_v3 = vld [vmem:[%s1364_s1 + $0x110] sm:$0xff]  ;;  %v729_v4 = vor.u32 %v940_v0, %v726_v1  ;;  %v963_v5 = vld [vmem:[%s1364_s1 + $0x48] sm:$0xff]  ;;  %v986_v8 = vld [vmem:[%s1364_s1 + $0x100] sm:$0xff] }
  0x16   :  { %999 = vmatpush.bf16.msra.mxu1 %v956_v19  ;;  %518 = vmatpush.bf16.msra.mxu0 %v956_v19  ;;  %v987_v6 = vld [vmem:[%s1364_s1 + $0x108] sm:$0xff]  ;;  %v934_v9 = vld [vmem:[%s1366_s0 + $0x4] sm:$0xf]  ;;  %v698_v10 = vld [vmem:[%s1366_s0 + $0x14] sm:$0xf0] }
  0x17   :  { %576 = vmatpush.bf16.msra.mxu2 %v972_v20  ;;  %161 = vperm.xlu0 %1011, %v127_v29   ;;  %v712_v11 = vld [vmem:[%s1366_s0 + $0x10] sm:$0xf]  ;;  %v938_v12 = vld [vmem:[%s1366_s0 + $0x20] sm:$0xf0]  ;;  %v744_v13 = vld [vmem:[%s1366_s0 + $0x58] sm:$0xf]  ;;  %v701_v15 = vor.u32 %v934_v9, %v698_v10 }
  0x18   :  { %605 = vmatpush.bf16.msra.mxu3 %v980_v21  ;;  %156 = vperm.xlu2 %1013, %v126_v52   ;;  %v947_v14 = vld [vmem:[%s1366_s0 + $0x68] sm:$0xf0]  ;;  %v713_v16 = vor.u32 %v938_v12, %v712_v11  ;;  %v945_v18 = vld [vmem:[%s1366_s0 + $0x5c] sm:$0xf]  ;;  %v746_v19 = vld [vmem:[%s1366_s0 + $0x6c] sm:$0xf0] }
  0x19   :  { %v745_v17 = vor.u32 %v947_v14, %v744_v13  ;;  %v749_v20 = vor.u32 %v945_v18, %v746_v19  ;;  %v939_v21 = vld [vmem:[%s1366_s0 + $0x2c] sm:$0xf]  ;;  %v764_v25 = vld [vmem:[%s1366_s0 + $0x80] sm:$0xf]  ;;  %v952_v26 = vld [vmem:[%s1366_s0 + $0x90] sm:$0xf0] }
  0x1a   :  { %1000 = vmatpush.bf16.msra.mxu1 %v955_v22  ;;  %519 = vmatpush.bf16.msra.mxu0 %v955_v22  ;;  %v718_v22 = vld [vmem:[%s1366_s0 + $0x3c] sm:$0xf0]  ;;  %v765_v29 = vor.u32 %v952_v26, %v764_v25  ;;  %v766_v31 = vld [vmem:[%s1366_s0 + $0x94] sm:$0xf0]  ;;  %v738_v34 = vld [vmem:[%s1366_s0 + $0x64] sm:$0xf0] }
  0x1b   :  { %577 = vmatpush.bf16.msra.mxu2 %v971_v23  ;;  %v732_v23 = vld [vmem:[%s1366_s0 + $0x38] sm:$0xf]  ;;  %v721_v27 = vor.u32 %v939_v21, %v718_v22  ;;  %v752_v35 = vld [vmem:[%s1366_s0 + $0x60] sm:$0xf]  ;;  %v949_v42 = vld [vmem:[%s1366_s0 + $0x7c] sm:$0xf] }
  0x1c   :  { %606 = vmatpush.bf16.msra.mxu3 %v979_v28 }
  0x1e   :  { %1001 = vmatpush.bf16.msra.mxu1 %v954_v24  ;;  %520 = vmatpush.bf16.msra.mxu0 %v954_v24  ;;  %v943_v24 = vld [vmem:[%s1366_s0 + $0x48] sm:$0xf0] }
  0x1f   :  { %578 = vmatpush.bf16.msra.mxu2 %v970_v33  ;;  %v733_v28 = vor.u32 %v943_v24, %v732_v23  ;;  %v944_v33 = vld [vmem:[%s1366_s0 + $0x54] sm:$0xf] }
  0x20   :  { %607 = vmatpush.bf16.msra.mxu3 %v978_v40 }
  0x21   :  { %531 = vmatmul.bf16.vlgmr.msra.gmra.mxu1 %v737_v37  ;;  %521 = vmatmul.bf16.vlgmr.msra.gmra.mxu0 %v697_v38  ;;  %v772_v37 = vld [vmem:[%s1366_s0 + $0x88] sm:$0xf]  ;;  %v953_v38 = vld [vmem:[%s1366_s0 + $0x98] sm:$0xf0] }
  0x22   :  { %542 = vmatpush.bf16.msrb.mxu1 %v969_v30  ;;  %629 = vmatpush.bf16.msrb.mxu0 %v993_v36  ;;  %v950_v30 = vld [vmem:[%s1366_s0 + $0x84] sm:$0xf]  ;;  %v773_v41 = vor.u32 %v953_v38, %v772_v37 }
  0x23   :  { %1002 = vmatpush.bf16.msrb.mxu2 %v993_v36  ;;  %608 = vmatmul.bf16.vlgmr.msra.gmra.mxu3 %v709_v45  ;;  %v769_v32 = vor.u32 %v950_v30, %v766_v31  ;;  %v948_v36 = vld [vmem:[%s1366_s0 + $0x70] sm:$0xf0] }
  0x24   :  { %579 = vmatmul.bf16.vlgmr.msra.gmra.mxu2 %v705_v39  ;;  %v741_v39 = vor.u32 %v944_v33, %v738_v34  ;;  %v753_v40 = vor.u32 %v948_v36, %v752_v35 }
  0x26   :  { %543 = vmatpush.bf16.msrb.mxu1 %v968_v43  ;;  %630 = vmatpush.bf16.msrb.mxu0 %v992_v44  ;;  %v758_v43 = vld [vmem:[%s1366_s0 + $0x8c] sm:$0xf0] }
  0x27   :  { %1003 = vmatpush.bf16.msrb.mxu2 %v992_v44  ;;  %v761_v44 = vor.u32 %v949_v42, %v758_v43 }
  0x2a   :  { %544 = vmatpush.bf16.msrb.mxu1 %v967_v48  ;;  %631 = vmatpush.bf16.msrb.mxu0 %v991_v49 }
  0x2b   :  { %1004 = vmatpush.bf16.msrb.mxu2 %v991_v49 }
  0x2e   :  { %545 = vmatpush.bf16.msrb.mxu1 %v966_v50  ;;  %632 = vmatpush.bf16.msrb.mxu0 %v990_v51 }
  0x2f   :  { %1005 = vmatpush.bf16.msrb.mxu2 %v990_v51 }
  0x31   :  { %536 = vmatmul.bf16.gmra.mxu1 %v757_v61  ;;  %526 = vmatmul.bf16.gmra.mxu0 %v717_v62 }
  0x32   :  { %546 = vmatpush.bf16.msrb.mxu1 %v965_v57  ;;  %633 = vmatpush.bf16.msrb.mxu0 %v989_v60 }
  0x33   :  { %1006 = vmatpush.bf16.msrb.mxu2 %v989_v60  ;;  %613 = vmatmul.bf16.gmra.mxu3 %v729_v4 }
  0x34   :  { %584 = vmatmul.bf16.gmra.mxu2 %v725_v63 }
  0x36   :  { %547 = vmatpush.bf16.msrb.mxu1 %v964_v2  ;;  %634 = vmatpush.bf16.msrb.mxu0 %v988_v3 }
  0x37   :  { %1007 = vmatpush.bf16.msrb.mxu2 %v988_v3  ;;  %v658_v3 = vld [vmem:[%s1367_s3] sm:$0xff] }
  0x3a   :  { %548 = vmatpush.bf16.msrb.mxu1 %v963_v5  ;;  %635 = vmatpush.bf16.msrb.mxu0 %v987_v6 }
  0x3b   :  { %1008 = vmatpush.bf16.msrb.mxu2 %v987_v6 }
  0x3e   :  { %549 = vmatpush.bf16.msrb.mxu1 %v962_v7  ;;  %636 = vmatpush.bf16.msrb.mxu0 %v986_v8 }
  0x3f   :  { %1009 = vmatpush.bf16.msrb.mxu2 %v986_v8 }
  0x41   :  { %550 = vmatmul.bf16.vlgmr.msrb.gmra.mxu1 %v701_v15  ;;  %637 = vmatmul.bf16.vlgmr.msrb.gmra.mxu0 %v713_v16  ;;  %v659_v16 = vld [vmem:[%s1367_s3 + $0x8] sm:$0xff] }
  0x43   :  { %618 = vmatmul.bf16.gmra.mxu3 %v749_v20 }
  0x44   :  { %589 = vmatmul.bf16.gmra.mxu2 %v745_v17 }
  0x51   :  { %555 = vmatmul.bf16.gmra.mxu1 %v721_v27  ;;  %642 = vmatmul.bf16.gmra.mxu0 %v733_v28 }
  0x53   :  { %623 = vmatmul.bf16.gmra.mxu3 %v769_v32 }
  0x54   :  { %594 = vmatmul.bf16.gmra.mxu2 %v765_v29  ;;  %v660_v29 = vld [vmem:[%s1367_s3 + $0x10] sm:$0xff] }
  0x61   :  { %560 = vmatmul.bf16.gmra.mxu1 %v741_v39  ;;  %647 = vmatmul.bf16.gmra.mxu0 %v753_v40 }
  0x64   :  { %652 = vmatmul.bf16.vlgmr.msrb.gmra.mxu2 %v773_v41  ;;  %v661_v41 = vld [vmem:[%s1367_s3 + $0x18] sm:$0xff] }
  0x6a   :  { %v152_v36 = vpop.permute.xlu2 %151 }
  0x71   :  { %565 = vmatmul.bf16.gmra.mxu1 %v761_v44 }
  0x77   :  { %v142_v13 = vpop.permute.xlu1 %141 }
  0x79   :  { %v132_v57 = vpop.permute.xlu0 %131 }
  0x7f   :  { %v147_v27 = vpop.permute.xlu1 %146 }
  0x81   :  { %v137_v2 = vpop.permute.xlu0 %136 }
  0x9e   :  { %v1304_v45 = vpop.f32.mrf.mxu1  ;;  %v522_v46 = vpop.f32.mrf.mxu0 }
  0x9f   :  { %v523_v58 = vadd.f32 %v522_v46, %v132_v57  ;;  %v533_v42 = vadd.f32 %v1304_v45, %v152_v36  ;;  %v662_v57 = vld [vmem:[%s1367_s3 + $0x20] sm:$0xff] }
  0xa6   :  { %v1306_v48 = vpop.f32.mrf.mxu1  ;;  %v524_v49 = vpop.f32.mrf.mxu0 }
  0xa7   :  { %v580_v47 = vpop.f32.mrf.mxu2  ;;  %v609_v53 = vpop.f32.mrf.mxu3  ;;  %v525_v4 = vadd.f32 %v524_v49, %v137_v2 }
  0xa8   :  { %v162_v2 = vpop.permute.xlu0 %161 }
  0xae   :  { %v1308_v51 = vpop.f32.mrf.mxu1  ;;  %v527_v52 = vpop.f32.mrf.mxu0 }
  0xaf   :  { %v582_v50 = vpop.f32.mrf.mxu2  ;;  %v611_v59 = vpop.f32.mrf.mxu3  ;;  %v528_v17 = vadd.f32 %v527_v52, %v142_v13 }
  0xb0   :  { %v167_v13 = vpop.permute.xlu1 %166 }
  0xb6   :  { %v1310_v55 = vpop.f32.mrf.mxu1  ;;  %v529_v56 = vpop.f32.mrf.mxu0 }
  0xb7   :  { %v585_v54 = vpop.f32.mrf.mxu2  ;;  %v614_v10 = vpop.f32.mrf.mxu3  ;;  %v530_v30 = vadd.f32 %v529_v56, %v147_v27 }
  0xbe   :  { %v551_v60 = vpop.f32.mrf.mxu1  ;;  %v638_v61 = vpop.f32.mrf.mxu0 }
  0xbf   :  { %v552_v62 = vadd.f32 %v551_v60, %v523_v58  ;;  %v587_v63 = vpop.f32.mrf.mxu2  ;;  %v616_v25 = vpop.f32.mrf.mxu3 }
  0xc1   :  { %v581_v0 = vadd.f32 %v580_v47, %v552_v62 }
  0xc3   :  { %v610_v1 = vadd.f32 %v609_v53, %v581_v0 }
  0xc5   :  { %v639_v5 = vadd.f32 %v638_v61, %v610_v1 }
  0xc6   :  { %v553_v6 = vpop.f32.mrf.mxu1  ;;  %v640_v7 = vpop.f32.mrf.mxu0 }
  0xc7   :  { %v666_v8 = vadd.f32 %v658_v3, %v639_v5  ;;  %v554_v9 = vadd.f32 %v553_v6, %v525_v4  ;;  %v590_v14 = vpop.f32.mrf.mxu2  ;;  %v619_v40 = vpop.f32.mrf.mxu3  ;;  %v663_v5 = vld [vmem:[%s1367_s3 + $0x28] sm:$0xff] }
  0xc9   :  { %v674_v11 = vmax.f32 %v666_v8, 0.0  ;;  %v583_v12 = vadd.f32 %v582_v50, %v554_v9 }
  0xcb   :  { %682 = vst [vmem:[%s1368_s4] sm:$0xff] %v674_v11  ;;  %v612_v15 = vadd.f32 %v611_v59, %v583_v12 }
  0xcd   :  { %v641_v18 = vadd.f32 %v640_v7, %v612_v15 }
  0xce   :  { %v556_v19 = vpop.f32.mrf.mxu1  ;;  %v643_v20 = vpop.f32.mrf.mxu0 }
  0xcf   :  { %v667_v21 = vadd.f32 %v659_v16, %v641_v18  ;;  %v557_v22 = vadd.f32 %v556_v19, %v528_v17  ;;  %v592_v28 = vpop.f32.mrf.mxu2  ;;  %v621_v59 = vpop.f32.mrf.mxu3  ;;  %v664_v16 = vld [vmem:[%s1367_s3 + $0x30] sm:$0xff] }
  0xd1   :  { %v675_v23 = vmax.f32 %v667_v21, 0.0  ;;  %v586_v24 = vadd.f32 %v585_v54, %v557_v22  ;;  %v157_v54 = vpop.permute.xlu2 %156 }
  0xd2   :  { %v535_v45 = vadd.f32 %v1306_v48, %v157_v54  ;;  %v538_v48 = vadd.f32 %v1308_v51, %v162_v2  ;;  %v540_v51 = vadd.f32 %v1310_v55, %v167_v13 }
  0xd3   :  { %683 = vst [vmem:[%s1368_s4 + $0x8] sm:$0xff] %v675_v23  ;;  %v615_v26 = vadd.f32 %v614_v10, %v586_v24 }
  0xd5   :  { %v644_v31 = vadd.f32 %v643_v20, %v615_v26  ;;  %v665_v26 = vld [vmem:[%s1367_s3 + $0x38] sm:$0xff] }
  0xd6   :  { %v558_v32 = vpop.f32.mrf.mxu1  ;;  %v645_v33 = vpop.f32.mrf.mxu0 }
  0xd7   :  { %v668_v34 = vadd.f32 %v660_v29, %v644_v31  ;;  %v559_v35 = vadd.f32 %v558_v32, %v530_v30  ;;  %v595_v44 = vpop.f32.mrf.mxu2  ;;  %v624_v10 = vpop.f32.mrf.mxu3 }
  0xd9   :  { %v676_v37 = vmax.f32 %v668_v34, 0.0  ;;  %v588_v38 = vadd.f32 %v587_v63, %v559_v35 }
  0xdb   :  { %684 = vst [vmem:[%s1368_s4 + $0x10] sm:$0xff] %v676_v37  ;;  %v617_v39 = vadd.f32 %v616_v25, %v588_v38 }
  0xdd   :  { %v646_v43 = vadd.f32 %v645_v33, %v617_v39 }
  0xde   :  { %v561_v46 = vpop.f32.mrf.mxu1  ;;  %v648_v50 = vpop.f32.mrf.mxu0 }
  0xdf   :  { %v669_v47 = vadd.f32 %v661_v41, %v646_v43  ;;  %v562_v49 = vadd.f32 %v561_v46, %v533_v42  ;;  %v597_v63 = vpop.f32.mrf.mxu2  ;;  %v626_v23 = vpop.f32.mrf.mxu3 }
  0xe1   :  { %v677_v52 = vmax.f32 %v669_v47, 0.0  ;;  %v591_v53 = vadd.f32 %v590_v14, %v562_v49 }
  0xe3   :  { %685 = vst [vmem:[%s1368_s4 + $0x18] sm:$0xff] %v677_v52  ;;  %v620_v56 = vadd.f32 %v619_v40, %v591_v53 }
  0xe5   :  { %v649_v58 = vadd.f32 %v648_v50, %v620_v56 }
  0xe6   :  { %v563_v60 = vpop.f32.mrf.mxu1  ;;  %v650_v3 = vpop.f32.mrf.mxu0 }
  0xe7   :  { %v670_v61 = vadd.f32 %v662_v57, %v649_v58  ;;  %v564_v62 = vadd.f32 %v563_v60, %v535_v45  ;;  %v653_v14 = vpop.f32.mrf.mxu2 }
  0xe9   :  { %v678_v0 = vmax.f32 %v670_v61, 0.0  ;;  %v593_v1 = vadd.f32 %v592_v28, %v564_v62 }
  0xeb   :  { %686 = vst [vmem:[%s1368_s4 + $0x20] sm:$0xff] %v678_v0  ;;  %v622_v4 = vadd.f32 %v621_v59, %v593_v1 }
  0xed   :  { %v651_v6 = vadd.f32 %v650_v3, %v622_v4 }
  0xee   :  { %v566_v7 = vpop.f32.mrf.mxu1 }
  0xef   :  { %v671_v8 = vadd.f32 %v663_v5, %v651_v6  ;;  %v567_v9 = vadd.f32 %v566_v7, %v538_v48  ;;  %v655_v25 = vpop.f32.mrf.mxu2 }
  0xf1   :  { %v679_v11 = vmax.f32 %v671_v8, 0.0  ;;  %v596_v12 = vadd.f32 %v595_v44, %v567_v9 }
  0xf3   :  { %687 = vst [vmem:[%s1368_s4 + $0x28] sm:$0xff] %v679_v11  ;;  %v625_v15 = vadd.f32 %v624_v10, %v596_v12 }
  0xf5   :  { %v654_v17 = vadd.f32 %v653_v14, %v625_v15 }
  0xf6   :  { %v568_v18 = vpop.f32.mrf.mxu1 }
  0xf7   :  { %v672_v19 = vadd.f32 %v664_v16, %v654_v17  ;;  %v569_v20 = vadd.f32 %v568_v18, %v540_v51 }
  0xf9   :  { %v680_v21 = vmax.f32 %v672_v19, 0.0  ;;  %v598_v22 = vadd.f32 %v597_v63, %v569_v20 }
  0xfb   :  { %688 = vst [vmem:[%s1368_s4 + $0x30] sm:$0xff] %v680_v21  ;;  %v627_v24 = vadd.f32 %v626_v23, %v598_v22 }
  0xfd   :  { %v656_v27 = vadd.f32 %v655_v25, %v627_v24 }
  0xff   :  { %v673_v28 = vadd.f32 %v665_v26, %v656_v27 }
 0x101   :  { %v681_v55 = vmax.f32 %v673_v28, 0.0 }
 0x103   :  { %689 = vst [vmem:[%s1368_s4 + $0x38] sm:$0xff] %v681_v55 }

</bundles_post_ra>
